<compile_context>
chip_gen: v7x
topology: tpu7x:2x2x1
jax: 0.10.0
libtpu: 0.0.40
codegen_flags: <defaults>
</compile_context>

<pallas_src>
import functools

import jax
import jax.numpy as jnp
from jax import lax
from jax.experimental import pallas as pl
from jax.experimental.pallas import tpu as pltpu


def _lblock_kernel(has_1x1, Ht, *refs):
    if has_1x1:
        (xt_ref, xm_ref, xb_ref, w1_ref, b1_ref, wa_ref, ba_ref, wb_ref,
         bb_ref, o_ref, pad1_ref, pad2_ref, patch_ref) = refs
    else:
        (xt_ref, xm_ref, xb_ref, wa_ref, ba_ref, wb_ref, bb_ref,
         o_ref, pad1_ref, pad2_ref, patch_ref) = refs

    _, _, W, Cin = xm_ref.shape
    Cout = o_ref.shape[-1]
    bf16 = jnp.bfloat16
    i = pl.program_id(1)
    last = pl.num_programs(1) - 1

    # ---- stage relu(x) tile + 2-row halos into the bf16 pad1 scratch --------
    # pad1 row r holds input row i*Ht - 2 + r (zeros beyond the image edge).
    # All stores below are full-width on the last two dims (outer-axis offsets
    # only), so no masked / sublane-offset bf16 stores are generated.
    x_mid = xm_ref[0]                                          # (Ht, W, Cin) f32
    top = jnp.where(i == 0, 0.0, jnp.maximum(xt_ref[0], 0.0))
    bot = jnp.where(i == last, 0.0, jnp.maximum(xb_ref[0], 0.0))
    pad1_ref[0:2] = top.astype(bf16)
    pad1_ref[2:Ht + 2] = jnp.maximum(x_mid, 0.0).astype(bf16)
    pad1_ref[Ht + 2:Ht + 4] = bot.astype(bf16)

    def conv3x3(pad_ref, rows_out, c, w_ref, b_ref):
        # im2col into the bf16 patch scratch (9 sliced stores, one per tap),
        # then a single MXU matmul with contraction dim 9*c; bias folded in
        # with one broadcast add.  Left/right zero padding of the conv is
        # materialized in-register for the dx=0 / dx=2 taps.
        m = rows_out * W
        zcol = jnp.zeros((rows_out, 1, c), bf16)
        t = 0
        for dy in range(3):
            slab = pad_ref[dy:dy + rows_out]                   # (rows_out, W, c)
            for dx in range(3):
                if dx == 0:
                    tap = jnp.concatenate([zcol, slab[:, :W - 1, :]], axis=1)
                elif dx == 1:
                    tap = slab
                else:
                    tap = jnp.concatenate([slab[:, 1:, :], zcol], axis=1)
                patch_ref[0:m, t * c:(t + 1) * c] = tap.reshape(m, c)
                t += 1
        return jnp.dot(patch_ref[0:m, 0:9 * c], w_ref[...],
                       preferred_element_type=jnp.float32) + b_ref[...]

    # ---- first 3x3 conv: Ht+2 rows (1-row halo for the second conv) ---------
    acc1 = conv3x3(pad1_ref, Ht + 2, Cin, wa_ref, ba_ref)      # ((Ht+2)*W, Cout)
    pad2_ref[...] = jnp.maximum(acc1, 0.0).reshape(Ht + 2, W, Cout).astype(bf16)

    # conv2 must see the image's zero padding at the top/bottom edge, not
    # conv1 evaluated on rows outside the image.
    @pl.when(i == 0)
    def _():
        pad2_ref[0:1] = jnp.zeros((1, W, Cout), bf16)

    @pl.when(i == last)
    def _():
        pad2_ref[Ht + 1:Ht + 2] = jnp.zeros((1, W, Cout), bf16)

    # ---- second 3x3 conv on the Ht central rows -----------------------------
    acc2 = conv3x3(pad2_ref, Ht, Cout, wb_ref, bb_ref)         # (Ht*W, Cout) f32

    # ---- residual add; assemble full width, then one full-block store -------
    x_flat = x_mid.reshape(Ht * W, Cin)
    if has_1x1:
        sc_extra = jnp.dot(x_flat.astype(bf16), w1_ref[...],
                           preferred_element_type=jnp.float32) + b1_ref[...]
        out = jnp.concatenate([acc2[:, :Cin] + x_flat,
                               acc2[:, Cin:] + sc_extra], axis=-1)
    else:
        out = acc2 + x_flat
    o_ref[0] = out.reshape(Ht, W, Cout).astype(o_ref.dtype)


def _pick_h_tile(H, W, cin, cout):
    """Largest even divisor of H whose bf16 scratch footprint fits a small
    per-tile budget.  TODO(synk): for production shapes also align Ht*W to a
    multiple of 256 (v6e/v7x MXU) and add channel tiling."""
    budget = 4 * 1024 * 1024  # bytes of bf16 scratch per tile
    best = 2
    for ht in range(2, H + 1, 2):
        if H % ht:
            continue
        scratch_bytes = 2 * ((ht + 4) * W * cin          # padded relu(x)
                             + (ht + 2) * W * cout       # padded relu(h1)
                             + (ht + 2) * W * 9 * cout)  # im2col slab
        if scratch_bytes <= budget:
            best = ht
    return best


def _vmem_limit_bytes():
    # Re-derive the scoped-VMEM limit per generation (v7x has 64 MiB physical
    # VMEM per TensorCore, v5e/v6e have 128 MiB); conservative fallback.
    try:
        cap = getattr(pltpu.get_tpu_info(), "vmem_capacity_bytes", None)
        if cap:
            return max(16 * 1024 * 1024,
                       min(int(cap) * 5 // 8, 96 * 1024 * 1024))
    except Exception:
        pass
    return 48 * 1024 * 1024


def lblock_forward(x, params, input_channels, output_channels, h_tile=None):
    """x: (N, H, W, Cin) float32, NHWC."""
    N, H, W, Cin = x.shape
    assert Cin == input_channels
    Cout = output_channels
    assert Cin <= Cout, "LBlock contract: input_channels <= output_channels"
    assert H % 2 == 0 and H >= 4, "kernel assumes an even image height >= 4"
    has_1x1 = Cin < Cout
    bf16 = jnp.bfloat16

    Ht = _pick_h_tile(H, W, Cin, Cout) if h_tile is None else int(h_tile)
    assert H % Ht == 0 and Ht % 2 == 0, "h_tile must be an even divisor of H"
    half = Ht // 2
    num_tiles = H // Ht
    last_halo_blk = H // 2 - 1

    # Pre-flatten the 3x3 weights (HWIO -> (9*C, Cout)) and cast MXU operands
    # to bf16 on the host; biases stay f32.
    wa_flat = params["wa"].reshape(9 * Cin, Cout).astype(bf16)
    wb_flat = params["wb"].reshape(9 * Cout, Cout).astype(bf16)
    ba = params["ba"].astype(jnp.float32).reshape(1, Cout)
    bb = params["bb"].astype(jnp.float32).reshape(1, Cout)

    # Overlapping 2-row halo windows expressed with plain Blocked specs on two
    # extra views of x:
    #   top rows [i*Ht-2, i*Ht)      -> 2-row block index i*Ht/2 - 1 (clamped)
    #   bottom rows [(i+1)*Ht, +2)   -> 2-row block index (i+1)*Ht/2 (clamped)
    # At the image edges the fetched block is ignored (kernel substitutes 0).
    x_specs = [
        pl.BlockSpec((1, 2, W, Cin),
                     lambda n, i: (n, jnp.maximum(i * half - 1, 0), 0, 0)),
        pl.BlockSpec((1, Ht, W, Cin), lambda n, i: (n, i, 0, 0)),
        pl.BlockSpec((1, 2, W, Cin),
                     lambda n, i: (n, jnp.minimum((i + 1) * half,
                                                  last_halo_blk), 0, 0)),
    ]

    w_args = []
    if has_1x1:
        w1 = params["w1"].reshape(Cin, Cout - Cin).astype(bf16)
        b1 = params["b1"].astype(jnp.float32).reshape(1, Cout - Cin)
        w_args += [w1, b1]
    w_args += [wa_flat, ba, wb_flat, bb]

    kernel = functools.partial(_lblock_kernel, has_1x1, Ht)

    def run(single_buffer_weights):
        def w_spec(shape):
            kwargs = {}
            if single_buffer_weights:
                # Grid-invariant operands: double-buffering them is pure VMEM
                # waste (matters at production channel counts on v7x).
                kwargs["pipeline_mode"] = pl.Buffered(1)
            return pl.BlockSpec(shape, lambda n, i, _r=len(shape): (0,) * _r,
                                **kwargs)

        return pl.pallas_call(
            kernel,
            out_shape=jax.ShapeDtypeStruct((N, H, W, Cout), x.dtype),
            grid_spec=pltpu.PrefetchScalarGridSpec(
                num_scalar_prefetch=0,
                grid=(N, num_tiles),
                in_specs=x_specs + [w_spec(a.shape) for a in w_args],
                out_specs=pl.BlockSpec((1, Ht, W, Cout),
                                       lambda n, i: (n, i, 0, 0)),
                scratch_shapes=[
                    pltpu.VMEM((Ht + 4, W, Cin), bf16),          # padded relu(x)
                    pltpu.VMEM((Ht + 2, W, Cout), bf16),         # padded relu(h1)
                    pltpu.VMEM(((Ht + 2) * W, 9 * Cout), bf16),  # im2col slab
                ],
            ),
            compiler_params=pltpu.CompilerParams(
                dimension_semantics=("parallel", "parallel"),
                vmem_limit_bytes=_vmem_limit_bytes()),
        )(x, x, x, *w_args)

    try:
        return run(single_buffer_weights=True)
    except Exception:
        # TODO(synk): drop this fallback once pl.Buffered(1) single-buffering
        # is guaranteed available on the deployed jax version.
        return run(single_buffer_weights=False)


# ------------- pure-JAX reference (mirrors the bf16 matmul operands) ---------
def _conv_bf16_ref(x, w_hwio, b, pad):
    y = lax.conv_general_dilated(
        x.astype(jnp.bfloat16), w_hwio.astype(jnp.bfloat16),
        window_strides=(1, 1), padding=[(pad, pad), (pad, pad)],
        dimension_numbers=("NHWC", "HWIO", "NHWC"),
        preferred_element_type=jnp.float32)
    return y + b.reshape(1, 1, 1, -1)


def lblock_ref(x, params, input_channels, output_channels):
    Cin, Cout = input_channels, output_channels
    if Cin < Cout:
        sc_extra = _conv_bf16_ref(x, params["w1"].reshape(1, 1, Cin, Cout - Cin),
                                  params["b1"].reshape(-1), pad=0)
        sc = jnp.concatenate([x, sc_extra], axis=-1)
    else:
        sc = x
    h = jax.nn.relu(x)
    h = _conv_bf16_ref(h, params["wa"], params["ba"].reshape(-1), pad=1)
    h = jax.nn.relu(h)
    h = _conv_bf16_ref(h, params["wb"], params["bb"].reshape(-1), pad=1)
    return h + sc


if __name__ == "__main__":
    N, H, W = 2, 16, 16

    def run_case(key, Cin, Cout, h_tile):
        ks = jax.random.split(key, 7)
        x = jax.random.normal(ks[0], (N, H, W, Cin), jnp.float32)
        params = {
            "wa": 0.1 * jax.random.normal(ks[3], (3, 3, Cin, Cout), jnp.float32),
            "ba": 0.1 * jax.random.normal(ks[4], (1, Cout), jnp.float32),
            "wb": 0.1 * jax.random.normal(ks[5], (3, 3, Cout, Cout), jnp.float32),
            "bb": 0.1 * jax.random.normal(ks[6], (1, Cout), jnp.float32),
        }
        if Cin < Cout:
            params["w1"] = 0.1 * jax.random.normal(
                ks[1], (Cin, Cout - Cin), jnp.float32)
            params["b1"] = 0.1 * jax.random.normal(
                ks[2], (1, Cout - Cin), jnp.float32)
        out = jax.block_until_ready(
            lblock_forward(x, params, Cin, Cout, h_tile=h_tile))
        ref = lblock_ref(x, params, Cin, Cout)
        assert out.shape == (N, H, W, Cout)
        max_err = float(jnp.max(jnp.abs(out - ref)))
        assert max_err < 5e-3, (
            f"mismatch vs reference (Cin={Cin}, Cout={Cout}, "
            f"h_tile={h_tile}): {max_err}")

    key = jax.random.PRNGKey(0)
    run_case(jax.random.fold_in(key, 0), 4, 8, 8)     # conv1x1 path, 2 H-tiles
    run_case(jax.random.fold_in(key, 1), 4, 8, None)  # conv1x1 path, default Ht
    run_case(jax.random.fold_in(key, 2), 8, 8, 4)     # identity path, 4 H-tiles
    print("KERNEL_OK")
</pallas_src>

<mosaic_0001>
module attributes {stable_mosaic.version = 11 : i64} {
  func.func @_lblock_kernel(%arg0: i32, %arg1: i32, %arg2: memref<1x2x16x4xf32, #tpu.memory_space<vmem>>, %arg3: memref<1x8x16x4xf32, #tpu.memory_space<vmem>>, %arg4: memref<1x2x16x4xf32, #tpu.memory_space<vmem>>, %arg5: memref<4x4xbf16, #tpu.memory_space<vmem>>, %arg6: memref<1x4xf32, #tpu.memory_space<vmem>>, %arg7: memref<36x8xbf16, #tpu.memory_space<vmem>>, %arg8: memref<1x8xf32, #tpu.memory_space<vmem>>, %arg9: memref<72x8xbf16, #tpu.memory_space<vmem>>, %arg10: memref<1x8xf32, #tpu.memory_space<vmem>>, %arg11: memref<1x8x16x8xf32, #tpu.memory_space<vmem>>, %arg12: memref<12x16x4xbf16, #tpu.memory_space<vmem>>, %arg13: memref<10x16x8xbf16, #tpu.memory_space<vmem>>, %arg14: memref<160x72xbf16, #tpu.memory_space<vmem>>) attributes {dimension_semantics = [#tpu.dimension_semantics<parallel>, #tpu.dimension_semantics<parallel>], iteration_bounds = array<i64: 2, 2>, scalar_prefetch = 0 : i64, scratch_operands = 3 : i64, tpu.core_type = #tpu.core_type<tc>, window_params = [{transform_indices = @transform_0, window_bounds = array<i64: 1, 2, 16, 4>}, {transform_indices = @transform_1, window_bounds = array<i64: 1, 8, 16, 4>}, {transform_indices = @transform_2, window_bounds = array<i64: 1, 2, 16, 4>}, {pipeline_mode = #tpu.pipeline_mode<synchronous>, transform_indices = @transform_3, window_bounds = array<i64: 4, 4>}, {pipeline_mode = #tpu.pipeline_mode<synchronous>, transform_indices = @transform_4, window_bounds = array<i64: 1, 4>}, {pipeline_mode = #tpu.pipeline_mode<synchronous>, transform_indices = @transform_5, window_bounds = array<i64: 36, 8>}, {pipeline_mode = #tpu.pipeline_mode<synchronous>, transform_indices = @transform_6, window_bounds = array<i64: 1, 8>}, {pipeline_mode = #tpu.pipeline_mode<synchronous>, transform_indices = @transform_7, window_bounds = array<i64: 72, 8>}, {pipeline_mode = #tpu.pipeline_mode<synchronous>, transform_indices = @transform_8, window_bounds = array<i64: 1, 8>}, {transform_indices = @transform_9, window_bounds = array<i64: 1, 8, 16, 8>}]} {
    %c0 = arith.constant 0 : index
    %c0_0 = arith.constant 0 : index
    %c0_1 = arith.constant 0 : index
    %c0_2 = arith.constant 0 : index
    %0 = vector.load %arg3[%c0, %c0_0, %c0_1, %c0_2] : memref<1x8x16x4xf32, #tpu.memory_space<vmem>>, vector<1x8x16x4xf32>
    %1 = vector.shape_cast %0 : vector<1x8x16x4xf32> to vector<8x16x4xf32>
    %c0_i32 = arith.constant 0 : i32
    %2 = arith.cmpi eq, %arg1, %c0_i32 : i32
    %c0_3 = arith.constant 0 : index
    %c0_4 = arith.constant 0 : index
    %c0_5 = arith.constant 0 : index
    %c0_6 = arith.constant 0 : index
    %3 = vector.load %arg2[%c0_3, %c0_4, %c0_5, %c0_6] : memref<1x2x16x4xf32, #tpu.memory_space<vmem>>, vector<1x2x16x4xf32>
    %4 = vector.shape_cast %3 : vector<1x2x16x4xf32> to vector<2x16x4xf32>
    %cst = arith.constant 0.000000e+00 : f32
    %5 = vector.broadcast %cst : f32 to vector<2x16x4xf32>
    %6 = arith.maximumf %4, %5 : vector<2x16x4xf32>
    %cst_7 = arith.constant 0.000000e+00 : f32
    %7 = vector.broadcast %cst_7 : f32 to vector<2x16x4xf32>
    %8 = arith.select %2, %7, %6 : vector<2x16x4xf32>
    %c1_i32 = arith.constant 1 : i32
    %9 = arith.cmpi eq, %arg1, %c1_i32 : i32
    %c0_8 = arith.constant 0 : index
    %c0_9 = arith.constant 0 : index
    %c0_10 = arith.constant 0 : index
    %c0_11 = arith.constant 0 : index
    %10 = vector.load %arg4[%c0_8, %c0_9, %c0_10, %c0_11] : memref<1x2x16x4xf32, #tpu.memory_space<vmem>>, vector<1x2x16x4xf32>
    %11 = vector.shape_cast %10 : vector<1x2x16x4xf32> to vector<2x16x4xf32>
    %cst_12 = arith.constant 0.000000e+00 : f32
    %12 = vector.broadcast %cst_12 : f32 to vector<2x16x4xf32>
    %13 = arith.maximumf %11, %12 : vector<2x16x4xf32>
    %cst_13 = arith.constant 0.000000e+00 : f32
    %14 = vector.broadcast %cst_13 : f32 to vector<2x16x4xf32>
    %15 = arith.select %9, %14, %13 : vector<2x16x4xf32>
    %16 = arith.truncf %8 : vector<2x16x4xf32> to vector<2x16x4xbf16>
    %c0_14 = arith.constant 0 : index
    %c0_15 = arith.constant 0 : index
    %c0_16 = arith.constant 0 : index
    %17 = vector.load %arg12[%c0_14, %c0_15, %c0_16] : memref<12x16x4xbf16, #tpu.memory_space<vmem>>, vector<2x16x4xbf16>
    tpu.vector_store %arg12[%c0_14, %c0_15, %c0_16], %16 {strides = array<i32>} : memref<12x16x4xbf16, #tpu.memory_space<vmem>>, vector<2x16x4xbf16>,
    %cst_17 = arith.constant 0.000000e+00 : f32
    %18 = vector.broadcast %cst_17 : f32 to vector<8x16x4xf32>
    %19 = arith.maximumf %1, %18 : vector<8x16x4xf32>
    %20 = arith.truncf %19 : vector<8x16x4xf32> to vector<8x16x4xbf16>
    %c2 = arith.constant 2 : index
    %c0_18 = arith.constant 0 : index
    %c0_19 = arith.constant 0 : index
    %21 = vector.load %arg12[%c2, %c0_18, %c0_19] : memref<12x16x4xbf16, #tpu.memory_space<vmem>>, vector<8x16x4xbf16>
    tpu.vector_store %arg12[%c2, %c0_18, %c0_19], %20 {strides = array<i32>} : memref<12x16x4xbf16, #tpu.memory_space<vmem>>, vector<8x16x4xbf16>,
    %22 = arith.truncf %15 : vector<2x16x4xf32> to vector<2x16x4xbf16>
    %c10 = arith.constant 10 : index
    %c0_20 = arith.constant 0 : index
    %c0_21 = arith.constant 0 : index
    %23 = vector.load %arg12[%c10, %c0_20, %c0_21] : memref<12x16x4xbf16, #tpu.memory_space<vmem>>, vector<2x16x4xbf16>
    tpu.vector_store %arg12[%c10, %c0_20, %c0_21], %22 {strides = array<i32>} : memref<12x16x4xbf16, #tpu.memory_space<vmem>>, vector<2x16x4xbf16>,
    %cst_22 = arith.constant 0.000000e+00 : bf16
    %24 = vector.broadcast %cst_22 : bf16 to vector<10x1x4xbf16>
    %c0_23 = arith.constant 0 : index
    %c0_24 = arith.constant 0 : index
    %c0_25 = arith.constant 0 : index
    %25 = vector.load %arg12[%c0_23, %c0_24, %c0_25] : memref<12x16x4xbf16, #tpu.memory_space<vmem>>, vector<10x16x4xbf16>
    %26 = vector.extract_strided_slice %25 {offsets = [0, 0, 0], sizes = [10, 15, 4], strides = [1, 1, 1]} : vector<10x16x4xbf16> to vector<10x15x4xbf16>
    %27 = tpu.concatenate %24, %26 in 1 : vector<10x1x4xbf16>, vector<10x15x4xbf16> -> vector<10x16x4xbf16>
    %28 = vector.shape_cast %27 : vector<10x16x4xbf16> to vector<160x4xbf16>
    %c0_26 = arith.constant 0 : index
    %c0_27 = arith.constant 0 : index
    %29 = vector.load %arg14[%c0_26, %c0_27] : memref<160x72xbf16, #tpu.memory_space<vmem>>, vector<160x4xbf16>
    tpu.vector_store %arg14[%c0_26, %c0_27], %28 {strides = array<i32>} : memref<160x72xbf16, #tpu.memory_space<vmem>>, vector<160x4xbf16>,
    %30 = vector.shape_cast %25 : vector<10x16x4xbf16> to vector<160x4xbf16>
    %c0_28 = arith.constant 0 : index
    %c4 = arith.constant 4 : index
    %31 = vector.load %arg14[%c0_28, %c4] : memref<160x72xbf16, #tpu.memory_space<vmem>>, vector<160x4xbf16>
    tpu.vector_store %arg14[%c0_28, %c4], %30 {strides = array<i32>} : memref<160x72xbf16, #tpu.memory_space<vmem>>, vector<160x4xbf16>,
    %32 = vector.extract_strided_slice %25 {offsets = [0, 1, 0], sizes = [10, 15, 4], strides = [1, 1, 1]} : vector<10x16x4xbf16> to vector<10x15x4xbf16>
    %33 = tpu.concatenate %32, %24 in 1 : vector<10x15x4xbf16>, vector<10x1x4xbf16> -> vector<10x16x4xbf16>
    %34 = vector.shape_cast %33 : vector<10x16x4xbf16> to vector<160x4xbf16>
    %c0_29 = arith.constant 0 : index
    %c8 = arith.constant 8 : index
    %35 = vector.load %arg14[%c0_29, %c8] : memref<160x72xbf16, #tpu.memory_space<vmem>>, vector<160x4xbf16>
    tpu.vector_store %arg14[%c0_29, %c8], %34 {strides = array<i32>} : memref<160x72xbf16, #tpu.memory_space<vmem>>, vector<160x4xbf16>,
    %c1 = arith.constant 1 : index
    %c0_30 = arith.constant 0 : index
    %c0_31 = arith.constant 0 : index
    %36 = vector.load %arg12[%c1, %c0_30, %c0_31] : memref<12x16x4xbf16, #tpu.memory_space<vmem>>, vector<10x16x4xbf16>
    %37 = vector.extract_strided_slice %36 {offsets = [0, 0, 0], sizes = [10, 15, 4], strides = [1, 1, 1]} : vector<10x16x4xbf16> to vector<10x15x4xbf16>
    %38 = tpu.concatenate %24, %37 in 1 : vector<10x1x4xbf16>, vector<10x15x4xbf16> -> vector<10x16x4xbf16>
    %39 = vector.shape_cast %38 : vector<10x16x4xbf16> to vector<160x4xbf16>
    %c0_32 = arith.constant 0 : index
    %c12 = arith.constant 12 : index
    %40 = vector.load %arg14[%c0_32, %c12] : memref<160x72xbf16, #tpu.memory_space<vmem>>, vector<160x4xbf16>
    tpu.vector_store %arg14[%c0_32, %c12], %39 {strides = array<i32>} : memref<160x72xbf16, #tpu.memory_space<vmem>>, vector<160x4xbf16>,
    %41 = vector.shape_cast %36 : vector<10x16x4xbf16> to vector<160x4xbf16>
    %c0_33 = arith.constant 0 : index
    %c16 = arith.constant 16 : index
    %42 = vector.load %arg14[%c0_33, %c16] : memref<160x72xbf16, #tpu.memory_space<vmem>>, vector<160x4xbf16>
    tpu.vector_store %arg14[%c0_33, %c16], %41 {strides = array<i32>} : memref<160x72xbf16, #tpu.memory_space<vmem>>, vector<160x4xbf16>,
    %43 = vector.extract_strided_slice %36 {offsets = [0, 1, 0], sizes = [10, 15, 4], strides = [1, 1, 1]} : vector<10x16x4xbf16> to vector<10x15x4xbf16>
    %44 = tpu.concatenate %43, %24 in 1 : vector<10x15x4xbf16>, vector<10x1x4xbf16> -> vector<10x16x4xbf16>
    %45 = vector.shape_cast %44 : vector<10x16x4xbf16> to vector<160x4xbf16>
    %c0_34 = arith.constant 0 : index
    %c20 = arith.constant 20 : index
    %46 = vector.load %arg14[%c0_34, %c20] : memref<160x72xbf16, #tpu.memory_space<vmem>>, vector<160x4xbf16>
    tpu.vector_store %arg14[%c0_34, %c20], %45 {strides = array<i32>} : memref<160x72xbf16, #tpu.memory_space<vmem>>, vector<160x4xbf16>,
    %c2_35 = arith.constant 2 : index
    %c0_36 = arith.constant 0 : index
    %c0_37 = arith.constant 0 : index
    %47 = vector.load %arg12[%c2_35, %c0_36, %c0_37] : memref<12x16x4xbf16, #tpu.memory_space<vmem>>, vector<10x16x4xbf16>
    %48 = vector.extract_strided_slice %47 {offsets = [0, 0, 0], sizes = [10, 15, 4], strides = [1, 1, 1]} : vector<10x16x4xbf16> to vector<10x15x4xbf16>
    %49 = tpu.concatenate %24, %48 in 1 : vector<10x1x4xbf16>, vector<10x15x4xbf16> -> vector<10x16x4xbf16>
    %50 = vector.shape_cast %49 : vector<10x16x4xbf16> to vector<160x4xbf16>
    %c0_38 = arith.constant 0 : index
    %c24 = arith.constant 24 : index
    %51 = vector.load %arg14[%c0_38, %c24] : memref<160x72xbf16, #tpu.memory_space<vmem>>, vector<160x4xbf16>
    tpu.vector_store %arg14[%c0_38, %c24], %50 {strides = array<i32>} : memref<160x72xbf16, #tpu.memory_space<vmem>>, vector<160x4xbf16>,
    %52 = vector.shape_cast %47 : vector<10x16x4xbf16> to vector<160x4xbf16>
    %c0_39 = arith.constant 0 : index
    %c28 = arith.constant 28 : index
    %53 = vector.load %arg14[%c0_39, %c28] : memref<160x72xbf16, #tpu.memory_space<vmem>>, vector<160x4xbf16>
    tpu.vector_store %arg14[%c0_39, %c28], %52 {strides = array<i32>} : memref<160x72xbf16, #tpu.memory_space<vmem>>, vector<160x4xbf16>,
    %54 = vector.extract_strided_slice %47 {offsets = [0, 1, 0], sizes = [10, 15, 4], strides = [1, 1, 1]} : vector<10x16x4xbf16> to vector<10x15x4xbf16>
    %55 = tpu.concatenate %54, %24 in 1 : vector<10x15x4xbf16>, vector<10x1x4xbf16> -> vector<10x16x4xbf16>
    %56 = vector.shape_cast %55 : vector<10x16x4xbf16> to vector<160x4xbf16>
    %c0_40 = arith.constant 0 : index
    %c32 = arith.constant 32 : index
    %57 = vector.load %arg14[%c0_40, %c32] : memref<160x72xbf16, #tpu.memory_space<vmem>>, vector<160x4xbf16>
    tpu.vector_store %arg14[%c0_40, %c32], %56 {strides = array<i32>} : memref<160x72xbf16, #tpu.memory_space<vmem>>, vector<160x4xbf16>,
    %c0_41 = arith.constant 0 : index
    %c0_42 = arith.constant 0 : index
    %58 = vector.load %arg14[%c0_41, %c0_42] : memref<160x72xbf16, #tpu.memory_space<vmem>>, vector<160x36xbf16>
    %c0_43 = arith.constant 0 : index
    %c0_44 = arith.constant 0 : index
    %59 = vector.load %arg7[%c0_43, %c0_44] : memref<36x8xbf16, #tpu.memory_space<vmem>>, vector<36x8xbf16>
    %cst_45 = arith.constant dense<0.000000e+00> : vector<160x8xf32>
    %60 = tpu.matmul %58, %59, %cst_45 {dimension_numbers = #tpu.dot_dimension_numbers<[1], [0], [0], [1], [0, 0, 1, 1], [], []>} : vector<160x36xbf16>, vector<36x8xbf16>, vector<160x8xf32> -> vector<160x8xf32>
    %c0_46 = arith.constant 0 : index
    %c0_47 = arith.constant 0 : index
    %61 = vector.load %arg8[%c0_46, %c0_47] : memref<1x8xf32, #tpu.memory_space<vmem>>, vector<1x8xf32>
    %62 = vector.broadcast %61 : vector<1x8xf32> to vector<160x8xf32>
    %63 = arith.addf %60, %62 : vector<160x8xf32>
    %cst_48 = arith.constant 0.000000e+00 : f32
    %64 = vector.broadcast %cst_48 : f32 to vector<160x8xf32>
    %65 = arith.maximumf %63, %64 : vector<160x8xf32>
    %66 = vector.shape_cast %65 : vector<160x8xf32> to vector<10x16x8xf32>
    %67 = arith.truncf %66 : vector<10x16x8xf32> to vector<10x16x8xbf16>
    %c0_49 = arith.constant 0 : index
    %c0_50 = arith.constant 0 : index
    %c0_51 = arith.constant 0 : index
    %68 = vector.load %arg13[%c0_49, %c0_50, %c0_51] : memref<10x16x8xbf16, #tpu.memory_space<vmem>>, vector<10x16x8xbf16>
    tpu.vector_store %arg13[%c0_49, %c0_50, %c0_51], %67 {strides = array<i32>} : memref<10x16x8xbf16, #tpu.memory_space<vmem>>, vector<10x16x8xbf16>,
    %c0_i32_52 = arith.constant 0 : i32
    %69 = arith.cmpi eq, %arg1, %c0_i32_52 : i32
    %70 = arith.extui %69 : i1 to i32
    %c0_i32_53 = arith.constant 0 : i32
    %71 = arith.cmpi ne, %70, %c0_i32_53 : i32
    scf.if %71 {
      %cst_96 = arith.constant 0.000000e+00 : bf16
      %131 = vector.broadcast %cst_96 : bf16 to vector<1x16x8xbf16>
      %c0_97 = arith.constant 0 : index
      %c0_98 = arith.constant 0 : index
      %c0_99 = arith.constant 0 : index
      %132 = vector.load %arg13[%c0_97, %c0_98, %c0_99] : memref<10x16x8xbf16, #tpu.memory_space<vmem>>, vector<1x16x8xbf16>
      tpu.vector_store %arg13[%c0_97, %c0_98, %c0_99], %131 {strides = array<i32>} : memref<10x16x8xbf16, #tpu.memory_space<vmem>>, vector<1x16x8xbf16>,
    } else {
    }
    %c1_i32_54 = arith.constant 1 : i32
    %72 = arith.cmpi eq, %arg1, %c1_i32_54 : i32
    %73 = arith.extui %72 : i1 to i32
    %c0_i32_55 = arith.constant 0 : i32
    %74 = arith.cmpi ne, %73, %c0_i32_55 : i32
    scf.if %74 {
      %cst_96 = arith.constant 0.000000e+00 : bf16
      %131 = vector.broadcast %cst_96 : bf16 to vector<1x16x8xbf16>
      %c9 = arith.constant 9 : index
      %c0_97 = arith.constant 0 : index
      %c0_98 = arith.constant 0 : index
      %132 = vector.load %arg13[%c9, %c0_97, %c0_98] : memref<10x16x8xbf16, #tpu.memory_space<vmem>>, vector<1x16x8xbf16>
      tpu.vector_store %arg13[%c9, %c0_97, %c0_98], %131 {strides = array<i32>} : memref<10x16x8xbf16, #tpu.memory_space<vmem>>, vector<1x16x8xbf16>,
    } else {
    }
    %cst_56 = arith.constant 0.000000e+00 : bf16
    %75 = vector.broadcast %cst_56 : bf16 to vector<8x1x8xbf16>
    %c0_57 = arith.constant 0 : index
    %c0_58 = arith.constant 0 : index
    %c0_59 = arith.constant 0 : index
    %76 = vector.load %arg13[%c0_57, %c0_58, %c0_59] : memref<10x16x8xbf16, #tpu.memory_space<vmem>>, vector<8x16x8xbf16>
    %77 = vector.extract_strided_slice %76 {offsets = [0, 0, 0], sizes = [8, 15, 8], strides = [1, 1, 1]} : vector<8x16x8xbf16> to vector<8x15x8xbf16>
    %78 = tpu.concatenate %75, %77 in 1 : vector<8x1x8xbf16>, vector<8x15x8xbf16> -> vector<8x16x8xbf16>
    %79 = vector.shape_cast %78 : vector<8x16x8xbf16> to vector<128x8xbf16>
    %c0_60 = arith.constant 0 : index
    %c0_61 = arith.constant 0 : index
    %80 = vector.load %arg14[%c0_60, %c0_61] : memref<160x72xbf16, #tpu.memory_space<vmem>>, vector<128x8xbf16>
    tpu.vector_store %arg14[%c0_60, %c0_61], %79 {strides = array<i32>} : memref<160x72xbf16, #tpu.memory_space<vmem>>, vector<128x8xbf16>,
    %81 = vector.shape_cast %76 : vector<8x16x8xbf16> to vector<128x8xbf16>
    %c0_62 = arith.constant 0 : index
    %c8_63 = arith.constant 8 : index
    %82 = vector.load %arg14[%c0_62, %c8_63] : memref<160x72xbf16, #tpu.memory_space<vmem>>, vector<128x8xbf16>
    tpu.vector_store %arg14[%c0_62, %c8_63], %81 {strides = array<i32>} : memref<160x72xbf16, #tpu.memory_space<vmem>>, vector<128x8xbf16>,
    %83 = vector.extract_strided_slice %76 {offsets = [0, 1, 0], sizes = [8, 15, 8], strides = [1, 1, 1]} : vector<8x16x8xbf16> to vector<8x15x8xbf16>
    %84 = tpu.concatenate %83, %75 in 1 : vector<8x15x8xbf16>, vector<8x1x8xbf16> -> vector<8x16x8xbf16>
    %85 = vector.shape_cast %84 : vector<8x16x8xbf16> to vector<128x8xbf16>
    %c0_64 = arith.constant 0 : index
    %c16_65 = arith.constant 16 : index
    %86 = vector.load %arg14[%c0_64, %c16_65] : memref<160x72xbf16, #tpu.memory_space<vmem>>, vector<128x8xbf16>
    tpu.vector_store %arg14[%c0_64, %c16_65], %85 {strides = array<i32>} : memref<160x72xbf16, #tpu.memory_space<vmem>>, vector<128x8xbf16>,
    %c1_66 = arith.constant 1 : index
    %c0_67 = arith.constant 0 : index
    %c0_68 = arith.constant 0 : index
    %87 = vector.load %arg13[%c1_66, %c0_67, %c0_68] : memref<10x16x8xbf16, #tpu.memory_space<vmem>>, vector<8x16x8xbf16>
    %88 = vector.extract_strided_slice %87 {offsets = [0, 0, 0], sizes = [8, 15, 8], strides = [1, 1, 1]} : vector<8x16x8xbf16> to vector<8x15x8xbf16>
    %89 = tpu.concatenate %75, %88 in 1 : vector<8x1x8xbf16>, vector<8x15x8xbf16> -> vector<8x16x8xbf16>
    %90 = vector.shape_cast %89 : vector<8x16x8xbf16> to vector<128x8xbf16>
    %c0_69 = arith.constant 0 : index
    %c24_70 = arith.constant 24 : index
    %91 = vector.load %arg14[%c0_69, %c24_70] : memref<160x72xbf16, #tpu.memory_space<vmem>>, vector<128x8xbf16>
    tpu.vector_store %arg14[%c0_69, %c24_70], %90 {strides = array<i32>} : memref<160x72xbf16, #tpu.memory_space<vmem>>, vector<128x8xbf16>,
    %92 = vector.shape_cast %87 : vector<8x16x8xbf16> to vector<128x8xbf16>
    %c0_71 = arith.constant 0 : index
    %c32_72 = arith.constant 32 : index
    %93 = vector.load %arg14[%c0_71, %c32_72] : memref<160x72xbf16, #tpu.memory_space<vmem>>, vector<128x8xbf16>
    tpu.vector_store %arg14[%c0_71, %c32_72], %92 {strides = array<i32>} : memref<160x72xbf16, #tpu.memory_space<vmem>>, vector<128x8xbf16>,
    %94 = vector.extract_strided_slice %87 {offsets = [0, 1, 0], sizes = [8, 15, 8], strides = [1, 1, 1]} : vector<8x16x8xbf16> to vector<8x15x8xbf16>
    %95 = tpu.concatenate %94, %75 in 1 : vector<8x15x8xbf16>, vector<8x1x8xbf16> -> vector<8x16x8xbf16>
    %96 = vector.shape_cast %95 : vector<8x16x8xbf16> to vector<128x8xbf16>
    %c0_73 = arith.constant 0 : index
    %c40 = arith.constant 40 : index
    %97 = vector.load %arg14[%c0_73, %c40] : memref<160x72xbf16, #tpu.memory_space<vmem>>, vector<128x8xbf16>
    tpu.vector_store %arg14[%c0_73, %c40], %96 {strides = array<i32>} : memref<160x72xbf16, #tpu.memory_space<vmem>>, vector<128x8xbf16>,
    %c2_74 = arith.constant 2 : index
    %c0_75 = arith.constant 0 : index
    %c0_76 = arith.constant 0 : index
    %98 = vector.load %arg13[%c2_74, %c0_75, %c0_76] : memref<10x16x8xbf16, #tpu.memory_space<vmem>>, vector<8x16x8xbf16>
    %99 = vector.extract_strided_slice %98 {offsets = [0, 0, 0], sizes = [8, 15, 8], strides = [1, 1, 1]} : vector<8x16x8xbf16> to vector<8x15x8xbf16>
    %100 = tpu.concatenate %75, %99 in 1 : vector<8x1x8xbf16>, vector<8x15x8xbf16> -> vector<8x16x8xbf16>
    %101 = vector.shape_cast %100 : vector<8x16x8xbf16> to vector<128x8xbf16>
    %c0_77 = arith.constant 0 : index
    %c48 = arith.constant 48 : index
    %102 = vector.load %arg14[%c0_77, %c48] : memref<160x72xbf16, #tpu.memory_space<vmem>>, vector<128x8xbf16>
    tpu.vector_store %arg14[%c0_77, %c48], %101 {strides = array<i32>} : memref<160x72xbf16, #tpu.memory_space<vmem>>, vector<128x8xbf16>,
    %103 = vector.shape_cast %98 : vector<8x16x8xbf16> to vector<128x8xbf16>
    %c0_78 = arith.constant 0 : index
    %c56 = arith.constant 56 : index
    %104 = vector.load %arg14[%c0_78, %c56] : memref<160x72xbf16, #tpu.memory_space<vmem>>, vector<128x8xbf16>
    tpu.vector_store %arg14[%c0_78, %c56], %103 {strides = array<i32>} : memref<160x72xbf16, #tpu.memory_space<vmem>>, vector<128x8xbf16>,
    %105 = vector.extract_strided_slice %98 {offsets = [0, 1, 0], sizes = [8, 15, 8], strides = [1, 1, 1]} : vector<8x16x8xbf16> to vector<8x15x8xbf16>
    %106 = tpu.concatenate %105, %75 in 1 : vector<8x15x8xbf16>, vector<8x1x8xbf16> -> vector<8x16x8xbf16>
    %107 = vector.shape_cast %106 : vector<8x16x8xbf16> to vector<128x8xbf16>
    %c0_79 = arith.constant 0 : index
    %c64 = arith.constant 64 : index
    %108 = vector.load %arg14[%c0_79, %c64] : memref<160x72xbf16, #tpu.memory_space<vmem>>, vector<128x8xbf16>
    tpu.vector_store %arg14[%c0_79, %c64], %107 {strides = array<i32>} : memref<160x72xbf16, #tpu.memory_space<vmem>>, vector<128x8xbf16>,
    %c0_80 = arith.constant 0 : index
    %c0_81 = arith.constant 0 : index
    %109 = vector.load %arg14[%c0_80, %c0_81] : memref<160x72xbf16, #tpu.memory_space<vmem>>, vector<128x72xbf16>
    %c0_82 = arith.constant 0 : index
    %c0_83 = arith.constant 0 : index
    %110 = vector.load %arg9[%c0_82, %c0_83] : memref<72x8xbf16, #tpu.memory_space<vmem>>, vector<72x8xbf16>
    %cst_84 = arith.constant dense<0.000000e+00> : vector<128x8xf32>
    %111 = tpu.matmul %109, %110, %cst_84 {dimension_numbers = #tpu.dot_dimension_numbers<[1], [0], [0], [1], [0, 0, 1, 1], [], []>} : vector<128x72xbf16>, vector<72x8xbf16>, vector<128x8xf32> -> vector<128x8xf32>
    %c0_85 = arith.constant 0 : index
    %c0_86 = arith.constant 0 : index
    %112 = vector.load %arg10[%c0_85, %c0_86] : memref<1x8xf32, #tpu.memory_space<vmem>>, vector<1x8xf32>
    %113 = vector.broadcast %112 : vector<1x8xf32> to vector<128x8xf32>
    %114 = arith.addf %111, %113 : vector<128x8xf32>
    %115 = vector.shape_cast %1 : vector<8x16x4xf32> to vector<128x4xf32>
    %116 = arith.truncf %115 : vector<128x4xf32> to vector<128x4xbf16>
    %c0_87 = arith.constant 0 : index
    %c0_88 = arith.constant 0 : index
    %117 = vector.load %arg5[%c0_87, %c0_88] : memref<4x4xbf16, #tpu.memory_space<vmem>>, vector<4x4xbf16>
    %cst_89 = arith.constant dense<0.000000e+00> : vector<128x4xf32>
    %118 = tpu.matmul %116, %117, %cst_89 {dimension_numbers = #tpu.dot_dimension_numbers<[1], [0], [0], [1], [0, 0, 1, 1], [], []>} : vector<128x4xbf16>, vector<4x4xbf16>, vector<128x4xf32> -> vector<128x4xf32>
    %c0_90 = arith.constant 0 : index
    %c0_91 = arith.constant 0 : index
    %119 = vector.load %arg6[%c0_90, %c0_91] : memref<1x4xf32, #tpu.memory_space<vmem>>, vector<1x4xf32>
    %120 = vector.broadcast %119 : vector<1x4xf32> to vector<128x4xf32>
    %121 = arith.addf %118, %120 : vector<128x4xf32>
    %122 = vector.extract_strided_slice %114 {offsets = [0, 0], sizes = [128, 4], strides = [1, 1]} : vector<128x8xf32> to vector<128x4xf32>
    %123 = arith.addf %122, %115 : vector<128x4xf32>
    %124 = vector.extract_strided_slice %114 {offsets = [0, 4], sizes = [128, 4], strides = [1, 1]} : vector<128x8xf32> to vector<128x4xf32>
    %125 = arith.addf %124, %121 : vector<128x4xf32>
    %126 = tpu.concatenate %123, %125 in 1 : vector<128x4xf32>, vector<128x4xf32> -> vector<128x8xf32>
    %127 = vector.shape_cast %126 : vector<128x8xf32> to vector<8x16x8xf32>
    %c0_92 = arith.constant 0 : index
    %c0_93 = arith.constant 0 : index
    %c0_94 = arith.constant 0 : index
    %c0_95 = arith.constant 0 : index
    %128 = vector.load %arg11[%c0_92, %c0_93, %c0_94, %c0_95] : memref<1x8x16x8xf32, #tpu.memory_space<vmem>>, vector<1x8x16x8xf32>
    %129 = vector.shape_cast %128 : vector<1x8x16x8xf32> to vector<8x16x8xf32>
    %130 = vector.shape_cast %127 : vector<8x16x8xf32> to vector<1x8x16x8xf32>
    tpu.vector_store %arg11[%c0_92, %c0_93, %c0_94, %c0_95], %130 {strides = array<i32>} : memref<1x8x16x8xf32, #tpu.memory_space<vmem>>, vector<1x8x16x8xf32>,
    return
  }
  func.func @transform_0(%arg0: i32, %arg1: i32) -> (i32, i32, i32, i32) {
    %c4_i32 = arith.constant 4 : i32
    %0 = arith.muli %arg1, %c4_i32 : i32
    %c1_i32 = arith.constant 1 : i32
    %1 = arith.subi %0, %c1_i32 : i32
    %c0_i32 = arith.constant 0 : i32
    %2 = arith.maxsi %1, %c0_i32 : i32
    %c0_i32_0 = arith.constant 0 : i32
    %c0_i32_1 = arith.constant 0 : i32
    %c0_i32_2 = arith.constant 0 : i32
    return %arg0, %2, %c0_i32_0, %c0_i32_1 : i32, i32, i32, i32
  }
  func.func @transform_1(%arg0: i32, %arg1: i32) -> (i32, i32, i32, i32) {
    %c0_i32 = arith.constant 0 : i32
    %c0_i32_0 = arith.constant 0 : i32
    %c0_i32_1 = arith.constant 0 : i32
    return %arg0, %arg1, %c0_i32, %c0_i32_0 : i32, i32, i32, i32
  }
  func.func @transform_2(%arg0: i32, %arg1: i32) -> (i32, i32, i32, i32) {
    %c1_i32 = arith.constant 1 : i32
    %0 = arith.addi %arg1, %c1_i32 : i32
    %c4_i32 = arith.constant 4 : i32
    %1 = arith.muli %0, %c4_i32 : i32
    %c7_i32 = arith.constant 7 : i32
    %2 = arith.minsi %1, %c7_i32 : i32
    %c0_i32 = arith.constant 0 : i32
    %c0_i32_0 = arith.constant 0 : i32
    %c0_i32_1 = arith.constant 0 : i32
    return %arg0, %2, %c0_i32, %c0_i32_0 : i32, i32, i32, i32
  }
  func.func @transform_3(%arg0: i32, %arg1: i32) -> (i32, i32) {
    %c0_i32 = arith.constant 0 : i32
    %c0_i32_0 = arith.constant 0 : i32
    %c0_i32_1 = arith.constant 0 : i32
    return %c0_i32, %c0_i32_0 : i32, i32
  }
  func.func @transform_4(%arg0: i32, %arg1: i32) -> (i32, i32) {
    %c0_i32 = arith.constant 0 : i32
    %c0_i32_0 = arith.constant 0 : i32
    %c0_i32_1 = arith.constant 0 : i32
    return %c0_i32, %c0_i32_0 : i32, i32
  }
  func.func @transform_5(%arg0: i32, %arg1: i32) -> (i32, i32) {
    %c0_i32 = arith.constant 0 : i32
    %c0_i32_0 = arith.constant 0 : i32
    %c0_i32_1 = arith.constant 0 : i32
    return %c0_i32, %c0_i32_0 : i32, i32
  }
  func.func @transform_6(%arg0: i32, %arg1: i32) -> (i32, i32) {
    %c0_i32 = arith.constant 0 : i32
    %c0_i32_0 = arith.constant 0 : i32
    %c0_i32_1 = arith.constant 0 : i32
    return %c0_i32, %c0_i32_0 : i32, i32
  }
  func.func @transform_7(%arg0: i32, %arg1: i32) -> (i32, i32) {
    %c0_i32 = arith.constant 0 : i32
    %c0_i32_0 = arith.constant 0 : i32
    %c0_i32_1 = arith.constant 0 : i32
    return %c0_i32, %c0_i32_0 : i32, i32
  }
  func.func @transform_8(%arg0: i32, %arg1: i32) -> (i32, i32) {
    %c0_i32 = arith.constant 0 : i32
    %c0_i32_0 = arith.constant 0 : i32
    %c0_i32_1 = arith.constant 0 : i32
    return %c0_i32, %c0_i32_0 : i32, i32
  }
  func.func @transform_9(%arg0: i32, %arg1: i32) -> (i32, i32, i32, i32) {
    %c0_i32 = arith.constant 0 : i32
    %c0_i32_0 = arith.constant 0 : i32
    %c0_i32_1 = arith.constant 0 : i32
    return %arg0, %arg1, %c0_i32, %c0_i32_0 : i32, i32, i32, i32
  }
}

module attributes {stable_mosaic.version = 11 : i64} {
  func.func @_lblock_kernel(%arg0: i32, %arg1: i32, %arg2: memref<1x2x16x4xf32, #tpu.memory_space<vmem>>, %arg3: memref<1x8x16x4xf32, #tpu.memory_space<vmem>>, %arg4: memref<1x2x16x4xf32, #tpu.memory_space<vmem>>, %arg5: memref<4x4xbf16, #tpu.memory_space<vmem>>, %arg6: memref<1x4xf32, #tpu.memory_space<vmem>>, %arg7: memref<36x8xbf16, #tpu.memory_space<vmem>>, %arg8: memref<1x8xf32, #tpu.memory_space<vmem>>, %arg9: memref<72x8xbf16, #tpu.memory_space<vmem>>, %arg10: memref<1x8xf32, #tpu.memory_space<vmem>>, %arg11: memref<1x8x16x8xf32, #tpu.memory_space<vmem>>, %arg12: memref<12x16x4xbf16, #tpu.memory_space<vmem>>, %arg13: memref<10x16x8xbf16, #tpu.memory_space<vmem>>, %arg14: memref<160x72xbf16, #tpu.memory_space<vmem>>) attributes {dimension_semantics = [#tpu.dimension_semantics<parallel>, #tpu.dimension_semantics<parallel>], iteration_bounds = array<i64: 2, 2>, scalar_prefetch = 0 : i64, scratch_operands = 3 : i64, tpu.core_type = #tpu.core_type<tc>, window_params = [{transform_indices = @transform_0, window_bounds = array<i64: 1, 2, 16, 4>}, {transform_indices = @transform_1, window_bounds = array<i64: 1, 8, 16, 4>}, {transform_indices = @transform_2, window_bounds = array<i64: 1, 2, 16, 4>}, {pipeline_mode = #tpu.pipeline_mode<synchronous>, transform_indices = @transform_3, window_bounds = array<i64: 4, 4>}, {pipeline_mode = #tpu.pipeline_mode<synchronous>, transform_indices = @transform_4, window_bounds = array<i64: 1, 4>}, {pipeline_mode = #tpu.pipeline_mode<synchronous>, transform_indices = @transform_5, window_bounds = array<i64: 36, 8>}, {pipeline_mode = #tpu.pipeline_mode<synchronous>, transform_indices = @transform_6, window_bounds = array<i64: 1, 8>}, {pipeline_mode = #tpu.pipeline_mode<synchronous>, transform_indices = @transform_7, window_bounds = array<i64: 72, 8>}, {pipeline_mode = #tpu.pipeline_mode<synchronous>, transform_indices = @transform_8, window_bounds = array<i64: 1, 8>}, {transform_indices = @transform_9, window_bounds = array<i64: 1, 8, 16, 8>}]} {
    %c0 = arith.constant 0 : index
    %c0_0 = arith.constant 0 : index
    %c0_1 = arith.constant 0 : index
    %c0_2 = arith.constant 0 : index
    %0 = vector.load %arg3[%c0, %c0_0, %c0_1, %c0_2] : memref<1x8x16x4xf32, #tpu.memory_space<vmem>>, vector<1x8x16x4xf32>
    %1 = vector.shape_cast %0 : vector<1x8x16x4xf32> to vector<8x16x4xf32>
    %c0_i32 = arith.constant 0 : i32
    %2 = arith.cmpi eq, %arg1, %c0_i32 : i32
    %c0_3 = arith.constant 0 : index
    %c0_4 = arith.constant 0 : index
    %c0_5 = arith.constant 0 : index
    %c0_6 = arith.constant 0 : index
    %3 = vector.load %arg2[%c0_3, %c0_4, %c0_5, %c0_6] : memref<1x2x16x4xf32, #tpu.memory_space<vmem>>, vector<1x2x16x4xf32>
    %4 = vector.shape_cast %3 : vector<1x2x16x4xf32> to vector<2x16x4xf32>
    %cst = arith.constant 0.000000e+00 : f32
    %5 = vector.broadcast %cst : f32 to vector<2x16x4xf32>
    %6 = arith.maximumf %4, %5 : vector<2x16x4xf32>
    %cst_7 = arith.constant 0.000000e+00 : f32
    %7 = vector.broadcast %cst_7 : f32 to vector<2x16x4xf32>
    %8 = arith.select %2, %7, %6 : vector<2x16x4xf32>
    %c1_i32 = arith.constant 1 : i32
    %9 = arith.cmpi eq, %arg1, %c1_i32 : i32
    %c0_8 = arith.constant 0 : index
    %c0_9 = arith.constant 0 : index
    %c0_10 = arith.constant 0 : index
    %c0_11 = arith.constant 0 : index
    %10 = vector.load %arg4[%c0_8, %c0_9, %c0_10, %c0_11] : memref<1x2x16x4xf32, #tpu.memory_space<vmem>>, vector<1x2x16x4xf32>
    %11 = vector.shape_cast %10 : vector<1x2x16x4xf32> to vector<2x16x4xf32>
    %cst_12 = arith.constant 0.000000e+00 : f32
    %12 = vector.broadcast %cst_12 : f32 to vector<2x16x4xf32>
    %13 = arith.maximumf %11, %12 : vector<2x16x4xf32>
    %cst_13 = arith.constant 0.000000e+00 : f32
    %14 = vector.broadcast %cst_13 : f32 to vector<2x16x4xf32>
    %15 = arith.select %9, %14, %13 : vector<2x16x4xf32>
    %16 = arith.truncf %8 : vector<2x16x4xf32> to vector<2x16x4xbf16>
    %c0_14 = arith.constant 0 : index
    %c0_15 = arith.constant 0 : index
    %c0_16 = arith.constant 0 : index
    %17 = vector.load %arg12[%c0_14, %c0_15, %c0_16] : memref<12x16x4xbf16, #tpu.memory_space<vmem>>, vector<2x16x4xbf16>
    tpu.vector_store %arg12[%c0_14, %c0_15, %c0_16], %16 {strides = array<i32>} : memref<12x16x4xbf16, #tpu.memory_space<vmem>>, vector<2x16x4xbf16>,
    %cst_17 = arith.constant 0.000000e+00 : f32
    %18 = vector.broadcast %cst_17 : f32 to vector<8x16x4xf32>
    %19 = arith.maximumf %1, %18 : vector<8x16x4xf32>
    %20 = arith.truncf %19 : vector<8x16x4xf32> to vector<8x16x4xbf16>
    %c2 = arith.constant 2 : index
    %c0_18 = arith.constant 0 : index
    %c0_19 = arith.constant 0 : index
    %21 = vector.load %arg12[%c2, %c0_18, %c0_19] : memref<12x16x4xbf16, #tpu.memory_space<vmem>>, vector<8x16x4xbf16>
    tpu.vector_store %arg12[%c2, %c0_18, %c0_19], %20 {strides = array<i32>} : memref<12x16x4xbf16, #tpu.memory_space<vmem>>, vector<8x16x4xbf16>,
    %22 = arith.truncf %15 : vector<2x16x4xf32> to vector<2x16x4xbf16>
    %c10 = arith.constant 10 : index
    %c0_20 = arith.constant 0 : index
    %c0_21 = arith.constant 0 : index
    %23 = vector.load %arg12[%c10, %c0_20, %c0_21] : memref<12x16x4xbf16, #tpu.memory_space<vmem>>, vector<2x16x4xbf16>
    tpu.vector_store %arg12[%c10, %c0_20, %c0_21], %22 {strides = array<i32>} : memref<12x16x4xbf16, #tpu.memory_space<vmem>>, vector<2x16x4xbf16>,
    %cst_22 = arith.constant 0.000000e+00 : bf16
    %24 = vector.broadcast %cst_22 : bf16 to vector<10x1x4xbf16>
    %c0_23 = arith.constant 0 : index
    %c0_24 = arith.constant 0 : index
    %c0_25 = arith.constant 0 : index
    %25 = vector.load %arg12[%c0_23, %c0_24, %c0_25] : memref<12x16x4xbf16, #tpu.memory_space<vmem>>, vector<10x16x4xbf16>
    %26 = vector.extract_strided_slice %25 {offsets = [0, 0, 0], sizes = [10, 15, 4], strides = [1, 1, 1]} : vector<10x16x4xbf16> to vector<10x15x4xbf16>
    %27 = tpu.concatenate %24, %26 in 1 : vector<10x1x4xbf16>, vector<10x15x4xbf16> -> vector<10x16x4xbf16>
    %28 = vector.shape_cast %27 : vector<10x16x4xbf16> to vector<160x4xbf16>
    %c0_26 = arith.constant 0 : index
    %c0_27 = arith.constant 0 : index
    %29 = vector.load %arg14[%c0_26, %c0_27] : memref<160x72xbf16, #tpu.memory_space<vmem>>, vector<160x4xbf16>
    tpu.vector_store %arg14[%c0_26, %c0_27], %28 {strides = array<i32>} : memref<160x72xbf16, #tpu.memory_space<vmem>>, vector<160x4xbf16>,
    %30 = vector.shape_cast %25 : vector<10x16x4xbf16> to vector<160x4xbf16>
    %c0_28 = arith.constant 0 : index
    %c4 = arith.constant 4 : index
    %31 = vector.load %arg14[%c0_28, %c4] : memref<160x72xbf16, #tpu.memory_space<vmem>>, vector<160x4xbf16>
    tpu.vector_store %arg14[%c0_28, %c4], %30 {strides = array<i32>} : memref<160x72xbf16, #tpu.memory_space<vmem>>, vector<160x4xbf16>,
    %32 = vector.extract_strided_slice %25 {offsets = [0, 1, 0], sizes = [10, 15, 4], strides = [1, 1, 1]} : vector<10x16x4xbf16> to vector<10x15x4xbf16>
    %33 = tpu.concatenate %32, %24 in 1 : vector<10x15x4xbf16>, vector<10x1x4xbf16> -> vector<10x16x4xbf16>
    %34 = vector.shape_cast %33 : vector<10x16x4xbf16> to vector<160x4xbf16>
    %c0_29 = arith.constant 0 : index
    %c8 = arith.constant 8 : index
    %35 = vector.load %arg14[%c0_29, %c8] : memref<160x72xbf16, #tpu.memory_space<vmem>>, vector<160x4xbf16>
    tpu.vector_store %arg14[%c0_29, %c8], %34 {strides = array<i32>} : memref<160x72xbf16, #tpu.memory_space<vmem>>, vector<160x4xbf16>,
    %c1 = arith.constant 1 : index
    %c0_30 = arith.constant 0 : index
    %c0_31 = arith.constant 0 : index
    %36 = vector.load %arg12[%c1, %c0_30, %c0_31] : memref<12x16x4xbf16, #tpu.memory_space<vmem>>, vector<10x16x4xbf16>
    %37 = vector.extract_strided_slice %36 {offsets = [0, 0, 0], sizes = [10, 15, 4], strides = [1, 1, 1]} : vector<10x16x4xbf16> to vector<10x15x4xbf16>
    %38 = tpu.concatenate %24, %37 in 1 : vector<10x1x4xbf16>, vector<10x15x4xbf16> -> vector<10x16x4xbf16>
    %39 = vector.shape_cast %38 : vector<10x16x4xbf16> to vector<160x4xbf16>
    %c0_32 = arith.constant 0 : index
    %c12 = arith.constant 12 : index
    %40 = vector.load %arg14[%c0_32, %c12] : memref<160x72xbf16, #tpu.memory_space<vmem>>, vector<160x4xbf16>
    tpu.vector_store %arg14[%c0_32, %c12], %39 {strides = array<i32>} : memref<160x72xbf16, #tpu.memory_space<vmem>>, vector<160x4xbf16>,
    %41 = vector.shape_cast %36 : vector<10x16x4xbf16> to vector<160x4xbf16>
    %c0_33 = arith.constant 0 : index
    %c16 = arith.constant 16 : index
    %42 = vector.load %arg14[%c0_33, %c16] : memref<160x72xbf16, #tpu.memory_space<vmem>>, vector<160x4xbf16>
    tpu.vector_store %arg14[%c0_33, %c16], %41 {strides = array<i32>} : memref<160x72xbf16, #tpu.memory_space<vmem>>, vector<160x4xbf16>,
    %43 = vector.extract_strided_slice %36 {offsets = [0, 1, 0], sizes = [10, 15, 4], strides = [1, 1, 1]} : vector<10x16x4xbf16> to vector<10x15x4xbf16>
    %44 = tpu.concatenate %43, %24 in 1 : vector<10x15x4xbf16>, vector<10x1x4xbf16> -> vector<10x16x4xbf16>
    %45 = vector.shape_cast %44 : vector<10x16x4xbf16> to vector<160x4xbf16>
    %c0_34 = arith.constant 0 : index
    %c20 = arith.constant 20 : index
    %46 = vector.load %arg14[%c0_34, %c20] : memref<160x72xbf16, #tpu.memory_space<vmem>>, vector<160x4xbf16>
    tpu.vector_store %arg14[%c0_34, %c20], %45 {strides = array<i32>} : memref<160x72xbf16, #tpu.memory_space<vmem>>, vector<160x4xbf16>,
    %c2_35 = arith.constant 2 : index
    %c0_36 = arith.constant 0 : index
    %c0_37 = arith.constant 0 : index
    %47 = vector.load %arg12[%c2_35, %c0_36, %c0_37] : memref<12x16x4xbf16, #tpu.memory_space<vmem>>, vector<10x16x4xbf16>
    %48 = vector.extract_strided_slice %47 {offsets = [0, 0, 0], sizes = [10, 15, 4], strides = [1, 1, 1]} : vector<10x16x4xbf16> to vector<10x15x4xbf16>
    %49 = tpu.concatenate %24, %48 in 1 : vector<10x1x4xbf16>, vector<10x15x4xbf16> -> vector<10x16x4xbf16>
    %50 = vector.shape_cast %49 : vector<10x16x4xbf16> to vector<160x4xbf16>
    %c0_38 = arith.constant 0 : index
    %c24 = arith.constant 24 : index
    %51 = vector.load %arg14[%c0_38, %c24] : memref<160x72xbf16, #tpu.memory_space<vmem>>, vector<160x4xbf16>
    tpu.vector_store %arg14[%c0_38, %c24], %50 {strides = array<i32>} : memref<160x72xbf16, #tpu.memory_space<vmem>>, vector<160x4xbf16>,
    %52 = vector.shape_cast %47 : vector<10x16x4xbf16> to vector<160x4xbf16>
    %c0_39 = arith.constant 0 : index
    %c28 = arith.constant 28 : index
    %53 = vector.load %arg14[%c0_39, %c28] : memref<160x72xbf16, #tpu.memory_space<vmem>>, vector<160x4xbf16>
    tpu.vector_store %arg14[%c0_39, %c28], %52 {strides = array<i32>} : memref<160x72xbf16, #tpu.memory_space<vmem>>, vector<160x4xbf16>,
    %54 = vector.extract_strided_slice %47 {offsets = [0, 1, 0], sizes = [10, 15, 4], strides = [1, 1, 1]} : vector<10x16x4xbf16> to vector<10x15x4xbf16>
    %55 = tpu.concatenate %54, %24 in 1 : vector<10x15x4xbf16>, vector<10x1x4xbf16> -> vector<10x16x4xbf16>
    %56 = vector.shape_cast %55 : vector<10x16x4xbf16> to vector<160x4xbf16>
    %c0_40 = arith.constant 0 : index
    %c32 = arith.constant 32 : index
    %57 = vector.load %arg14[%c0_40, %c32] : memref<160x72xbf16, #tpu.memory_space<vmem>>, vector<160x4xbf16>
    tpu.vector_store %arg14[%c0_40, %c32], %56 {strides = array<i32>} : memref<160x72xbf16, #tpu.memory_space<vmem>>, vector<160x4xbf16>,
    %c0_41 = arith.constant 0 : index
    %c0_42 = arith.constant 0 : index
    %58 = vector.load %arg14[%c0_41, %c0_42] : memref<160x72xbf16, #tpu.memory_space<vmem>>, vector<160x36xbf16>
    %c0_43 = arith.constant 0 : index
    %c0_44 = arith.constant 0 : index
    %59 = vector.load %arg7[%c0_43, %c0_44] : memref<36x8xbf16, #tpu.memory_space<vmem>>, vector<36x8xbf16>
    %cst_45 = arith.constant dense<0.000000e+00> : vector<160x8xf32>
    %60 = tpu.matmul %58, %59, %cst_45 {dimension_numbers = #tpu.dot_dimension_numbers<[1], [0], [0], [1], [0, 0, 1, 1], [], []>} : vector<160x36xbf16>, vector<36x8xbf16>, vector<160x8xf32> -> vector<160x8xf32>
    %c0_46 = arith.constant 0 : index
    %c0_47 = arith.constant 0 : index
    %61 = vector.load %arg8[%c0_46, %c0_47] : memref<1x8xf32, #tpu.memory_space<vmem>>, vector<1x8xf32>
    %62 = vector.broadcast %61 : vector<1x8xf32> to vector<160x8xf32>
    %63 = arith.addf %60, %62 : vector<160x8xf32>
    %cst_48 = arith.constant 0.000000e+00 : f32
    %64 = vector.broadcast %cst_48 : f32 to vector<160x8xf32>
    %65 = arith.maximumf %63, %64 : vector<160x8xf32>
    %66 = vector.shape_cast %65 : vector<160x8xf32> to vector<10x16x8xf32>
    %67 = arith.truncf %66 : vector<10x16x8xf32> to vector<10x16x8xbf16>
    %c0_49 = arith.constant 0 : index
    %c0_50 = arith.constant 0 : index
    %c0_51 = arith.constant 0 : index
    %68 = vector.load %arg13[%c0_49, %c0_50, %c0_51] : memref<10x16x8xbf16, #tpu.memory_space<vmem>>, vector<10x16x8xbf16>
    tpu.vector_store %arg13[%c0_49, %c0_50, %c0_51], %67 {strides = array<i32>} : memref<10x16x8xbf16, #tpu.memory_space<vmem>>, vector<10x16x8xbf16>,
    %c0_i32_52 = arith.constant 0 : i32
    %69 = arith.cmpi eq, %arg1, %c0_i32_52 : i32
    %70 = arith.extui %69 : i1 to i32
    %c0_i32_53 = arith.constant 0 : i32
    %71 = arith.cmpi ne, %70, %c0_i32_53 : i32
    scf.if %71 {
      %cst_96 = arith.constant 0.000000e+00 : bf16
      %131 = vector.broadcast %cst_96 : bf16 to vector<1x16x8xbf16>
      %c0_97 = arith.constant 0 : index
      %c0_98 = arith.constant 0 : index
      %c0_99 = arith.constant 0 : index
      %132 = vector.load %arg13[%c0_97, %c0_98, %c0_99] : memref<10x16x8xbf16, #tpu.memory_space<vmem>>, vector<1x16x8xbf16>
      tpu.vector_store %arg13[%c0_97, %c0_98, %c0_99], %131 {strides = array<i32>} : memref<10x16x8xbf16, #tpu.memory_space<vmem>>, vector<1x16x8xbf16>,
    } else {
    }
    %c1_i32_54 = arith.constant 1 : i32
    %72 = arith.cmpi eq, %arg1, %c1_i32_54 : i32
    %73 = arith.extui %72 : i1 to i32
    %c0_i32_55 = arith.constant 0 : i32
    %74 = arith.cmpi ne, %73, %c0_i32_55 : i32
    scf.if %74 {
      %cst_96 = arith.constant 0.000000e+00 : bf16
      %131 = vector.broadcast %cst_96 : bf16 to vector<1x16x8xbf16>
      %c9 = arith.constant 9 : index
      %c0_97 = arith.constant 0 : index
      %c0_98 = arith.constant 0 : index
      %132 = vector.load %arg13[%c9, %c0_97, %c0_98] : memref<10x16x8xbf16, #tpu.memory_space<vmem>>, vector<1x16x8xbf16>
      tpu.vector_store %arg13[%c9, %c0_97, %c0_98], %131 {strides = array<i32>} : memref<10x16x8xbf16, #tpu.memory_space<vmem>>, vector<1x16x8xbf16>,
    } else {
    }
    %cst_56 = arith.constant 0.000000e+00 : bf16
    %75 = vector.broadcast %cst_56 : bf16 to vector<8x1x8xbf16>
    %c0_57 = arith.constant 0 : index
    %c0_58 = arith.constant 0 : index
    %c0_59 = arith.constant 0 : index
    %76 = vector.load %arg13[%c0_57, %c0_58, %c0_59] : memref<10x16x8xbf16, #tpu.memory_space<vmem>>, vector<8x16x8xbf16>
    %77 = vector.extract_strided_slice %76 {offsets = [0, 0, 0], sizes = [8, 15, 8], strides = [1, 1, 1]} : vector<8x16x8xbf16> to vector<8x15x8xbf16>
    %78 = tpu.concatenate %75, %77 in 1 : vector<8x1x8xbf16>, vector<8x15x8xbf16> -> vector<8x16x8xbf16>
    %79 = vector.shape_cast %78 : vector<8x16x8xbf16> to vector<128x8xbf16>
    %c0_60 = arith.constant 0 : index
    %c0_61 = arith.constant 0 : index
    %80 = vector.load %arg14[%c0_60, %c0_61] : memref<160x72xbf16, #tpu.memory_space<vmem>>, vector<128x8xbf16>
    tpu.vector_store %arg14[%c0_60, %c0_61], %79 {strides = array<i32>} : memref<160x72xbf16, #tpu.memory_space<vmem>>, vector<128x8xbf16>,
    %81 = vector.shape_cast %76 : vector<8x16x8xbf16> to vector<128x8xbf16>
    %c0_62 = arith.constant 0 : index
    %c8_63 = arith.constant 8 : index
    %82 = vector.load %arg14[%c0_62, %c8_63] : memref<160x72xbf16, #tpu.memory_space<vmem>>, vector<128x8xbf16>
    tpu.vector_store %arg14[%c0_62, %c8_63], %81 {strides = array<i32>} : memref<160x72xbf16, #tpu.memory_space<vmem>>, vector<128x8xbf16>,
    %83 = vector.extract_strided_slice %76 {offsets = [0, 1, 0], sizes = [8, 15, 8], strides = [1, 1, 1]} : vector<8x16x8xbf16> to vector<8x15x8xbf16>
    %84 = tpu.concatenate %83, %75 in 1 : vector<8x15x8xbf16>, vector<8x1x8xbf16> -> vector<8x16x8xbf16>
    %85 = vector.shape_cast %84 : vector<8x16x8xbf16> to vector<128x8xbf16>
    %c0_64 = arith.constant 0 : index
    %c16_65 = arith.constant 16 : index
    %86 = vector.load %arg14[%c0_64, %c16_65] : memref<160x72xbf16, #tpu.memory_space<vmem>>, vector<128x8xbf16>
    tpu.vector_store %arg14[%c0_64, %c16_65], %85 {strides = array<i32>} : memref<160x72xbf16, #tpu.memory_space<vmem>>, vector<128x8xbf16>,
    %c1_66 = arith.constant 1 : index
    %c0_67 = arith.constant 0 : index
    %c0_68 = arith.constant 0 : index
    %87 = vector.load %arg13[%c1_66, %c0_67, %c0_68] : memref<10x16x8xbf16, #tpu.memory_space<vmem>>, vector<8x16x8xbf16>
    %88 = vector.extract_strided_slice %87 {offsets = [0, 0, 0], sizes = [8, 15, 8], strides = [1, 1, 1]} : vector<8x16x8xbf16> to vector<8x15x8xbf16>
    %89 = tpu.concatenate %75, %88 in 1 : vector<8x1x8xbf16>, vector<8x15x8xbf16> -> vector<8x16x8xbf16>
    %90 = vector.shape_cast %89 : vector<8x16x8xbf16> to vector<128x8xbf16>
    %c0_69 = arith.constant 0 : index
    %c24_70 = arith.constant 24 : index
    %91 = vector.load %arg14[%c0_69, %c24_70] : memref<160x72xbf16, #tpu.memory_space<vmem>>, vector<128x8xbf16>
    tpu.vector_store %arg14[%c0_69, %c24_70], %90 {strides = array<i32>} : memref<160x72xbf16, #tpu.memory_space<vmem>>, vector<128x8xbf16>,
    %92 = vector.shape_cast %87 : vector<8x16x8xbf16> to vector<128x8xbf16>
    %c0_71 = arith.constant 0 : index
    %c32_72 = arith.constant 32 : index
    %93 = vector.load %arg14[%c0_71, %c32_72] : memref<160x72xbf16, #tpu.memory_space<vmem>>, vector<128x8xbf16>
    tpu.vector_store %arg14[%c0_71, %c32_72], %92 {strides = array<i32>} : memref<160x72xbf16, #tpu.memory_space<vmem>>, vector<128x8xbf16>,
    %94 = vector.extract_strided_slice %87 {offsets = [0, 1, 0], sizes = [8, 15, 8], strides = [1, 1, 1]} : vector<8x16x8xbf16> to vector<8x15x8xbf16>
    %95 = tpu.concatenate %94, %75 in 1 : vector<8x15x8xbf16>, vector<8x1x8xbf16> -> vector<8x16x8xbf16>
    %96 = vector.shape_cast %95 : vector<8x16x8xbf16> to vector<128x8xbf16>
    %c0_73 = arith.constant 0 : index
    %c40 = arith.constant 40 : index
    %97 = vector.load %arg14[%c0_73, %c40] : memref<160x72xbf16, #tpu.memory_space<vmem>>, vector<128x8xbf16>
    tpu.vector_store %arg14[%c0_73, %c40], %96 {strides = array<i32>} : memref<160x72xbf16, #tpu.memory_space<vmem>>, vector<128x8xbf16>,
    %c2_74 = arith.constant 2 : index
    %c0_75 = arith.constant 0 : index
    %c0_76 = arith.constant 0 : index
    %98 = vector.load %arg13[%c2_74, %c0_75, %c0_76] : memref<10x16x8xbf16, #tpu.memory_space<vmem>>, vector<8x16x8xbf16>
    %99 = vector.extract_strided_slice %98 {offsets = [0, 0, 0], sizes = [8, 15, 8], strides = [1, 1, 1]} : vector<8x16x8xbf16> to vector<8x15x8xbf16>
    %100 = tpu.concatenate %75, %99 in 1 : vector<8x1x8xbf16>, vector<8x15x8xbf16> -> vector<8x16x8xbf16>
    %101 = vector.shape_cast %100 : vector<8x16x8xbf16> to vector<128x8xbf16>
    %c0_77 = arith.constant 0 : index
    %c48 = arith.constant 48 : index
    %102 = vector.load %arg14[%c0_77, %c48] : memref<160x72xbf16, #tpu.memory_space<vmem>>, vector<128x8xbf16>
    tpu.vector_store %arg14[%c0_77, %c48], %101 {strides = array<i32>} : memref<160x72xbf16, #tpu.memory_space<vmem>>, vector<128x8xbf16>,
    %103 = vector.shape_cast %98 : vector<8x16x8xbf16> to vector<128x8xbf16>
    %c0_78 = arith.constant 0 : index
    %c56 = arith.constant 56 : index
    %104 = vector.load %arg14[%c0_78, %c56] : memref<160x72xbf16, #tpu.memory_space<vmem>>, vector<128x8xbf16>
    tpu.vector_store %arg14[%c0_78, %c56], %103 {strides = array<i32>} : memref<160x72xbf16, #tpu.memory_space<vmem>>, vector<128x8xbf16>,
    %105 = vector.extract_strided_slice %98 {offsets = [0, 1, 0], sizes = [8, 15, 8], strides = [1, 1, 1]} : vector<8x16x8xbf16> to vector<8x15x8xbf16>
    %106 = tpu.concatenate %105, %75 in 1 : vector<8x15x8xbf16>, vector<8x1x8xbf16> -> vector<8x16x8xbf16>
    %107 = vector.shape_cast %106 : vector<8x16x8xbf16> to vector<128x8xbf16>
    %c0_79 = arith.constant 0 : index
    %c64 = arith.constant 64 : index
    %108 = vector.load %arg14[%c0_79, %c64] : memref<160x72xbf16, #tpu.memory_space<vmem>>, vector<128x8xbf16>
    tpu.vector_store %arg14[%c0_79, %c64], %107 {strides = array<i32>} : memref<160x72xbf16, #tpu.memory_space<vmem>>, vector<128x8xbf16>,
    %c0_80 = arith.constant 0 : index
    %c0_81 = arith.constant 0 : index
    %109 = vector.load %arg14[%c0_80, %c0_81] : memref<160x72xbf16, #tpu.memory_space<vmem>>, vector<128x72xbf16>
    %c0_82 = arith.constant 0 : index
    %c0_83 = arith.constant 0 : index
    %110 = vector.load %arg9[%c0_82, %c0_83] : memref<72x8xbf16, #tpu.memory_space<vmem>>, vector<72x8xbf16>
    %cst_84 = arith.constant dense<0.000000e+00> : vector<128x8xf32>
    %111 = tpu.matmul %109, %110, %cst_84 {dimension_numbers = #tpu.dot_dimension_numbers<[1], [0], [0], [1], [0, 0, 1, 1], [], []>} : vector<128x72xbf16>, vector<72x8xbf16>, vector<128x8xf32> -> vector<128x8xf32>
    %c0_85 = arith.constant 0 : index
    %c0_86 = arith.constant 0 : index
    %112 = vector.load %arg10[%c0_85, %c0_86] : memref<1x8xf32, #tpu.memory_space<vmem>>, vector<1x8xf32>
    %113 = vector.broadcast %112 : vector<1x8xf32> to vector<128x8xf32>
    %114 = arith.addf %111, %113 : vector<128x8xf32>
    %115 = vector.shape_cast %1 : vector<8x16x4xf32> to vector<128x4xf32>
    %116 = arith.truncf %115 : vector<128x4xf32> to vector<128x4xbf16>
    %c0_87 = arith.constant 0 : index
    %c0_88 = arith.constant 0 : index
    %117 = vector.load %arg5[%c0_87, %c0_88] : memref<4x4xbf16, #tpu.memory_space<vmem>>, vector<4x4xbf16>
    %cst_89 = arith.constant dense<0.000000e+00> : vector<128x4xf32>
    %118 = tpu.matmul %116, %117, %cst_89 {dimension_numbers = #tpu.dot_dimension_numbers<[1], [0], [0], [1], [0, 0, 1, 1], [], []>} : vector<128x4xbf16>, vector<4x4xbf16>, vector<128x4xf32> -> vector<128x4xf32>
    %c0_90 = arith.constant 0 : index
    %c0_91 = arith.constant 0 : index
    %119 = vector.load %arg6[%c0_90, %c0_91] : memref<1x4xf32, #tpu.memory_space<vmem>>, vector<1x4xf32>
    %120 = vector.broadcast %119 : vector<1x4xf32> to vector<128x4xf32>
    %121 = arith.addf %118, %120 : vector<128x4xf32>
    %122 = vector.extract_strided_slice %114 {offsets = [0, 0], sizes = [128, 4], strides = [1, 1]} : vector<128x8xf32> to vector<128x4xf32>
    %123 = arith.addf %122, %115 : vector<128x4xf32>
    %124 = vector.extract_strided_slice %114 {offsets = [0, 4], sizes = [128, 4], strides = [1, 1]} : vector<128x8xf32> to vector<128x4xf32>
    %125 = arith.addf %124, %121 : vector<128x4xf32>
    %126 = tpu.concatenate %123, %125 in 1 : vector<128x4xf32>, vector<128x4xf32> -> vector<128x8xf32>
    %127 = vector.shape_cast %126 : vector<128x8xf32> to vector<8x16x8xf32>
    %c0_92 = arith.constant 0 : index
    %c0_93 = arith.constant 0 : index
    %c0_94 = arith.constant 0 : index
    %c0_95 = arith.constant 0 : index
    %128 = vector.load %arg11[%c0_92, %c0_93, %c0_94, %c0_95] : memref<1x8x16x8xf32, #tpu.memory_space<vmem>>, vector<1x8x16x8xf32>
    %129 = vector.shape_cast %128 : vector<1x8x16x8xf32> to vector<8x16x8xf32>
    %130 = vector.shape_cast %127 : vector<8x16x8xf32> to vector<1x8x16x8xf32>
    tpu.vector_store %arg11[%c0_92, %c0_93, %c0_94, %c0_95], %130 {strides = array<i32>} : memref<1x8x16x8xf32, #tpu.memory_space<vmem>>, vector<1x8x16x8xf32>,
    return
  }
  func.func @transform_0(%arg0: i32, %arg1: i32) -> (i32, i32, i32, i32) {
    %c4_i32 = arith.constant 4 : i32
    %0 = arith.muli %arg1, %c4_i32 : i32
    %c1_i32 = arith.constant 1 : i32
    %1 = arith.subi %0, %c1_i32 : i32
    %c0_i32 = arith.constant 0 : i32
    %2 = arith.maxsi %1, %c0_i32 : i32
    %c0_i32_0 = arith.constant 0 : i32
    %c0_i32_1 = arith.constant 0 : i32
    %c0_i32_2 = arith.constant 0 : i32
    return %arg0, %2, %c0_i32_0, %c0_i32_1 : i32, i32, i32, i32
  }
  func.func @transform_1(%arg0: i32, %arg1: i32) -> (i32, i32, i32, i32) {
    %c0_i32 = arith.constant 0 : i32
    %c0_i32_0 = arith.constant 0 : i32
    %c0_i32_1 = arith.constant 0 : i32
    return %arg0, %arg1, %c0_i32, %c0_i32_0 : i32, i32, i32, i32
  }
  func.func @transform_2(%arg0: i32, %arg1: i32) -> (i32, i32, i32, i32) {
    %c1_i32 = arith.constant 1 : i32
    %0 = arith.addi %arg1, %c1_i32 : i32
    %c4_i32 = arith.constant 4 : i32
    %1 = arith.muli %0, %c4_i32 : i32
    %c7_i32 = arith.constant 7 : i32
    %2 = arith.minsi %1, %c7_i32 : i32
    %c0_i32 = arith.constant 0 : i32
    %c0_i32_0 = arith.constant 0 : i32
    %c0_i32_1 = arith.constant 0 : i32
    return %arg0, %2, %c0_i32, %c0_i32_0 : i32, i32, i32, i32
  }
  func.func @transform_3(%arg0: i32, %arg1: i32) -> (i32, i32) {
    %c0_i32 = arith.constant 0 : i32
    %c0_i32_0 = arith.constant 0 : i32
    %c0_i32_1 = arith.constant 0 : i32
    return %c0_i32, %c0_i32_0 : i32, i32
  }
  func.func @transform_4(%arg0: i32, %arg1: i32) -> (i32, i32) {
    %c0_i32 = arith.constant 0 : i32
    %c0_i32_0 = arith.constant 0 : i32
    %c0_i32_1 = arith.constant 0 : i32
    return %c0_i32, %c0_i32_0 : i32, i32
  }
  func.func @transform_5(%arg0: i32, %arg1: i32) -> (i32, i32) {
    %c0_i32 = arith.constant 0 : i32
    %c0_i32_0 = arith.constant 0 : i32
    %c0_i32_1 = arith.constant 0 : i32
    return %c0_i32, %c0_i32_0 : i32, i32
  }
  func.func @transform_6(%arg0: i32, %arg1: i32) -> (i32, i32) {
    %c0_i32 = arith.constant 0 : i32
    %c0_i32_0 = arith.constant 0 : i32
    %c0_i32_1 = arith.constant 0 : i32
    return %c0_i32, %c0_i32_0 : i32, i32
  }
  func.func @transform_7(%arg0: i32, %arg1: i32) -> (i32, i32) {
    %c0_i32 = arith.constant 0 : i32
    %c0_i32_0 = arith.constant 0 : i32
    %c0_i32_1 = arith.constant 0 : i32
    return %c0_i32, %c0_i32_0 : i32, i32
  }
  func.func @transform_8(%arg0: i32, %arg1: i32) -> (i32, i32) {
    %c0_i32 = arith.constant 0 : i32
    %c0_i32_0 = arith.constant 0 : i32
    %c0_i32_1 = arith.constant 0 : i32
    return %c0_i32, %c0_i32_0 : i32, i32
  }
  func.func @transform_9(%arg0: i32, %arg1: i32) -> (i32, i32, i32, i32) {
    %c0_i32 = arith.constant 0 : i32
    %c0_i32_0 = arith.constant 0 : i32
    %c0_i32_1 = arith.constant 0 : i32
    return %arg0, %arg1, %c0_i32, %c0_i32_0 : i32, i32, i32, i32
  }
}

</mosaic_0001>

<bundles_post_ra>
// kernel: tpu_custom_call.1
= control target key start
LH: loop header
LB: loop body
LE: loop exit
PB: predicated region body
PF: predicated region fallthrough
CT: control target
= control target key end

     0   :  { %s3301_s30 = smov 0   ;;  %s3303_s10 = smov 0   ;;  %s4421_s0 = inlined_call_operand.vmem [shape: f32[2,16,16,4], index: 0, kind: input, shape index: {}]   ;;  %s4422_s1 = inlined_call_operand.vmem [shape: f32[2,16,16,4], index: 1, kind: input, shape index: {}]   ;;  %s4423_s2 = inlined_call_operand.vmem [shape: f32[2,16,16,4], index: 2, kind: input, shape index: {}]   ;;  %s4424_s3 = inlined_call_operand.vmem [shape: bf16[4,4], index: 3, kind: input, shape index: {}]   ;;  %s4425_s4 = inlined_call_operand.vmem [shape: f32[1,4], index: 4, kind: input, shape index: {}]   ;;  %s4426_s5 = inlined_call_operand.vmem [shape: bf16[36,8], index: 5, kind: input, shape index: {}]   ;;  %s4427_s6 = inlined_call_operand.vmem [shape: f32[1,8], index: 6, kind: input, shape index: {}]   ;;  %s4428_s7 = inlined_call_operand.vmem [shape: bf16[72,8], index: 7, kind: input, shape index: {}]   ;;  %s4429_s8 = inlined_call_operand.vmem [shape: f32[1,8], index: 8, kind: input, shape index: {}]   ;;  %s4430_s9 = inlined_call_operand.vmem [shape: f32[2,16,16,8], index: 9, kind: output, shape index: {}]  }
   0x1   :  { %s3305_s11 = smov 0   ;;  %s3307_s12 = smov 0  }
   0x2   :  { %s3309_s13 = smov 0  }
   0x3 LB: > { %s28_s14 = sadd.s32 1, %s3227_s11  ;;  %s31_s15 = sadd.s32 1, %s3231_s12  ;;  %s3235_s13 = sphi %s3309_s13, %s19_s13   ;;  %s3231_s12 = sphi %s3307_s12, %s4449_s12   ;;  %s3227_s11 = sphi %s3305_s11, %s4448_s11   ;;  %s3223_s10 = sphi %s3303_s10, %s4447_s10   ;;  %s3219_s30 = sphi %s3301_s30, %s4446_s30  }
   0x4   : > { %p29_p0 = scmp.ge.s32.totalorder %s28_s14, 2  ;;  %p2953_p1 = scmp.ge.s32.totalorder %s3235_s13, 1 }
   0x5   : > { %p377_p2 = scmp.lt.s32.totalorder %s3235_s13, 5 }
   0x6   : > { %s4451_s14 = smov (%p29_p0, %s28_s14), 0  ;;  %s4453_s15 = smov (!%p29_p0, %s31_s15), %s3231_s12 }
   0x7   : > { %p378_p3 = pnand %p2953_p1, %p377_p2  ;;  %p33_p4 = scmp.ge.s32.totalorder %s4453_s15, 2 }
   0x8   : > { %p456_p5 = scmp.lt.s32.totalorder (!%p378_p3), %s3223_s10, 1  ;;  %s2960_s16 = sshll.u32 (!%p378_p3), %s3219_s30, 3  ;;  %vm562_vm0 = vcmask (!%p378_p3), 31744   ;;  %vm693_vm2 = vcmask (!%p378_p3), 1040384   ;;  %vm694_vm3 = vsmask.f32 (!%p378_p3), 256 }
   0x9   : > { %s4455_s15 = smov (%p33_p4, %s4453_s15), 0  ;;  %381 = sbr.rel (%p378_p3) target bundleno = 1022 (0x3fe), region = 56 }
   0xa   : > { %p473_p6 = scmp.lt.s32.totalorder (!%p378_p3), %s2960_s16, 15  ;;  %s2954_s21 = sshll.u32 (!%p378_p3), %s3219_s30, 2  ;;  %vm3468_vm4 = vmand (!%p378_p3), %vm693_vm2, %vm694_vm3  ;;  %vm797_vm5 = vcmask (!%p378_p3), 1047552   ;;  %vm798_vm6 = vsmask.f32 (!%p378_p3), 7424  ;;  %vm1516_vm9 = vcmask (!%p378_p3), 1041408  }
   0xb   : > { %s2955_s28 = sadd.s32 (!%p378_p3), 4294967295, %s2954_s21  ;;  %s3019_s29 = sadd.s32 (!%p378_p3), 4, %s2954_s21  ;;  %vm3491_vm7 = vmand (!%p378_p3), %vm797_vm5, %vm798_vm6  ;;  %vm756_vm10 = vcmask (!%p378_p3), 64544   ;;  %vm850_vm11 = vcmask (!%p378_p3), 97344   ;;  %vm1002_vm12 = vcmask (!%p378_p3), 130144   ;;  %vm1053_vm13 = vcmask (!%p378_p3), 162944  }
   0xc   : > { %p453_p7 = scmp.gt.s32.totalorder (!%p378_p3), %s2955_s28, 0  ;;  %p483_p8 = scmp.lt.s32.totalorder (!%p378_p3), %s3019_s29, 7  ;;  %vm1144_vm14 = vcmask (!%p378_p3), 195744   ;;  %vm1295_vm15 = vcmask (!%p378_p3), 228544   ;;  %vm1437_vm2 = vcmask (!%p378_p3), 294144   ;;  %vm1485_vm3 = vcmask (!%p378_p3), 293888  }
   0xd   : > { %p528_p9 = scmp.eq.s32.totalorder (!%p378_p3), %s3219_s30, 0  ;;  %s3237_s21 = smov (!%p378_p3), 28   ;;  %vm1663_vm5 = vcmask (!%p378_p3), 64512  }
   0xe   : > { %s3238_s22 = smov (!%p378_p3), 16   ;;  %p544_p12 = scmp.eq.s32.totalorder (!%p378_p3), %s3219_s30, 1 }
   0xf   : > { %s3242_s25 = smov (!%p378_p3), 24   ;;  %p2987_p13 = scmp.ne.s32.totalorder (!%p378_p3), %s3219_s30, 0 }
  0x10   : > { %s4457_s10 = smov (!%p456_p5, %s3223_s10), 1  ;;  %s4459_s16 = smov (!%p473_p6, %s2960_s16), 15 }
  0x11   : > { %s3334_s17 = sshll.u32 %s4457_s10, 5  ;;  %s2961_s18 = sshll.u32 %s4459_s16, 1 }
  0x12   : > { %s477_s19 = sadd.s32 %s2961_s18, %s3334_s17  ;;  %s4461_s28 = smov (!%p453_p7, %s2955_s28), 0 }
  0x13   : > { %s2963_s20 = sshll.u32 %s477_s19, 3  ;;  %s4463_s29 = smov (!%p483_p8, %s3019_s29), 7 }
  0x14   : > { %s3341_s24 = scalar_lea.vmem %s4422_s1, %s2963_s20  ;;  %s3346_s27 = scalar_lea.vmem %s4430_s9, %s2963_s20 }
  0x15   : > { %v3349_v0 = vld [vmem:[%s3341_s24] sm:$0xff]  ;;  %v3352_v1 = vld [vmem:[%s3341_s24 + $0x8] sm:$0xff]  ;;  %v3364_v7 = vld [vmem:[%s3341_s24 + $0x10] sm:$0xff]  ;;  %s2956_s10 = sshll.u32 %s4461_s28, 1  ;;  %s2965_s16 = sshll.u32 %s4463_s29, 1 }
  0x16   : > { %v3355_v2 = vld [vmem:[%s3341_s24 + $0x40] sm:$0xff]  ;;  %v565_v3 = vmax.f32 %v3349_v0, 0.0  ;;  %v566_v4 = vmax.f32 %v3352_v1, 0.0  ;;  %v3360_v5 = vld [vmem:[%s3341_s24 + $0x48] sm:$0xff]  ;;  %v3367_v8 = vld [vmem:[%s3341_s24 + $0x18] sm:$0xff]  ;;  %v567_v10 = vmax.f32 %v3364_v7, 0.0 }
  0x17   : > { %v573_v6 = vmax.f32 %v3355_v2, 0.0  ;;  %v574_v9 = vmax.f32 %v3360_v5, 0.0  ;;  %v568_v11 = vmax.f32 %v3367_v8, 0.0  ;;  %v3373_v12 = vld [vmem:[%s3341_s24 + $0x50] sm:$0xff]  ;;  %v3376_v14 = vld [vmem:[%s3341_s24 + $0x58] sm:$0xff]  ;;  %v3380_v16 = vld [vmem:[%s3341_s24 + $0x20] sm:$0xff] }
  0x18   : > { %v581_v13 = vpack.c.bf16 %v566_v4, %v565_v3  ;;  %v575_v15 = vmax.f32 %v3373_v12, 0.0  ;;  %v3383_v17 = vld [vmem:[%s3341_s24 + $0x28] sm:$0xff]  ;;  %v576_v20 = vmax.f32 %v3376_v14, 0.0  ;;  %v569_v21 = vmax.f32 %v3380_v16, 0.0  ;;  %v3390_v22 = vld [vmem:[%s3341_s24 + $0x60] sm:$0xff]  ;;  %v3396_v24 = vld [vmem:[%s3341_s24 + $0x30] sm:$0xff] }
  0x19   : > { %v585_v18 = vpack.c.bf16 %v574_v9, %v573_v6  ;;  %v582_v19 = vpack.c.bf16 %v568_v11, %v567_v10  ;;  %v3393_v23 = vld [vmem:[%s3341_s24 + $0x68] sm:$0xff]  ;;  %v570_v25 = vmax.f32 %v3383_v17, 0.0  ;;  %v577_v26 = vmax.f32 %v3390_v22, 0.0  ;;  %v3406_v28 = vld [vmem:[%s3341_s24 + $0x38] sm:$0xff]  ;;  %v3415_v32 = vld [vmem:[%s3341_s24 + $0x70] sm:$0xff]  ;;  %p458_p10 = scmp.lt.s32.totalorder %s2956_s10, 15 }
  0x1a   : > { %590 = vst.msk [vmem:[#allocation2 + $0x10] sm:$0xff] %vm562_vm0, %v581_v13  ;;  %v578_v27 = vmax.f32 %v3393_v23, 0.0  ;;  %v571_v29 = vmax.f32 %v3396_v24, 0.0  ;;  %v586_v30 = vpack.c.bf16 %v576_v20, %v575_v15  ;;  %v572_v31 = vmax.f32 %v3406_v28, 0.0  ;;  %v3418_v33 = vld [vmem:[%s3341_s24 + $0x78] sm:$0xff]  ;;  %p3435_p11 = scmp.lt.s32.totalorder %s2965_s16, 15 }
  0x1b   : > { %594 = vst.msk [vmem:[#allocation2 + $0x30] sm:$0xff] %vm562_vm0, %v585_v18  ;;  %591 = vst.msk [vmem:[#allocation2 + $0x18] sm:$0xff] %vm562_vm0, %v582_v19  ;;  %v583_v34 = vpack.c.bf16 %v570_v25, %v569_v21  ;;  %v579_v36 = vmax.f32 %v3415_v32, 0.0  ;;  %v580_v37 = vmax.f32 %v3418_v33, 0.0  ;;  %s4465_s10 = smov (!%p458_p10, %s2956_s10), 15 }
  0x1c   : > { %v587_v35 = vpack.c.bf16 %v578_v27, %v577_v26  ;;  %595 = vst.msk [vmem:[#allocation2 + $0x38] sm:$0xff] %vm562_vm0, %v586_v30  ;;  %v584_v38 = vpack.c.bf16 %v572_v31, %v571_v29  ;;  %s537_s18 = scalar_select %p528_p9, 1, 0 }
  0x1d   : > { %592 = vst.msk [vmem:[#allocation2 + $0x20] sm:$0xff] %vm562_vm0, %v583_v34  ;;  %v588_v39 = vpack.c.bf16 %v580_v37, %v579_v36  ;;  %s2957_s19 = sshll.u32 %s4465_s10, 1  ;;  %s3239_s10 = smov 4  }
  0x1e   : > { %596 = vst.msk [vmem:[#allocation2 + $0x40] sm:$0xff] %vm562_vm0, %v587_v35  ;;  %593 = vst.msk [vmem:[#allocation2 + $0x28] sm:$0xff] %vm562_vm0, %v584_v38  ;;  %s462_s20 = sadd.s32 %s3334_s17, %s2957_s19  ;;  %v538_v41 = vstv %s537_s18  ;;  %s4467_s16 = smov (!%p3435_p11, %s2965_s16), 15 }
  0x1f   : > { %597 = vst.msk [vmem:[#allocation2 + $0x48] sm:$0xff] %vm562_vm0, %v588_v39  ;;  %s2959_s23 = sshll.u32 %s462_s20, 3  ;;  %vm3446_vm1 = vcmp.eq.s32.totalorder %v538_v41, 1  ;;  %s2966_s29 = sshll.u32 %s4467_s16, 1 }
  0x20   : > { %s464_s28 = scalar_lea.vmem %s4421_s0, %s2959_s23  ;;  %s3503_s16 = sadd.s32 %s2966_s29, %s3334_s17 }
  0x21   : > { %v1155_v40 = vld [vmem:[#allocation2 + $0x10] sm:$0xff]  ;;  %v529_v47 = vld [vmem:[%s464_s28] sm:$0xff]  ;;  %v530_v48 = vld [vmem:[%s464_s28 + $0x8] sm:$0xff]  ;;  %s3240_s18 = smov 12   ;;  %s2968_s17 = sshll.u32 %s3503_s16, 3 }
  0x22   : > { %1316 = vrot.lane.b32.xlu0 %v1155_v40, %s3237_s21  ;;  %v1166_v42 = vshrl.u32 %v1155_v40, 16  ;;  %1025 = vrot.lane.b32.xlu1 %v1155_v40, %s3238_s22  ;;  %v1169_v43 = vshll.u32 %v1155_v40, 16  ;;  %v3439_v44 = vld [vmem:[#allocation2 + $0x30] sm:$0xff]  ;;  %v3441_v45 = vld [vmem:[#allocation2 + $0x18] sm:$0xff]  ;;  %v533_v51 = vmax.f32 %v529_v47, 0.0  ;;  %v534_v52 = vmax.f32 %v530_v48, 0.0  ;;  %s3547_s24 = scalar_lea.vmem %s4423_s2, %s2968_s17 }
  0x23   : > { %v531_v50 = vld [vmem:[%s464_s28 + $0x10] sm:$0xff]  ;;  %v532_v53 = vld [vmem:[%s464_s28 + $0x18] sm:$0xff]  ;;  %v1173_v54 = vshrl.u32 %v3441_v45, 16  ;;  %v656_v57 = vshrl.u32 %v3439_v44, 16  ;;  %v1176_v4 = vshll.u32 %v3441_v45, 16  ;;  %v659_v20 = vshll.u32 %v3439_v44, 16 }
  0x24   : > { %v882_v46 = vrot.slane %v1166_v42, 7  ;;  %v1066_v55 = vrot.slane %v1169_v43, 1  ;;  %v535_v56 = vmax.f32 %v531_v50, 0.0  ;;  %v540_v59 = vsel %vm3446_vm1, 0.0, %v533_v51  ;;  %v3483_v13 = vld [vmem:[#allocation2 + $0x20] sm:$0xff]  ;;  %v3511_v34 = vld [vmem:[#allocation2 + $0x38] sm:$0xff] }
  0x25   : > { %v541_v60 = vsel %vm3446_vm1, 0.0, %v534_v52  ;;  %v536_v63 = vmax.f32 %v532_v53, 0.0  ;;  %v658_v3 = vrot.slane %v656_v57, 7  ;;  %v637_v9 = vrot.slane %v1173_v54, 7  ;;  %v3496_v21 = vld [vmem:[#allocation2 + $0x40] sm:$0xff]  ;;  %v3500_v27 = vld [vmem:[#allocation2 + $0x28] sm:$0xff] }
  0x26   : > { %738 = vrot.lane.b32.xlu0 %v3439_v44, %s3239_s10  ;;  %1318 = vrot.lane.b32.xlu1 %v3441_v45, %s3237_s21  ;;  %v885_v58 = vor.u32 %v1169_v43, %v882_v46  ;;  %v560_v62 = vpack.c.bf16 %v541_v60, %v540_v59  ;;  %v542_v6 = vsel %vm3446_vm1, 0.0, %v535_v56  ;;  %v1067_v10 = vor.u32 %v1166_v42, %v1066_v55  ;;  %v3526_v48 = vld [vmem:[#allocation2 + $0x48] sm:$0xff]  ;;  %s3241_s19 = smov 20   ;;  %s3243_s28 = smov 32  }
  0x27   : > { %v543_v11 = vsel %vm3446_vm1, 0.0, %v536_v63  ;;  %v1359_v25 = vrot.slane %v1176_v4, 1  ;;  %v4431_v26 = vshrl.u32 %v3483_v13, 16  ;;  %v661_v29 = vor.u32 %v659_v20, %v658_v3  ;;  %s553_s26 = scalar_select %p544_p12, 1, 0 }
  0x28   : > { %563 = vst.msk [vmem:[#allocation2] sm:$0xff] %vm562_vm0, %v560_v62  ;;  %v3488_v15 = vsel %vm3468_vm4, 0, %v885_v58  ;;  %v561_v19 = vpack.c.bf16 %v543_v11, %v542_v6  ;;  %v640_v30 = vor.u32 %v1176_v4, %v637_v9  ;;  %v3509_v31 = vsel %vm3491_vm7, %v1067_v10, 0  ;;  %s3244_s23 = smov 8  }
  0x29   : > { %v896_v35 = vrot.slane %v4431_v26, 7  ;;  %v4433_v36 = vshll.u32 %v3483_v13, 16  ;;  %v4432_v37 = vshrl.u32 %v3496_v21, 16  ;;  %v925_v38 = vshll.u32 %v3496_v21, 16  ;;  %708 = vst.msk [vmem:[#allocation4 + $0x10] sm:$0xff] %vm562_vm0, %v3488_v15 }
  0x2a   : > { %732 = vrot.lane.b32.xlu0 %v3441_v45, %s3239_s10  ;;  %730 = vrot.lane.b32.xlu1 %v1155_v40, %s3239_s10  ;;  %564 = vst.msk [vmem:[#allocation2 + $0x8] sm:$0xff] %vm562_vm0, %v561_v19  ;;  %v663_v39 = vshrl.u32 %v3511_v34, 16  ;;  %v666_v40 = vshll.u32 %v3511_v34, 16  ;;  %v1187_v41 = vshrl.u32 %v3500_v27, 16  ;;  %v1360_v43 = vor.u32 %v1359_v25, %v1173_v54  ;;  %v545_v19 = vld [vmem:[%s3547_s24] sm:$0xff] }
  0x2b   : > { %v899_v46 = vor.u32 %v4433_v36, %v896_v35  ;;  %v924_v47 = vrot.slane %v4432_v37, 7  ;;  %v1190_v52 = vshll.u32 %v3500_v27, 16  ;;  %v3536_v54 = vsel %vm3468_vm4, 0, %v640_v30 }
  0x2c   : > { %v665_v50 = vrot.slane %v663_v39, 7  ;;  %v1189_v51 = vrot.slane %v1187_v41, 7  ;;  %v1215_v62 = vshrl.u32 %v3526_v48, 16  ;;  %v3562_v9 = vsel %vm3491_vm7, %v1360_v43, 0  ;;  %709 = vst.msk [vmem:[#allocation4 + $0x18] sm:$0xff] %vm562_vm0, %v3536_v54 }
  0x2d   : > { %v3540_v55 = vsel %vm3468_vm4, 0, %v899_v46  ;;  %v927_v56 = vor.u32 %v925_v38, %v924_v47  ;;  %v3564_v10 = vrot.slane %v659_v20, 1  ;;  %v546_v46 = vld [vmem:[%s3547_s24 + $0x8] sm:$0xff]  ;;  %v1218_v43 = vshll.u32 %v3526_v48, 16 }
  0x2e   : > { %974 = vrot.lane.b32.xlu1 %v3488_v15, %s3240_s18  ;;  %v1192_v60 = vor.u32 %v1190_v52, %v1189_v51  ;;  %710 = vst.msk [vmem:[#allocation4 + $0x20] sm:$0xff] %vm562_vm0, %v3540_v55  ;;  %v668_v20 = vor.u32 %v666_v40, %v665_v50  ;;  %v1363_v47 = vrot.slane %v1190_v52, 1  ;;  %v3583_v51 = vsel %vm3468_vm4, 0, %v661_v29 }
  0x2f   : > { %v603_v42 = vld [vmem:[#allocation2] sm:$0xff]  ;;  %v3555_v6 = vsel %vm3468_vm4, 0, %v927_v56  ;;  %v1371_v50 = vrot.slane %v1218_v43, 1  ;;  %v550_v26 = vmax.f32 %v546_v46, 0.0  ;;  %v554_v36 = vstv %s553_s26  ;;  %712 = vst.msk [vmem:[#allocation4 + $0x30] sm:$0xff] %vm562_vm0, %v3583_v51 }
  0x30   : > { %726 = vrot.lane.b32.xlu0 %v603_v42, %s3239_s10  ;;  %v617_v49 = vshll.u32 %v603_v42, 16  ;;  %v614_v53 = vshrl.u32 %v603_v42, 16  ;;  %v3568_v11 = vsel %vm3468_vm4, 0, %v1192_v60  ;;  %714 = vst.msk [vmem:[#allocation4 + $0x40] sm:$0xff] %vm562_vm0, %v3555_v6  ;;  %v1217_v42 = vrot.slane %v1215_v62, 7 }
  0x31   : > { %v604_v58 = vld [vmem:[#allocation2 + $0x8] sm:$0xff]  ;;  %711 = vst.msk [vmem:[#allocation4 + $0x28] sm:$0xff] %vm562_vm0, %v3568_v11  ;;  %v1364_v60 = vor.u32 %v1363_v47, %v1187_v41  ;;  %vm3598_vm8 = vcmp.eq.s32.totalorder %v554_v36, 1  ;;  %v547_v41 = vld [vmem:[%s3547_s24 + $0x10] sm:$0xff]  ;;  %v781_v47 = vrot.slane %v666_v40, 1  ;;  %vm1346_vm1 = vcmask 261344  }
  0x32   : > { %1116 = vrot.lane.b32.xlu1 %v3509_v31, %s3241_s19  ;;  %v767_v59 = vrot.slane %v617_v49, 1  ;;  %v616_v63 = vrot.slane %v614_v53, 7  ;;  %v621_v3 = vshrl.u32 %v604_v58, 16  ;;  %v624_v4 = vshll.u32 %v604_v58, 16 }
  0x33   : > { %v551_v46 = vmax.f32 %v547_v41, 0.0 }
  0x34   : > { %728 = vrot.lane.b32.xlu0 %v604_v58, %s3239_s10  ;;  %v623_v25 = vrot.slane %v621_v3, 7  ;;  %v768_v30 = vor.u32 %v767_v59, %v614_v53  ;;  %v769_v35 = vrot.slane %v624_v4, 1  ;;  %v619_v56 = vor.u32 %v617_v49, %v616_v63 }
  0x35   : > { %v549_v53 = vmax.f32 %v545_v19, 0.0  ;;  %v1220_v59 = vor.u32 %v1218_v43, %v1217_v42  ;;  %v1372_v63 = vor.u32 %v1371_v50, %v1215_v62  ;;  %v3634_v42 = vsel %vm3468_vm4, 0, %v668_v20  ;;  %v3190_v20 = vld [vmem:[%s4426_s5 + $0x8] sm:$0xff]  }
  0x36   : > { %1267 = vrot.lane.b32.xlu1 %v3536_v54, %s3242_s25  ;;  %v626_v37 = vor.u32 %v624_v4, %v623_v25  ;;  %v800_v52 = vsel %vm3491_vm7, %v768_v30, 0  ;;  %v770_v29 = vor.u32 %v769_v35, %v621_v3  ;;  %v548_v4 = vld [vmem:[%s3547_s24 + $0x18] sm:$0xff]  ;;  %v557_v3 = vsel %vm3598_vm8, 0.0, %v550_v26  ;;  %v3189_v30 = vld [vmem:[%s4426_s5] sm:$0xff]   ;;  %713 = vst.msk [vmem:[#allocation4 + $0x38] sm:$0xff] %vm562_vm0, %v3634_v42 }
  0x37   : > { %v3592_v49 = vsel %vm3468_vm4, 0, %v1220_v59  ;;  %v556_v25 = vsel %vm3598_vm8, 0.0, %v549_v53  ;;  %v3619_v36 = vsel %vm3491_vm7, %v1372_v63, 0  ;;  %v696_v26 = vsel %vm3468_vm4, 0, %v619_v56  ;;  %3055 = vmatprep.subr.bf16.mxu0 %v3189_v30  ;;  %3125 = vmatprep.subr.bf16.mxu1 %v3189_v30 }
  0x38   : > { %1023 = vrot.lane.b32.xlu0 %v604_v58, %s3238_s22  ;;  %v3596_v58 = vsel %vm3491_vm7, %v1364_v60, 0  ;;  %715 = vst.msk [vmem:[#allocation4 + $0x48] sm:$0xff] %vm562_vm0, %v3592_v49  ;;  %v598_v62 = vpack.c.bf16 %v557_v3, %v556_v25  ;;  %706 = vst.msk [vmem:[#allocation4] sm:$0xff] %vm562_vm0, %v696_v26  ;;  %v697_v35 = vsel %vm3468_vm4, 0, %v626_v37  ;;  %v552_v43 = vmax.f32 %v548_v4, 0.0  ;;  %3056 = vmatpush3.bf16.msra.mxu0 %v3189_v30 }
  0x39   : > { %707 = vst.msk [vmem:[#allocation4 + $0x8] sm:$0xff] %vm562_vm0, %v697_v35  ;;  %3128 = vmatpush3.bf16.msra.mxu1 %v3189_v30  ;;  %v801_v53 = vsel %vm3491_vm7, %v770_v29, 0  ;;  %v780_v59 = vor.u32 %v3564_v10, %v656_v57  ;;  %3057 = vmatprep.subr.bf16.mxu0 %v3190_v20  ;;  %v3191_v60 = vld [vmem:[%s4426_s5 + $0x10] ss:$0 sps:$4 sm:$0x33]   ;;  %v782_v57 = vor.u32 %v781_v47, %v663_v39  ;;  %v4443_v39 = vshll.u32 %v3483_v13, 16 }
  0x3a   : > { %1409 = vrot.lane.b32.xlu1 %v3562_v9, %s3243_s28  ;;  %601 = vst.msk [vmem:[#allocation2 + $0x50] sm:$0xff] %vm562_vm0, %v598_v62  ;;  %v559_v37 = vsel %vm3598_vm8, 0.0, %v552_v43  ;;  %3126 = vmatprep.subr.bf16.mxu1 %v3190_v20  ;;  %v1518_v10 = vsel %vm1516_vm9, %v3191_v60, 0 }
  0x3b   : > { %v3665_v40 = vsel %vm3491_vm7, %v780_v59, 0  ;;  %v3677_v50 = vsel %vm3491_vm7, %v782_v57, 0 }
  0x3c   : > { %1265 = vrot.lane.b32.xlu0 %v3488_v15, %s3242_s25  ;;  %v558_v15 = vsel %vm3598_vm8, 0.0, %v551_v46  ;;  %3058 = vmatpush3.bf16.msra.mxu0 %v3190_v20 }
  0x3d   : > { %v599_v56 = vpack.c.bf16 %v559_v37, %v558_v15  ;;  %3129 = vmatpush3.bf16.msra.mxu1 %v3190_v20  ;;  %3131 = vmatprep.subr.msk.bf16.mxu0 %vm1516_vm9, %v3191_v60 }
  0x3e   : > { %740 = vrot.lane.b32.xlu1 %v3511_v34, %s3239_s10  ;;  %3132 = vmatprep.subr.msk.bf16.mxu1 %vm1516_vm9, %v3191_v60 }
  0x3f   : > { %602 = vst.msk [vmem:[#allocation2 + $0x58] sm:$0xff] %vm562_vm0, %v599_v56 }
  0x40   : > { %1407 = vrot.lane.b32.xlu0 %v3509_v31, %s3243_s28  ;;  %3060 = vmatpush3.bf16.msra.mxu0 %v1518_v10 }
  0x41   : > { %3130 = vmatpush3.bf16.msra.mxu1 %v1518_v10 }
  0x42   : > { %820 = vrot.lane.b32.xlu1 %v800_v52, %s3244_s23  ;;  %v4444_v52 = vshrl.u32 %v3496_v21, 16 }
  0x44   : > { %972 = vrot.lane.b32.xlu0 %v697_v35, %s3240_s18 }
  0x46   : > { %822 = vrot.lane.b32.xlu1 %v801_v53, %s3244_s23  ;;  %v1164_v35 = vld [vmem:[#allocation2 + $0x58] sm:$0xff] }
  0x47   : > { %v1229_v46 = vshrl.u32 %v1164_v35, 16  ;;  %v1232_v37 = vshll.u32 %v1164_v35, 16 }
  0x48   : > { %1114 = vrot.lane.b32.xlu0 %v801_v53, %s3241_s19 }
  0x49   : > { %v1231_v15 = vrot.slane %v1229_v46, 7  ;;  %v1375_v10 = vrot.slane %v1232_v37, 1 }
  0x4a   : > { %832 = vrot.lane.b32.xlu1 %v3665_v40, %s3244_s23 }
  0x4c   : > { %824 = vrot.lane.b32.xlu0 %v3509_v31, %s3244_s23  ;;  %v1078_v31 = vrot.slane %v925_v38, 1  ;;  %v4445_v38 = vshrl.u32 %v3483_v13, 16 }
  0x4e   : > { %834 = vrot.lane.b32.xlu1 %v3677_v50, %s3244_s23  ;;  %v1079_v29 = vor.u32 %v1078_v31, %v4444_v52 }
  0x50   : > { %826 = vrot.lane.b32.xlu0 %v3562_v9, %s3244_s23 }
  0x52   : > { %984 = vrot.lane.b32.xlu1 %v3634_v42, %s3240_s18 }
  0x54   : > { %976 = vrot.lane.b32.xlu0 %v3536_v54, %s3240_s18  ;;  %v1070_v54 = vrot.slane %v4443_v39, 1 }
  0x56   : > { %986 = vrot.lane.b32.xlu1 %v3555_v6, %s3240_s18  ;;  %v1071_v63 = vor.u32 %v1070_v54, %v4445_v38 }
  0x58   : > { %978 = vrot.lane.b32.xlu0 %v3540_v55, %s3240_s18  ;;  %v1097_v19 = vsel %vm3491_vm7, %v1071_v63, 0 }
  0x5a   : > { %1035 = vrot.lane.b32.xlu1 %v3511_v34, %s3238_s22 }
  0x5c   : > { %1027 = vrot.lane.b32.xlu0 %v3441_v45, %s3238_s22  ;;  %v1101_v45 = vsel %vm3491_vm7, %v1079_v29, 0 }
  0x5e   : > { %1037 = vrot.lane.b32.xlu1 %v3496_v21, %s3238_s22 }
  0x60   : > { %1029 = vrot.lane.b32.xlu0 %v3483_v13, %s3238_s22 }
  0x62   : > { %1126 = vrot.lane.b32.xlu1 %v3677_v50, %s3241_s19 }
  0x64   : > { %1118 = vrot.lane.b32.xlu0 %v3562_v9, %s3241_s19 }
  0x66   : > { %1128 = vrot.lane.b32.xlu1 %v1101_v45, %s3241_s19 }
  0x68   : > { %1120 = vrot.lane.b32.xlu0 %v1097_v19, %s3241_s19 }
  0x6a   : > { %1277 = vrot.lane.b32.xlu1 %v3555_v6, %s3242_s25 }
  0x6c   : > { %1269 = vrot.lane.b32.xlu0 %v3540_v55, %s3242_s25  ;;  %v871_v55 = vld [vmem:[#allocation2 + $0x50] sm:$0xff] }
  0x6d   : > { %v936_v6 = vshrl.u32 %v871_v55, 16  ;;  %v939_v9 = vshll.u32 %v871_v55, 16 }
  0x6e   : > { %1279 = vrot.lane.b32.xlu1 %v3592_v49, %s3242_s25 }
  0x70   : > { %1271 = vrot.lane.b32.xlu0 %v3568_v11, %s3242_s25 }
  0x72   : > { %1328 = vrot.lane.b32.xlu1 %v3496_v21, %s3237_s21 }
  0x74   : > { %1320 = vrot.lane.b32.xlu0 %v3483_v13, %s3237_s21 }
  0x76   : > { %1330 = vrot.lane.b32.xlu1 %v3526_v48, %s3237_s21 }
  0x78   : > { %1322 = vrot.lane.b32.xlu0 %v3500_v27, %s3237_s21 }
  0x7a   : > { %1419 = vrot.lane.b32.xlu1 %v1101_v45, %s3243_s28 }
  0x7c   : > { %1411 = vrot.lane.b32.xlu0 %v1097_v19, %s3243_s28 }
  0x7e   : > { %742 = vrot.lane.b32.xlu1 %v3496_v21, %s3239_s10  ;;  %v938_v21 = vrot.slane %v936_v6, 7 }
  0x80   : > { %734 = vrot.lane.b32.xlu0 %v3483_v13, %s3239_s10  ;;  %v941_v13 = vor.u32 %v939_v9, %v938_v21 }
  0x82   : > { %1421 = vrot.lane.b32.xlu1 %v3619_v36, %s3243_s28  ;;  %v961_v41 = vsel %vm3468_vm4, 0, %v941_v13 }
  0x84   : > { %1413 = vrot.lane.b32.xlu0 %v3596_v58, %s3243_s28 }
  0x86   : > { %744 = vrot.lane.b32.xlu1 %v3526_v48, %s3239_s10 }
  0x88   : > { %736 = vrot.lane.b32.xlu0 %v3500_v27, %s3239_s10 }
  0x8a   : > { %836 = vrot.lane.b32.xlu1 %v1101_v45, %s3244_s23 }
  0x8c   : > { %828 = vrot.lane.b32.xlu0 %v1097_v19, %s3244_s23 }
  0x8e   : > { %838 = vrot.lane.b32.xlu1 %v3619_v36, %s3244_s23 }
  0x90   : > { %830 = vrot.lane.b32.xlu0 %v3596_v58, %s3244_s23 }
  0x92   : > { %988 = vrot.lane.b32.xlu1 %v3592_v49, %s3240_s18  ;;  %v1082_v49 = vrot.slane %v939_v9, 1 }
  0x94   : > { %v3759_v4 = vpop.permute.xlu0 %1316  ;;  %v3761_v25 = vpop.permute.xlu1 %1025  ;;  %980 = vrot.lane.b32.xlu0 %v3568_v11, %s3240_s18  ;;  %v1083_v11 = vor.u32 %v1082_v49, %v936_v6 }
  0x96   : > { %990 = vrot.lane.b32.xlu1 %v961_v41, %s3240_s18 }
  0x98   : > { %v739_v3 = vpop.permute.xlu0 %738  ;;  %v3766_v30 = vpop.permute.xlu1 %1318  ;;  %982 = vrot.lane.b32.xlu0 %v3583_v51, %s3240_s18 }
  0x99   : > { %763 = vst.msk [vmem:[#allocation4 + $0x30] sm:$0xff] %vm756_vm10, %v739_v3 }
  0x9a   : > { %1039 = vrot.lane.b32.xlu1 %v3526_v48, %s3238_s22  ;;  %v1103_v48 = vsel %vm3491_vm7, %v1083_v11, 0 }
  0x9c   : > { %v733_v62 = vpop.permute.xlu0 %732  ;;  %v731_v26 = vpop.permute.xlu1 %730  ;;  %1031 = vrot.lane.b32.xlu0 %v3500_v27, %s3238_s22  ;;  %v1234_v27 = vor.u32 %v1232_v37, %v1231_v15 }
  0x9d   : > { %760 = vst.msk [vmem:[#allocation4 + $0x18] sm:$0xff] %vm756_vm10, %v733_v62  ;;  %759 = vst.msk [vmem:[#allocation4 + $0x10] sm:$0xff] %vm756_vm10, %v731_v26 }
  0x9e   : > { %1041 = vrot.lane.b32.xlu1 %v871_v55, %s3238_s22 }
  0xa0   : > { %v975_v43 = vpop.permute.xlu1 %974  ;;  %1033 = vrot.lane.b32.xlu0 %v3439_v44, %s3238_s22 }
  0xa2   : > { %1130 = vrot.lane.b32.xlu1 %v3619_v36, %s3241_s19  ;;  %v727_v20 = vpop.permute.xlu0 %726  ;;  %v1254_v36 = vsel %vm3468_vm4, 0, %v1234_v27 }
  0xa3   : > { %757 = vst.msk [vmem:[#allocation4] sm:$0xff] %vm756_vm10, %v727_v20 }
  0xa4   : > { %v1117_v47 = vpop.permute.xlu1 %1116  ;;  %1122 = vrot.lane.b32.xlu0 %v3596_v58, %s3241_s19 }
  0xa6   : > { %1132 = vrot.lane.b32.xlu1 %v1103_v48, %s3241_s19  ;;  %v729_v56 = vpop.permute.xlu0 %728 }
  0xa7   : > { %758 = vst.msk [vmem:[#allocation4 + $0x8] sm:$0xff] %vm756_vm10, %v729_v56 }
  0xa8   : > { %v1268_v53 = vpop.permute.xlu1 %1267  ;;  %1124 = vrot.lane.b32.xlu0 %v3665_v40, %s3241_s19 }
  0xaa   : > { %1281 = vrot.lane.b32.xlu1 %v961_v41, %s3242_s25  ;;  %v1024_v59 = vpop.permute.xlu0 %1023 }
  0xac   : > { %v1410_v60 = vpop.permute.xlu1 %1409  ;;  %1273 = vrot.lane.b32.xlu0 %v3583_v51, %s3242_s25  ;;  %v1376_v51 = vor.u32 %v1375_v10, %v1229_v46 }
  0xae   : > { %1283 = vrot.lane.b32.xlu1 %v1254_v36, %s3242_s25  ;;  %v1266_v58 = vpop.permute.xlu0 %1265 }
  0xb0   : > { %v741_v57 = vpop.permute.xlu1 %740  ;;  %1275 = vrot.lane.b32.xlu0 %v3634_v42, %s3242_s25 }
  0xb1   : > { %764 = vst.msk [vmem:[#allocation4 + $0x38] sm:$0xff] %vm756_vm10, %v741_v57 }
  0xb2   : > { %1332 = vrot.lane.b32.xlu1 %v871_v55, %s3237_s21  ;;  %v1408_v31 = vpop.permute.xlu0 %1407 }
  0xb4   : > { %v821_v39 = vpop.permute.xlu1 %820  ;;  %1324 = vrot.lane.b32.xlu0 %v3439_v44, %s3237_s21  ;;  %v1396_v44 = vsel %vm3491_vm7, %v1376_v51, 0 }
  0xb5   : > { %851 = vst.msk [vmem:[#allocation4] sm:$0xff] %vm850_vm11, %v821_v39 }
  0xb6   : > { %1334 = vrot.lane.b32.xlu1 %v1164_v35, %s3237_s21  ;;  %v973_v54 = vpop.permute.xlu0 %972 }
  0xb7   : > { %1003 = vst.msk [vmem:[#allocation4] sm:$0xff] %vm1002_vm12, %v973_v54 }
  0xb8   : > { %v823_v52 = vpop.permute.xlu1 %822  ;;  %1326 = vrot.lane.b32.xlu0 %v3511_v34, %s3237_s21  ;;  %1054 = vst.msk [vmem:[#allocation4] sm:$0xff] %vm1053_vm13, %v1024_v59 }
  0xb9   : > { %852 = vst.msk [vmem:[#allocation4 + $0x8] sm:$0xff] %vm850_vm11, %v823_v52 }
  0xba   : > { %1004 = vst.msk [vmem:[#allocation4 + $0x8] sm:$0xff] %vm1002_vm12, %v975_v43  ;;  %1423 = vrot.lane.b32.xlu1 %v1103_v48, %s3243_s28  ;;  %v1115_v42 = vpop.permute.xlu0 %1114 }
  0xbb   : > { %1055 = vst.msk [vmem:[#allocation4 + $0x8] sm:$0xff] %vm1053_vm13, %v3761_v25 }
  0xbc   : > { %1146 = vst.msk [vmem:[#allocation4 + $0x8] sm:$0xff] %vm1144_vm14, %v1117_v47  ;;  %v833_v29 = vpop.permute.xlu1 %832  ;;  %1145 = vst.msk [vmem:[#allocation4] sm:$0xff] %vm1144_vm14, %v1115_v42  ;;  %1415 = vrot.lane.b32.xlu0 %v3665_v40, %s3243_s28 }
  0xbd   : > { %1297 = vst.msk [vmem:[#allocation4 + $0x8] sm:$0xff] %vm1295_vm15, %v1268_v53  ;;  %1296 = vst.msk [vmem:[#allocation4] sm:$0xff] %vm1295_vm15, %v1266_v58 }
  0xbe   : > { %857 = vst.msk [vmem:[#allocation4 + $0x30] sm:$0xff] %vm850_vm11, %v833_v29  ;;  %1425 = vrot.lane.b32.xlu1 %v1396_v44, %s3243_s28  ;;  %v825_v34 = vpop.permute.xlu0 %824 }
  0xbf   : > { %1348 = vst.msk [vmem:[#allocation4 + $0x8] sm:$0xff] %vm1346_vm1, %v3766_v30  ;;  %1347 = vst.msk [vmem:[#allocation4] sm:$0xff] %vm1346_vm1, %v3759_v4 }
  0xc0   : > { %1439 = vst.msk [vmem:[#allocation4 + $0x8] sm:$0xff] %vm1437_vm2, %v1410_v60  ;;  %1438 = vst.msk [vmem:[#allocation4] sm:$0xff] %vm1437_vm2, %v1408_v31  ;;  %v835_v38 = vpop.permute.xlu1 %834  ;;  %1417 = vrot.lane.b32.xlu0 %v3677_v50, %s3243_s28 }
  0xc1   : > { %853 = vst.msk [vmem:[#allocation4 + $0x10] sm:$0xff] %vm850_vm11, %v825_v34  ;;  %858 = vst.msk [vmem:[#allocation4 + $0x38] sm:$0xff] %vm850_vm11, %v835_v38 }
  0xc2   : > { %v827_v63 = vpop.permute.xlu0 %826 }
  0xc3   : > { %854 = vst.msk [vmem:[#allocation4 + $0x18] sm:$0xff] %vm850_vm11, %v827_v63 }
  0xc4   : > { %v985_v40 = vpop.permute.xlu1 %984 }
  0xc5   : > { %1009 = vst.msk [vmem:[#allocation4 + $0x30] sm:$0xff] %vm1002_vm12, %v985_v40 }
  0xc6   : > { %v977_v55 = vpop.permute.xlu0 %976 }
  0xc7   : > { %v1449_v45 = vld [vmem:[#allocation4 + $0x8] sm:$0xff]  ;;  %v1448_v19 = vld [vmem:[#allocation4] sm:$0xff]  ;;  %1005 = vst.msk [vmem:[#allocation4 + $0x10] sm:$0xff] %vm1002_vm12, %v977_v55 }
  0xc8   : > { %3061 = vmatprep.mubr.msk.bf16.mxu0 %vm1485_vm3, %v1448_v19  ;;  %v987_v6 = vpop.permute.xlu1 %986 }
  0xc9   : > { %3062 = vmatmul.mubr.msk.bf16.vlgmr.msra.gmra.mrb[0].mxu0 %vm1485_vm3, %v1449_v45  ;;  %1010 = vst.msk [vmem:[#allocation4 + $0x38] sm:$0xff] %vm1002_vm12, %v987_v6 }
  0xca   : > { %v979_v50 = vpop.permute.xlu0 %978 }
  0xcb   : > { %1006 = vst.msk [vmem:[#allocation4 + $0x18] sm:$0xff] %vm1002_vm12, %v979_v50 }
  0xcc   : > { %v1036_v21 = vpop.permute.xlu1 %1035 }
  0xcd   : > { %1060 = vst.msk [vmem:[#allocation4 + $0x30] sm:$0xff] %vm1053_vm13, %v1036_v21 }
  0xce   : > { %v1028_v9 = vpop.permute.xlu0 %1027 }
  0xcf   : > { %1056 = vst.msk [vmem:[#allocation4 + $0x10] sm:$0xff] %vm1053_vm13, %v1028_v9 }
  0xd0   : > { %v1038_v13 = vpop.permute.xlu1 %1037 }
  0xd1   : > { %1061 = vst.msk [vmem:[#allocation4 + $0x38] sm:$0xff] %vm1053_vm13, %v1038_v13 }
  0xd2   : > { %v1030_v41 = vpop.permute.xlu0 %1029 }
  0xd3   : > { %1057 = vst.msk [vmem:[#allocation4 + $0x18] sm:$0xff] %vm1053_vm13, %v1030_v41 }
  0xd4   : > { %v1127_v4 = vpop.permute.xlu1 %1126 }
  0xd5   : > { %1151 = vst.msk [vmem:[#allocation4 + $0x30] sm:$0xff] %vm1144_vm14, %v1127_v4 }
  0xd6   : > { %v1119_v25 = vpop.permute.xlu0 %1118 }
  0xd7   : > { %1147 = vst.msk [vmem:[#allocation4 + $0x10] sm:$0xff] %vm1144_vm14, %v1119_v25 }
  0xd8   : > { %v1129_v3 = vpop.permute.xlu1 %1128 }
  0xd9   : > { %1152 = vst.msk [vmem:[#allocation4 + $0x38] sm:$0xff] %vm1144_vm14, %v1129_v3 }
  0xda   : > { %v1121_v30 = vpop.permute.xlu0 %1120 }
  0xdb   : > { %1148 = vst.msk [vmem:[#allocation4 + $0x18] sm:$0xff] %vm1144_vm14, %v1121_v30 }
  0xdc   : > { %v1278_v49 = vpop.permute.xlu1 %1277 }
  0xdd   : > { %1302 = vst.msk [vmem:[#allocation4 + $0x30] sm:$0xff] %vm1295_vm15, %v1278_v49 }
  0xde   : > { %v1270_v62 = vpop.permute.xlu0 %1269 }
  0xdf   : > { %1298 = vst.msk [vmem:[#allocation4 + $0x10] sm:$0xff] %vm1295_vm15, %v1270_v62 }
  0xe0   : > { %v1280_v26 = vpop.permute.xlu1 %1279 }
  0xe1   : > { %1303 = vst.msk [vmem:[#allocation4 + $0x38] sm:$0xff] %vm1295_vm15, %v1280_v26 }
  0xe2   : > { %v1272_v35 = vpop.permute.xlu0 %1271 }
  0xe3   : > { %1299 = vst.msk [vmem:[#allocation4 + $0x18] sm:$0xff] %vm1295_vm15, %v1272_v35 }
  0xe4   : > { %v1329_v11 = vpop.permute.xlu1 %1328 }
  0xe5   : > { %1353 = vst.msk [vmem:[#allocation4 + $0x30] sm:$0xff] %vm1346_vm1, %v1329_v11 }
  0xe6   : > { %v1321_v46 = vpop.permute.xlu0 %1320 }
  0xe7   : > { %1349 = vst.msk [vmem:[#allocation4 + $0x10] sm:$0xff] %vm1346_vm1, %v1321_v46 }
  0xe8   : > { %v1331_v43 = vpop.permute.xlu1 %1330 }
  0xe9   : > { %1354 = vst.msk [vmem:[#allocation4 + $0x38] sm:$0xff] %vm1346_vm1, %v1331_v43  ;;  %v3904_v43 = vld [vmem:[%s4427_s6] ss:$0 sm:$0xff] }
  0xea   : > { %v1323_v48 = vpop.permute.xlu0 %1322 }
  0xeb   : > { %1350 = vst.msk [vmem:[#allocation4 + $0x18] sm:$0xff] %vm1346_vm1, %v1323_v48 }
  0xec   : > { %v1420_v15 = vpop.permute.xlu1 %1419 }
  0xed   : > { %1444 = vst.msk [vmem:[#allocation4 + $0x30] sm:$0xff] %vm1437_vm2, %v1420_v15 }
  0xee   : > { %v1412_v37 = vpop.permute.xlu0 %1411 }
  0xef   : > { %1440 = vst.msk [vmem:[#allocation4 + $0x10] sm:$0xff] %vm1437_vm2, %v1412_v37 }
  0xf0   : > { %v743_v20 = vpop.permute.xlu1 %742 }
  0xf1   : > { %765 = vst.msk [vmem:[#allocation4 + $0x40] sm:$0xff] %vm756_vm10, %v743_v20 }
  0xf2   : > { %v735_v47 = vpop.permute.xlu0 %734 }
  0xf3   : > { %761 = vst.msk [vmem:[#allocation4 + $0x20] sm:$0xff] %vm756_vm10, %v735_v47 }
  0xf4   : > { %v1422_v27 = vpop.permute.xlu1 %1421  ;;  %v1454_v56 = vld [vmem:[#allocation4 + $0x30] sm:$0xff] }
  0xf5   : > { %1445 = vst.msk [vmem:[#allocation4 + $0x38] sm:$0xff] %vm1437_vm2, %v1422_v27  ;;  %3073 = vmatprep.mubr.msk.bf16.mxu1 %vm1485_vm3, %v1454_v56 }
  0xf6   : > { %v1414_v53 = vpop.permute.xlu0 %1413  ;;  %v1450_v36 = vld [vmem:[#allocation4 + $0x10] sm:$0xff] }
  0xf7   : > { %1441 = vst.msk [vmem:[#allocation4 + $0x18] sm:$0xff] %vm1437_vm2, %v1414_v53  ;;  %3065 = vmatprep.mubr.msk.bf16.mxu0 %vm1485_vm3, %v1450_v36 }
  0xf8   : > { %v745_v59 = vpop.permute.xlu1 %744 }
  0xf9   : > { %766 = vst.msk [vmem:[#allocation4 + $0x48] sm:$0xff] %vm756_vm10, %v745_v59 }
  0xfa   : > { %v737_v60 = vpop.permute.xlu0 %736 }
  0xfb   : > { %762 = vst.msk [vmem:[#allocation4 + $0x28] sm:$0xff] %vm756_vm10, %v737_v60 }
  0xfc   : > { %v837_v58 = vpop.permute.xlu1 %836  ;;  %v1455_v57 = vld [vmem:[#allocation4 + $0x38] sm:$0xff] }
  0xfd   : > { %859 = vst.msk [vmem:[#allocation4 + $0x40] sm:$0xff] %vm850_vm11, %v837_v58  ;;  %3074 = vmatmul.mubr.msk.bf16.vlgmr.msra.gmra.mrb[0].mxu1 %vm1485_vm3, %v1455_v57 }
  0xfe   : > { %v829_v10 = vpop.permute.xlu0 %828  ;;  %v1451_v31 = vld [vmem:[#allocation4 + $0x18] sm:$0xff] }
  0xff   : > { %855 = vst.msk [vmem:[#allocation4 + $0x20] sm:$0xff] %vm850_vm11, %v829_v10  ;;  %3066 = vmatmul.mubr.msk.bf16.gmra.mrb[4].mxu0 %vm1485_vm3, %v1451_v31 }
 0x100   : > { %v839_v39 = vpop.permute.xlu1 %838 }
 0x101   : > { %860 = vst.msk [vmem:[#allocation4 + $0x48] sm:$0xff] %vm850_vm11, %v839_v39 }
 0x102   : > { %v831_v51 = vpop.permute.xlu0 %830 }
 0x103   : > { %856 = vst.msk [vmem:[#allocation4 + $0x28] sm:$0xff] %vm850_vm11, %v831_v51 }
 0x104   : > { %v989_v54 = vpop.permute.xlu1 %988 }
 0x105   : > { %1011 = vst.msk [vmem:[#allocation4 + $0x40] sm:$0xff] %vm1002_vm12, %v989_v54 }
 0x106   : > { %v981_v52 = vpop.permute.xlu0 %980 }
 0x107   : > { %1007 = vst.msk [vmem:[#allocation4 + $0x20] sm:$0xff] %vm1002_vm12, %v981_v52 }
 0x108   : > { %v991_v44 = vpop.permute.xlu1 %990 }
 0x109   : > { %1012 = vst.msk [vmem:[#allocation4 + $0x48] sm:$0xff] %vm1002_vm12, %v991_v44 }
 0x10a   : > { %v983_v42 = vpop.permute.xlu0 %982 }
 0x10b   : > { %1008 = vst.msk [vmem:[#allocation4 + $0x28] sm:$0xff] %vm1002_vm12, %v983_v42 }
 0x10c   : > { %v1040_v29 = vpop.permute.xlu1 %1039 }
 0x10d   : > { %1062 = vst.msk [vmem:[#allocation4 + $0x40] sm:$0xff] %vm1053_vm13, %v1040_v29 }
 0x10e   : > { %v1032_v34 = vpop.permute.xlu0 %1031 }
 0x10f   : > { %1058 = vst.msk [vmem:[#allocation4 + $0x20] sm:$0xff] %vm1053_vm13, %v1032_v34 }
 0x110   : > { %v1042_v38 = vpop.permute.xlu1 %1041 }
 0x111   : > { %1063 = vst.msk [vmem:[#allocation4 + $0x48] sm:$0xff] %vm1053_vm13, %v1042_v38 }
 0x112   : > { %v1034_v63 = vpop.permute.xlu0 %1033 }
 0x113   : > { %1059 = vst.msk [vmem:[#allocation4 + $0x28] sm:$0xff] %vm1053_vm13, %v1034_v63 }
 0x114   : > { %v1131_v40 = vpop.permute.xlu1 %1130 }
 0x115   : > { %1153 = vst.msk [vmem:[#allocation4 + $0x40] sm:$0xff] %vm1144_vm14, %v1131_v40 }
 0x116   : > { %v1123_v45 = vpop.permute.xlu0 %1122 }
 0x117   : > { %1149 = vst.msk [vmem:[#allocation4 + $0x20] sm:$0xff] %vm1144_vm14, %v1123_v45 }
 0x118   : > { %v1133_v19 = vpop.permute.xlu1 %1132 }
 0x119   : > { %1154 = vst.msk [vmem:[#allocation4 + $0x48] sm:$0xff] %vm1144_vm14, %v1133_v19 }
 0x11a   : > { %v1125_v55 = vpop.permute.xlu0 %1124 }
 0x11b   : > { %1150 = vst.msk [vmem:[#allocation4 + $0x28] sm:$0xff] %vm1144_vm14, %v1125_v55 }
 0x11c   : > { %v1282_v6 = vpop.permute.xlu1 %1281 }
 0x11d   : > { %1304 = vst.msk [vmem:[#allocation4 + $0x40] sm:$0xff] %vm1295_vm15, %v1282_v6 }
 0x11e   : > { %v1274_v50 = vpop.permute.xlu0 %1273 }
 0x11f   : > { %1300 = vst.msk [vmem:[#allocation4 + $0x20] sm:$0xff] %vm1295_vm15, %v1274_v50 }
 0x120   : > { %v1284_v21 = vpop.permute.xlu1 %1283 }
 0x121   : > { %1305 = vst.msk [vmem:[#allocation4 + $0x48] sm:$0xff] %vm1295_vm15, %v1284_v21 }
 0x122   : > { %v1276_v9 = vpop.permute.xlu0 %1275 }
 0x123   : > { %1301 = vst.msk [vmem:[#allocation4 + $0x28] sm:$0xff] %vm1295_vm15, %v1276_v9 }
 0x124   : > { %v1333_v13 = vpop.permute.xlu1 %1332 }
 0x125   : > { %1355 = vst.msk [vmem:[#allocation4 + $0x40] sm:$0xff] %vm1346_vm1, %v1333_v13 }
 0x126   : > { %v1325_v41 = vpop.permute.xlu0 %1324 }
 0x127   : > { %1351 = vst.msk [vmem:[#allocation4 + $0x20] sm:$0xff] %vm1346_vm1, %v1325_v41 }
 0x128   : > { %v1335_v4 = vpop.permute.xlu1 %1334 }
 0x129   : > { %1356 = vst.msk [vmem:[#allocation4 + $0x48] sm:$0xff] %vm1346_vm1, %v1335_v4 }
 0x12a   : > { %v1327_v25 = vpop.permute.xlu0 %1326 }
 0x12b   : > { %1352 = vst.msk [vmem:[#allocation4 + $0x28] sm:$0xff] %vm1346_vm1, %v1327_v25 }
 0x12c   : > { %v1424_v3 = vpop.permute.xlu1 %1423 }
 0x12d   : > { %1446 = vst.msk [vmem:[#allocation4 + $0x40] sm:$0xff] %vm1437_vm2, %v1424_v3 }
 0x12e   : > { %v1416_v30 = vpop.permute.xlu0 %1415 }
 0x12f   : > { %1442 = vst.msk [vmem:[#allocation4 + $0x20] sm:$0xff] %vm1437_vm2, %v1416_v30 }
 0x130   : > { %v1426_v49 = vpop.permute.xlu1 %1425 }
 0x131   : > { %1447 = vst.msk [vmem:[#allocation4 + $0x48] sm:$0xff] %vm1437_vm2, %v1426_v49 }
 0x132   : > { %v1418_v62 = vpop.permute.xlu0 %1417 }
 0x133   : > { %1443 = vst.msk [vmem:[#allocation4 + $0x28] sm:$0xff] %vm1437_vm2, %v1418_v62 }
 0x134   : > { %v1456_v26 = vld [vmem:[#allocation4 + $0x40] sm:$0xff] }
 0x135   : > { %3077 = vmatprep.mubr.msk.bf16.mxu1 %vm1485_vm3, %v1456_v26 }
 0x136   : > { %v1452_v35 = vld [vmem:[#allocation4 + $0x20] sm:$0xff] }
 0x137   : > { %3069 = vmatprep.mubr.msk.bf16.mxu0 %vm1485_vm3, %v1452_v35 }
 0x138   : > { %v1457_v11 = vld [vmem:[#allocation4 + $0x48] sm:$0xff] }
 0x139   : > { %3078 = vmatmul.mubr.msk.bf16.gmra.mrb[4].mxu1 %vm1485_vm3, %v1457_v11 }
 0x13a   : > { %v1453_v46 = vld [vmem:[#allocation4 + $0x28] sm:$0xff] }
 0x13b   : > { %3070 = vmatmul.mubr.msk.bf16.gmra.mrb[8].mxu0 %vm1485_vm3, %v1453_v46 }
 0x19c   : > { %v3063_v48 = vpop.f32.mrb[0].mxu0 }
 0x19d   : > { %v1563_v15 = vadd.f32 %v3063_v48, %v3904_v43  ;;  %v1554_v37 = vpop.f32.mrb[1].mxu0 }
 0x19e   : > { %v1555_v20 = vadd.f32 %v3904_v43, %v1554_v37  ;;  %v3064_v47 = vpop.f32.mrb[2].mxu0 }
 0x19f   : > { %v1566_v27 = vadd.f32 %v3064_v47, %v3904_v43  ;;  %v1557_v56 = vpop.f32.mrb[3].mxu0  ;;  %v1635_v36 = vmax.f32 %v1563_v15, 0.0 }
 0x1a0   : > { %v1558_v53 = vadd.f32 %v3904_v43, %v1557_v56  ;;  %v1633_v60 = vmax.f32 %v1555_v20, 0.0 }
 0x1a1   : > { %v1636_v59 = vmax.f32 %v1566_v27, 0.0 }
 0x1a2   : > { %v1634_v58 = vmax.f32 %v1558_v53, 0.0 }
 0x1a3   : > { %v1654_v57 = vpack.c.bf16 %v1636_v59, %v1635_v36 }
 0x1a4   : > { %v1653_v10 = vpack.c.bf16 %v1634_v58, %v1633_v60 }
 0x1a5   : > { %1665 = vst.msk [vmem:[#allocation3 + $0x8] sm:$0xff] %vm1663_vm5, %v1654_v57 }
 0x1a6   : > { %1664 = vst.msk [vmem:[#allocation3] sm:$0xff] %vm1663_vm5, %v1653_v10 }
 0x1d0   : > { %v3075_v31 = vpop.f32.mrb[0].mxu1 }
 0x1d1   : > { %v1611_v39 = vadd.f32 %v3075_v31, %v3904_v43  ;;  %v1602_v51 = vpop.f32.mrb[1].mxu1 }
 0x1d2   : > { %v1603_v54 = vadd.f32 %v3904_v43, %v1602_v51  ;;  %v3076_v52 = vpop.f32.mrb[2].mxu1  ;;  %v3067_v29 = vpop.f32.mrb[4].mxu0 }
 0x1d3   : > { %v1614_v44 = vadd.f32 %v3076_v52, %v3904_v43  ;;  %v1605_v42 = vpop.f32.mrb[3].mxu1  ;;  %v1579_v38 = vadd.f32 %v3067_v29, %v3904_v43  ;;  %v1647_v63 = vmax.f32 %v1611_v39, 0.0  ;;  %v1570_v40 = vpop.f32.mrb[5].mxu0 }
 0x1d4   : > { %v1606_v34 = vadd.f32 %v3904_v43, %v1605_v42  ;;  %v1571_v19 = vadd.f32 %v3904_v43, %v1570_v40  ;;  %v1645_v55 = vmax.f32 %v1603_v54, 0.0  ;;  %v3068_v6 = vpop.f32.mrb[6].mxu0  ;;  %v3245_v40 = vmov (!%p2987_p13), 0  }
 0x1d5   : > { %v1648_v45 = vmax.f32 %v1614_v44, 0.0  ;;  %v1582_v21 = vadd.f32 %v3068_v6, %v3904_v43  ;;  %v1573_v13 = vpop.f32.mrb[7].mxu0  ;;  %v1639_v25 = vmax.f32 %v1579_v38, 0.0  ;;  %1677 = vst.msk [vmem:[#allocation3] sm:$0xff] (!%p2987_p13), %vm1663_vm5, %v3245_v40 }
 0x1d6   : > { %v1646_v50 = vmax.f32 %v1606_v34, 0.0  ;;  %v1574_v41 = vadd.f32 %v3904_v43, %v1573_v13  ;;  %v1637_v30 = vmax.f32 %v1571_v19, 0.0 }
 0x1d7   : > { %v1660_v9 = vpack.c.bf16 %v1648_v45, %v1647_v63  ;;  %v1640_v3 = vmax.f32 %v1582_v21, 0.0 }
 0x1d8   : > { %v1659_v4 = vpack.c.bf16 %v1646_v50, %v1645_v55  ;;  %v1638_v49 = vmax.f32 %v1574_v41, 0.0 }
 0x1d9   : > { %1671 = vst.msk [vmem:[#allocation3 + $0x38] sm:$0xff] %vm1663_vm5, %v1660_v9  ;;  %v1656_v62 = vpack.c.bf16 %v1640_v3, %v1639_v25 }
 0x1da   : > { %1670 = vst.msk [vmem:[#allocation3 + $0x30] sm:$0xff] %vm1663_vm5, %v1659_v4  ;;  %v1655_v26 = vpack.c.bf16 %v1638_v49, %v1637_v30 }
 0x1db   : > { %1667 = vst.msk [vmem:[#allocation3 + $0x18] sm:$0xff] %vm1663_vm5, %v1656_v62 }
 0x1dc   : > { %1666 = vst.msk [vmem:[#allocation3 + $0x10] sm:$0xff] %vm1663_vm5, %v1655_v26 }
 0x20c   : > { %v3079_v35 = vpop.f32.mrb[4].mxu1 }
 0x20d   : > { %v1627_v11 = vadd.f32 %v3079_v35, %v3904_v43  ;;  %v1618_v46 = vpop.f32.mrb[5].mxu1 }
 0x20e   : > { %v1619_v48 = vadd.f32 %v3904_v43, %v1618_v46  ;;  %v3080_v15 = vpop.f32.mrb[6].mxu1  ;;  %v3071_v47 = vpop.f32.mrb[8].mxu0 }
 0x20f   : > { %v1630_v37 = vadd.f32 %v3080_v15, %v3904_v43  ;;  %v1621_v20 = vpop.f32.mrb[7].mxu1  ;;  %v1595_v56 = vadd.f32 %v3071_v47, %v3904_v43  ;;  %v1651_v53 = vmax.f32 %v1627_v11, 0.0  ;;  %v1586_v36 = vpop.f32.mrb[9].mxu0 }
 0x210   : > { %v1622_v27 = vadd.f32 %v3904_v43, %v1621_v20  ;;  %v1587_v60 = vadd.f32 %v3904_v43, %v1586_v36  ;;  %v1649_v58 = vmax.f32 %v1619_v48, 0.0  ;;  %v3072_v57 = vpop.f32.mrb[10].mxu0 }
 0x211   : > { %v1652_v59 = vmax.f32 %v1630_v37, 0.0  ;;  %v1598_v31 = vadd.f32 %v3072_v57, %v3904_v43  ;;  %v1589_v51 = vpop.f32.mrb[11].mxu0  ;;  %v1643_v44 = vmax.f32 %v1595_v56, 0.0 }
 0x212   : > { %v1650_v10 = vmax.f32 %v1622_v27, 0.0  ;;  %v1590_v54 = vadd.f32 %v3904_v43, %v1589_v51  ;;  %v1641_v29 = vmax.f32 %v1587_v60, 0.0  ;;  %1676 = sbr.rel (%p2987_p13) target bundleno = 537 (0x219), region = 60 }
 0x213   : > { %v1662_v39 = vpack.c.bf16 %v1652_v59, %v1651_v53  ;;  %v1644_v42 = vmax.f32 %v1598_v31, 0.0 }
 0x214   : > { %v1661_v52 = vpack.c.bf16 %v1650_v10, %v1649_v58  ;;  %v1642_v34 = vmax.f32 %v1590_v54, 0.0 }
 0x215   : > { %1673 = vst.msk [vmem:[#allocation3 + $0x48] sm:$0xff] %vm1663_vm5, %v1662_v39  ;;  %v1658_v38 = vpack.c.bf16 %v1644_v42, %v1643_v44 }
 0x216   : > { %1672 = vst.msk [vmem:[#allocation3 + $0x40] sm:$0xff] %vm1663_vm5, %v1661_v52  ;;  %v1657_v63 = vpack.c.bf16 %v1642_v34, %v1641_v29 }
 0x217   : > { %1669 = vst.msk [vmem:[#allocation3 + $0x28] sm:$0xff] %vm1663_vm5, %v1658_v38 }
 0x218   : > { %1668 = vst.msk [vmem:[#allocation3 + $0x20] sm:$0xff] %vm1663_vm5, %v1657_v63 }
 0x219 PF: > { %p2988_p0 = scmp.ne.s32.totalorder %s3219_s30, 1 }
 0x21a   : > { %v3246_v43 = vmov (!%p2988_p0), 0  }
 0x21b   : > { %1680 = sbr.rel (%p2988_p0) target bundleno = 546 (0x222), region = 64  ;;  %1682 = vst.msk [vmem:[#allocation3 + $0x48] sm:$0xff] (!%p2988_p0), %vm1663_vm5, %v3246_v43 }
 0x222 PF: > { %v3940_v45 = vld [vmem:[#allocation3] sm:$0xff]  ;;  %v3942_v19 = vld [vmem:[#allocation3 + $0x8] sm:$0xff]  ;;  %v3944_v55 = vld [vmem:[#allocation3 + $0x10] sm:$0xff]  ;;  %v2534_v6 = vpack.c.bf16 %v3352_v1, %v3349_v0  ;;  %v2535_v48 = vpack.c.bf16 %v3367_v8, %v3364_v7  ;;  %v2536_v60 = vpack.c.bf16 %v3383_v17, %v3380_v16  ;;  %s3247_s24 = smov 40   ;;  %s3248_s18 = smov 48   ;;  %vm2433_vm6 = vcmask 1043456  }
 0x223   : > { %1779 = vrot.lane.b32.xlu0 %v3940_v45, %s3244_s23  ;;  %v1695_v50 = vshll.u32 %v3940_v45, 16  ;;  %v1702_v21 = vshll.u32 %v3942_v19, 16  ;;  %v1692_v9 = vshrl.u32 %v3940_v45, 16  ;;  %v1895_v13 = vshrl.u32 %v3942_v19, 16  ;;  %v3954_v41 = vld [vmem:[#allocation3 + $0x18] sm:$0xff]  ;;  %v3973_v15 = vld [vmem:[#allocation3 + $0x20] sm:$0xff] }
 0x224   : > { %v1902_v4 = vshrl.u32 %v3944_v55, 16  ;;  %v1905_v25 = vshll.u32 %v3944_v55, 16  ;;  %v2138_v3 = vshrl.u32 %v3954_v41, 16  ;;  %v2141_v30 = vshll.u32 %v3954_v41, 16  ;;  %3109 = vmatprep.mubr.msk.bf16.mxu0 %vm562_vm0, %v2534_v6  ;;  %v2542_v35 = vld [vmem:[%s4424_s3] sm:$0x3] }
 0x225   : > { %v1812_v49 = vrot.slane %v1695_v50, 1  ;;  %v1897_v62 = vrot.slane %v1895_v13, 7  ;;  %v1814_v26 = vrot.slane %v1702_v21, 1  ;;  %3134 = vmatprep.subr.msk.bf16.mxu0 %vm1516_vm9, %v2542_v35  ;;  %v2575_v27 = vsel %vm1516_vm9, %v2542_v35, 0  ;;  %v3978_v56 = vld [vmem:[#allocation3 + $0x28] sm:$0xff]  ;;  %v3980_v53 = vld [vmem:[#allocation3 + $0x30] sm:$0xff] }
 0x226   : > { %v1904_v11 = vrot.slane %v1902_v4, 7  ;;  %v2140_v46 = vrot.slane %v2138_v3, 7  ;;  %3108 = vmatpush3.bf16.msra.mxu0 %v2575_v27  ;;  %v1916_v10 = vshrl.u32 %v3973_v15, 16  ;;  %v3991_v31 = vld [vmem:[#allocation3 + $0x38] sm:$0xff]  ;;  %v1919_v44 = vshll.u32 %v3973_v15, 16  ;;  %v3192_v34 = vld [vmem:[%s4428_s7] sm:$0xff]  }
 0x227   : > { %1781 = vrot.lane.b32.xlu0 %v3942_v19, %s3244_s23  ;;  %v1813_v37 = vor.u32 %v1812_v49, %v1692_v9  ;;  %v1900_v20 = vor.u32 %v1897_v62, %v1702_v21  ;;  %v1815_v47 = vor.u32 %v1895_v13, %v1814_v26  ;;  %v2152_v42 = vshrl.u32 %v3978_v56, 16  ;;  %3081 = vmatprep.subr.bf16.mxu1 %v3192_v34  ;;  %v3195_v45 = vld [vmem:[%s4428_s7 + $0x18] sm:$0xff]   ;;  %s3249_s29 = smov 56   ;;  %s3250_s20 = smov 64  }
 0x228   : > { %v1907_v36 = vor.u32 %v1905_v25, %v1904_v11  ;;  %v2143_v59 = vor.u32 %v2141_v30, %v2140_v46  ;;  %v1918_v52 = vrot.slane %v1916_v10, 7  ;;  %v2155_v29 = vshll.u32 %v3978_v56, 16  ;;  %3082 = vmatpush3.bf16.msra.mxu1 %v3192_v34 }
 0x229   : > { %v1836_v58 = vsel %vm3491_vm7, %v1813_v37, 0  ;;  %v1958_v57 = vsel %vm3468_vm4, 0, %v1900_v20  ;;  %v1837_v39 = vsel %vm3491_vm7, %v1815_v47, 0  ;;  %3110 = vmatmul.mubr.msk.bf16.vlgmr.msra.gmra.mrb[12].mxu0 %vm562_vm0, %v2535_v48  ;;  %v1930_v38 = vshrl.u32 %v3980_v53, 16  ;;  %v3193_v20 = vld [vmem:[%s4428_s7 + $0x8] sm:$0xff]  }
 0x22a   : > { %1852 = vrot.lane.b32.xlu1 %v1836_v58, %s3238_s22  ;;  %v1959_v51 = vsel %vm3468_vm4, 0, %v1907_v36  ;;  %v4000_v54 = vsel %vm3468_vm4, 0, %v2143_v59  ;;  %1764 = vst.msk [vmem:[#allocation4 + $0x8] sm:$0xff] %vm1663_vm5, %v1958_v57  ;;  %3113 = vmatprep.mubr.msk.bf16.mxu0 %vm562_vm0, %v2536_v60  ;;  %v1933_v63 = vshll.u32 %v3980_v53, 16  ;;  %v2166_v40 = vshrl.u32 %v3991_v31, 16 }
 0x22b   : > { %1974 = vrot.lane.b32.xlu0 %v1958_v57, %s3242_s25  ;;  %1765 = vst.msk [vmem:[#allocation4 + $0x10] sm:$0xff] %vm1663_vm5, %v1959_v51  ;;  %1766 = vst.msk [vmem:[#allocation4 + $0x18] sm:$0xff] %vm1663_vm5, %v4000_v54  ;;  %v2169_v43 = vshll.u32 %v3991_v31, 16  ;;  %v1921_v6 = vor.u32 %v1919_v44, %v1918_v52  ;;  %v2154_v21 = vrot.slane %v2152_v42, 7  ;;  %v2537_v13 = vpack.c.bf16 %v3406_v28, %v3396_v24  ;;  %v3194_v57 = vld [vmem:[%s4428_s7 + $0x10] sm:$0xff]  }
 0x22c   : > { %v1932_v49 = vrot.slane %v1930_v38, 7  ;;  %v2058_v62 = vrot.slane %v1933_v63, 1  ;;  %v2168_v26 = vrot.slane %v2166_v40, 7  ;;  %v1694_v11 = vrot.slane %v1692_v9, 7  ;;  %3083 = vmatprep.subr.bf16.mxu1 %v3193_v20 }
 0x22d   : > { %v2294_v35 = vrot.slane %v2169_v43, 1  ;;  %v2050_v46 = vrot.slane %v1905_v25, 1  ;;  %v4032_v48 = vsel %vm3468_vm4, 0, %v1921_v6  ;;  %v2157_v37 = vor.u32 %v2155_v29, %v2154_v21  ;;  %3084 = vmatpush3.bf16.msra.mxu1 %v3193_v20 }
 0x22e   : > { %1854 = vrot.lane.b32.xlu1 %v1837_v39, %s3238_s22  ;;  %v1935_v47 = vor.u32 %v1933_v63, %v1932_v49  ;;  %v4039_v27 = vor.u32 %v2058_v62, %v1930_v38  ;;  %v2171_v36 = vor.u32 %v2169_v43, %v2168_v26  ;;  %1767 = vst.msk [vmem:[#allocation4 + $0x20] sm:$0xff] %vm1663_vm5, %v4032_v48  ;;  %v2129_v49 = vld [vmem:[#allocation3 + $0x48] sm:$0xff]  ;;  %vm1803_vm8 = vcmask 130112  }
 0x22f   : > { %2015 = vrot.lane.b32.xlu0 %v3942_v19, %s3243_s28  ;;  %v4041_v9 = vor.u32 %v2294_v35, %v2166_v40  ;;  %v4047_v19 = vsel %vm3468_vm4, 0, %v2157_v37  ;;  %v2538_v25 = vpack.c.bf16 %v3360_v5, %v3355_v2  ;;  %v2051_v58 = vor.u32 %v2050_v46, %v1902_v4  ;;  %3085 = vmatprep.subr.bf16.mxu1 %v3194_v57 }
 0x230   : > { %v4054_v59 = vsel %vm3468_vm4, 0, %v1935_v47  ;;  %v4058_v60 = vsel %vm3468_vm4, 0, %v2171_v36  ;;  %1768 = vst.msk [vmem:[#allocation4 + $0x28] sm:$0xff] %vm1663_vm5, %v4047_v19  ;;  %v2539_v34 = vpack.c.bf16 %v3376_v14, %v3373_v12  ;;  %v2540_v38 = vpack.c.bf16 %v3393_v23, %v3390_v22 }
 0x231   : > { %3114 = vmatmul.mubr.msk.bf16.gmra.mrb[16].mxu0 %vm562_vm0, %v2537_v13  ;;  %1769 = vst.msk [vmem:[#allocation4 + $0x30] sm:$0xff] %vm1663_vm5, %v4054_v59  ;;  %1770 = vst.msk [vmem:[#allocation4 + $0x38] sm:$0xff] %vm1663_vm5, %v4058_v60  ;;  %3086 = vmatpush3.bf16.msra.mxu1 %v3194_v57  ;;  %v2073_v52 = vsel %vm3491_vm7, %v2051_v58, 0  ;;  %v2541_v40 = vpack.c.bf16 %v3418_v33, %v3415_v32  ;;  %v2180_v26 = vshrl.u32 %v2129_v49, 16  ;;  %v2183_v46 = vshll.u32 %v2129_v49, 16 }
 0x232   : > { %1976 = vrot.lane.b32.xlu1 %v1959_v51, %s3242_s25  ;;  %3117 = vmatprep.mubr.msk.bf16.mxu0 %vm562_vm0, %v2538_v25  ;;  %vm1876_vm9 = vcmask 195712   ;;  %vm1998_vm10 = vcmask 261312   ;;  %vm2039_vm11 = vcmask 326912   ;;  %vm2234_vm12 = vcmask 458112  }
 0x233   : > { %2088 = vrot.lane.b32.xlu0 %v1837_v39, %s3247_s24  ;;  %v1697_v39 = vor.u32 %v1695_v50, %v1694_v11  ;;  %v2286_v50 = vrot.slane %v2141_v30, 1  ;;  %3087 = vmatprep.subr.bf16.mxu1 %v3195_v45  ;;  %v2182_v11 = vrot.slane %v2180_v26, 7  ;;  %vm2275_vm13 = vcmask 523712  }
 0x234   : > { %vm2408_vm14 = vcmask 588800  }
 0x235   : > { %v1755_v4 = vsel %vm3468_vm4, 0, %v1697_v39  ;;  %3088 = vmatpush3.bf16.msra.mxu1 %v3195_v45  ;;  %v2287_v30 = vor.u32 %v2286_v50, %v2138_v3  ;;  %v2054_v3 = vrot.slane %v1919_v44, 1 }
 0x236   : > { %2017 = vrot.lane.b32.xlu1 %v3944_v55, %s3243_s28  ;;  %1763 = vst.msk [vmem:[#allocation4] sm:$0xff] %vm1663_vm5, %v1755_v4 }
 0x237   : > { %2210 = vrot.lane.b32.xlu0 %v1959_v51, %s3248_s18  ;;  %v3196_v51 = vld [vmem:[%s4428_s7 + $0x20] ss:$0 sps:$4 sm:$0xff]   ;;  %v2309_v43 = vsel %vm3491_vm7, %v2287_v30, 0 }
 0x238   : > { %3133 = vmatprep.subr.msk.bf16.mxu1 %vm2433_vm6, %v3196_v51  ;;  %v2435_v63 = vsel %vm2433_vm6, %v3196_v51, 0 }
 0x239   : > { %3118 = vmatmul.mubr.msk.bf16.gmra.mrb[20].mxu0 %vm562_vm0, %v2539_v34  ;;  %3090 = vmatpush3.bf16.msra.mxu1 %v2435_v63 }
 0x23a   : > { %2090 = vrot.lane.b32.xlu1 %v2073_v52, %s3247_s24  ;;  %3121 = vmatprep.mubr.msk.bf16.mxu0 %vm562_vm0, %v2540_v38 }
 0x23b   : > { %2251 = vrot.lane.b32.xlu0 %v3944_v55, %s3249_s29 }
 0x23e   : > { %2212 = vrot.lane.b32.xlu1 %v4000_v54, %s3248_s18 }
 0x23f   : > { %2324 = vrot.lane.b32.xlu0 %v2073_v52, %s3250_s20 }
 0x241   : > { %3122 = vmatmul.mubr.msk.bf16.gmra.mrb[24].mxu0 %vm562_vm0, %v2541_v40 }
 0x242   : > { %2253 = vrot.lane.b32.xlu1 %v3954_v41, %s3249_s29 }
 0x243   : > { %2326 = vrot.lane.b32.xlu0 %v2309_v43, %s3250_s20 }
 0x246   : > { %1783 = vrot.lane.b32.xlu1 %v3944_v55, %s3244_s23  ;;  %v2055_v55 = vor.u32 %v2054_v3, %v1916_v10 }
 0x247   : > { %1856 = vrot.lane.b32.xlu0 %v2073_v52, %s3238_s22 }
 0x24a   : > { %1785 = vrot.lane.b32.xlu1 %v3954_v41, %s3244_s23 }
 0x24b   : > { %1978 = vrot.lane.b32.xlu0 %v4000_v54, %s3242_s25  ;;  %v2290_v54 = vrot.slane %v2155_v29, 1 }
 0x24d   : > { %v2291_v10 = vor.u32 %v2290_v54, %v2152_v42  ;;  %v1893_v42 = vld [vmem:[#allocation3 + $0x40] sm:$0xff] }
 0x24e   : > { %1858 = vrot.lane.b32.xlu1 %v2309_v43, %s3238_s22  ;;  %v1944_v29 = vshrl.u32 %v1893_v42, 16  ;;  %v1947_v21 = vshll.u32 %v1893_v42, 16 }
 0x24f   : > { %2019 = vrot.lane.b32.xlu0 %v3954_v41, %s3243_s28  ;;  %v2075_v41 = vsel %vm3491_vm7, %v2055_v55, 0  ;;  %v2311_v44 = vsel %vm3491_vm7, %v2291_v10, 0 }
 0x250   : > { %v1946_v6 = vrot.slane %v1944_v29, 7 }
 0x252   : > { %1980 = vrot.lane.b32.xlu1 %v4032_v48, %s3242_s25  ;;  %v1949_v13 = vor.u32 %v1947_v21, %v1946_v6 }
 0x253   : > { %2092 = vrot.lane.b32.xlu0 %v2309_v43, %s3247_s24 }
 0x254   : > { %v1965_v62 = vsel %vm3468_vm4, 0, %v1949_v13 }
 0x256   : > { %2021 = vrot.lane.b32.xlu1 %v3973_v15, %s3243_s28 }
 0x257   : > { %2214 = vrot.lane.b32.xlu0 %v4032_v48, %s3248_s18 }
 0x25a   : > { %2094 = vrot.lane.b32.xlu1 %v2075_v41, %s3247_s24 }
 0x25b   : > { %2255 = vrot.lane.b32.xlu0 %v3973_v15, %s3249_s29 }
 0x25e   : > { %2216 = vrot.lane.b32.xlu1 %v4047_v19, %s3248_s18 }
 0x25f   : > { %2328 = vrot.lane.b32.xlu0 %v2075_v41, %s3250_s20 }
 0x262   : > { %2257 = vrot.lane.b32.xlu1 %v3978_v56, %s3249_s29 }
 0x263   : > { %2330 = vrot.lane.b32.xlu0 %v2311_v44, %s3250_s20 }
 0x266   : > { %1787 = vrot.lane.b32.xlu1 %v3973_v15, %s3244_s23  ;;  %v2077_v15 = vsel %vm3491_vm7, %v4039_v27, 0  ;;  %v2298_v27 = vrot.slane %v2183_v46, 1 }
 0x267   : > { %1860 = vrot.lane.b32.xlu0 %v2075_v41, %s3238_s22 }
 0x26a   : > { %1789 = vrot.lane.b32.xlu1 %v3978_v56, %s3244_s23 }
 0x26b   : > { %1982 = vrot.lane.b32.xlu0 %v4047_v19, %s3242_s25  ;;  %v2299_v19 = vor.u32 %v2298_v27, %v2180_v26 }
 0x26e   : > { %1862 = vrot.lane.b32.xlu1 %v2311_v44, %s3238_s22 }
 0x26f   : > { %2023 = vrot.lane.b32.xlu0 %v3978_v56, %s3243_s28  ;;  %v2313_v56 = vsel %vm3491_vm7, %v4041_v9, 0 }
 0x272   : > { %1984 = vrot.lane.b32.xlu1 %v4054_v59, %s3242_s25 }
 0x273   : > { %2096 = vrot.lane.b32.xlu0 %v2311_v44, %s3247_s24 }
 0x276   : > { %2025 = vrot.lane.b32.xlu1 %v3980_v53, %s3243_s28 }
 0x277   : > { %2218 = vrot.lane.b32.xlu0 %v4054_v59, %s3248_s18  ;;  %v2315_v59 = vsel %vm3491_vm7, %v2299_v19, 0 }
 0x27a   : > { %2098 = vrot.lane.b32.xlu1 %v2077_v15, %s3247_s24 }
 0x27b   : > { %2259 = vrot.lane.b32.xlu0 %v3980_v53, %s3249_s29 }
 0x27e   : > { %2220 = vrot.lane.b32.xlu1 %v4058_v60, %s3248_s18 }
 0x27f   : > { %2332 = vrot.lane.b32.xlu0 %v2077_v15, %s3250_s20 }
 0x282   : > { %2261 = vrot.lane.b32.xlu1 %v3991_v31, %s3249_s29 }
 0x283   : > { %2334 = vrot.lane.b32.xlu0 %v2313_v56, %s3250_s20 }
 0x286   : > { %1791 = vrot.lane.b32.xlu1 %v3980_v53, %s3244_s23  ;;  %v2062_v53 = vrot.slane %v1947_v21, 1 }
 0x287   : > { %1864 = vrot.lane.b32.xlu0 %v2077_v15, %s3238_s22 }
 0x288   : > { %v2063_v35 = vor.u32 %v2062_v53, %v1944_v29 }
 0x28a   : > { %1793 = vrot.lane.b32.xlu1 %v3991_v31, %s3244_s23  ;;  %v2079_v37 = vsel %vm3491_vm7, %v2063_v35, 0  ;;  %vm2348_vm7 = vcmask 589312  }
 0x28b   : > { %1986 = vrot.lane.b32.xlu0 %v4058_v60, %s3242_s25 }
 0x28e   : > { %1866 = vrot.lane.b32.xlu1 %v2313_v56, %s3238_s22 }
 0x28f   : > { %2027 = vrot.lane.b32.xlu0 %v3991_v31, %s3243_s28  ;;  %v2185_v31 = vor.u32 %v2183_v46, %v2182_v11 }
 0x291   : > { %v2201_v47 = vsel %vm3468_vm4, 0, %v2185_v31  ;;  %vm2112_vm4 = vcmask 392512  }
 0x292   : > { %1988 = vrot.lane.b32.xlu1 %v1965_v62, %s3242_s25 }
 0x293   : > { %2100 = vrot.lane.b32.xlu0 %v2313_v56, %s3247_s24 }
 0x295   : > { %v1780_v48 = vpop.permute.xlu0 %1779 }
 0x296   : > { %2029 = vrot.lane.b32.xlu1 %v1893_v42, %s3243_s28  ;;  %1804 = vst.msk [vmem:[#allocation4] sm:$0xff] %vm1803_vm8, %v1780_v48 }
 0x297   : > { %2222 = vrot.lane.b32.xlu0 %v1965_v62, %s3248_s18 }
 0x299   : > { %v1782_v20 = vpop.permute.xlu0 %1781 }
 0x29a   : > { %2102 = vrot.lane.b32.xlu1 %v2079_v37, %s3247_s24  ;;  %1805 = vst.msk [vmem:[#allocation4 + $0x8] sm:$0xff] %vm1803_vm8, %v1782_v20 }
 0x29b   : > { %2263 = vrot.lane.b32.xlu0 %v1893_v42, %s3249_s29 }
 0x29c   : > { %v1853_v36 = vpop.permute.xlu1 %1852 }
 0x29d   : > { %1877 = vst.msk [vmem:[#allocation4] sm:$0xff] %vm1876_vm9, %v1853_v36  ;;  %v1975_v9 = vpop.permute.xlu0 %1974 }
 0x29e   : > { %2224 = vrot.lane.b32.xlu1 %v2201_v47, %s3248_s18  ;;  %1999 = vst.msk [vmem:[#allocation4] sm:$0xff] %vm1998_vm10, %v1975_v9 }
 0x29f   : > { %2336 = vrot.lane.b32.xlu0 %v2079_v37, %s3250_s20 }
 0x2a0   : > { %v1855_v25 = vpop.permute.xlu1 %1854 }
 0x2a1   : > { %1878 = vst.msk [vmem:[#allocation4 + $0x8] sm:$0xff] %vm1876_vm9, %v1855_v25  ;;  %v2016_v61 = vpop.permute.xlu0 %2015 }
 0x2a2   : > { %2265 = vrot.lane.b32.xlu1 %v2129_v49, %s3249_s29  ;;  %2040 = vst.msk [vmem:[#allocation4] sm:$0xff] %vm2039_vm11, %v2016_v61 }
 0x2a4   : > { %v1977_v60 = vpop.permute.xlu1 %1976 }
 0x2a5   : > { %2000 = vst.msk [vmem:[#allocation4 + $0x8] sm:$0xff] %vm1998_vm10, %v1977_v60  ;;  %v2089_v58 = vpop.permute.xlu0 %2088 }
 0x2a6   : > { %2338 = vrot.lane.b32.xlu1 %v2315_v59, %s3250_s20  ;;  %2113 = vst.msk [vmem:[#allocation4] sm:$0xff] %vm2112_vm4, %v2089_v58 }
 0x2a8   : > { %v2018_v57 = vpop.permute.xlu1 %2017 }
 0x2a9   : > { %2041 = vst.msk [vmem:[#allocation4 + $0x8] sm:$0xff] %vm2039_vm11, %v2018_v57  ;;  %v2211_v39 = vpop.permute.xlu0 %2210  ;;  %v4270_v57 = vld [vmem:[%s4425_s4] ss:$0 sm:$0xff] }
 0x2aa   : > { %2235 = vst.msk [vmem:[#allocation4] sm:$0xff] %vm2234_vm12, %v2211_v39 }
 0x2ac   : > { %v2091_v4 = vpop.permute.xlu1 %2090 }
 0x2ad   : > { %2114 = vst.msk [vmem:[#allocation4 + $0x8] sm:$0xff] %vm2112_vm4, %v2091_v4  ;;  %v2252_v18 = vpop.permute.xlu0 %2251 }
 0x2ae   : > { %2276 = vst.msk [vmem:[#allocation4] sm:$0xff] %vm2275_vm13, %v2252_v18 }
 0x2b0   : > { %v2213_v52 = vpop.permute.xlu1 %2212 }
 0x2b1   : > { %2236 = vst.msk [vmem:[#allocation4 + $0x8] sm:$0xff] %vm2234_vm12, %v2213_v52  ;;  %v2325_v34 = vpop.permute.xlu0 %2324 }
 0x2b2   : > { %2349 = vst.msk [vmem:[#allocation4] sm:$0xff] %vm2348_vm7, %v2325_v34 }
 0x2b4   : > { %v2254_v45 = vpop.permute.xlu1 %2253 }
 0x2b5   : > { %2277 = vst.msk [vmem:[#allocation4 + $0x8] sm:$0xff] %vm2275_vm13, %v2254_v45  ;;  %v2327_v50 = vpop.permute.xlu0 %2326 }
 0x2b6   : > { %2350 = vst.msk [vmem:[#allocation4 + $0x8] sm:$0xff] %vm2348_vm7, %v2327_v50 }
 0x2b8   : > { %v1784_v38 = vpop.permute.xlu1 %1783 }
 0x2b9   : > { %1806 = vst.msk [vmem:[#allocation4 + $0x10] sm:$0xff] %vm1803_vm8, %v1784_v38  ;;  %v1857_v51 = vpop.permute.xlu0 %1856  ;;  %v2357_v30 = vld [vmem:[#allocation4] sm:$0xff] }
 0x2ba   : > { %1879 = vst.msk [vmem:[#allocation4 + $0x10] sm:$0xff] %vm1876_vm9, %v1857_v51  ;;  %3091 = vmatprep.mubr.msk.bf16.mxu1 %vm2408_vm14, %v2357_v30 }
 0x2bc   : > { %v1786_v63 = vpop.permute.xlu1 %1785 }
 0x2bd   : > { %1807 = vst.msk [vmem:[#allocation4 + $0x18] sm:$0xff] %vm1803_vm8, %v1786_v63  ;;  %v1979_v40 = vpop.permute.xlu0 %1978  ;;  %v2358_v43 = vld [vmem:[#allocation4 + $0x8] sm:$0xff] }
 0x2be   : > { %2001 = vst.msk [vmem:[#allocation4 + $0x10] sm:$0xff] %vm1998_vm10, %v1979_v40  ;;  %3092 = vmatmul.mubr.msk.bf16.vlgmr.msra.gmra.mrb[8].mxu1 %vm2408_vm14, %v2358_v43 }
 0x2c0   : > { %v1859_v3 = vpop.permute.xlu1 %1858 }
 0x2c1   : > { %1880 = vst.msk [vmem:[#allocation4 + $0x18] sm:$0xff] %vm1876_vm9, %v1859_v3  ;;  %v2020_v55 = vpop.permute.xlu0 %2019 }
 0x2c2   : > { %2042 = vst.msk [vmem:[#allocation4 + $0x10] sm:$0xff] %vm2039_vm11, %v2020_v55 }
 0x2c4   : > { %v1981_v41 = vpop.permute.xlu1 %1980 }
 0x2c5   : > { %2002 = vst.msk [vmem:[#allocation4 + $0x18] sm:$0xff] %vm1998_vm10, %v1981_v41  ;;  %v2093_v54 = vpop.permute.xlu0 %2092 }
 0x2c6   : > { %2115 = vst.msk [vmem:[#allocation4 + $0x10] sm:$0xff] %vm2112_vm4, %v2093_v54 }
 0x2c8   : > { %v2022_v10 = vpop.permute.xlu1 %2021 }
 0x2c9   : > { %2043 = vst.msk [vmem:[#allocation4 + $0x18] sm:$0xff] %vm2039_vm11, %v2022_v10  ;;  %v2215_v44 = vpop.permute.xlu0 %2214 }
 0x2ca   : > { %2237 = vst.msk [vmem:[#allocation4 + $0x10] sm:$0xff] %vm2234_vm12, %v2215_v44 }
 0x2cc   : > { %v2095_v15 = vpop.permute.xlu1 %2094 }
 0x2cd   : > { %2116 = vst.msk [vmem:[#allocation4 + $0x18] sm:$0xff] %vm2112_vm4, %v2095_v15  ;;  %v2256_v56 = vpop.permute.xlu0 %2255 }
 0x2ce   : > { %2278 = vst.msk [vmem:[#allocation4 + $0x10] sm:$0xff] %vm2275_vm13, %v2256_v56 }
 0x2d0   : > { %v2217_v42 = vpop.permute.xlu1 %2216 }
 0x2d1   : > { %2238 = vst.msk [vmem:[#allocation4 + $0x18] sm:$0xff] %vm2234_vm12, %v2217_v42  ;;  %v2329_v29 = vpop.permute.xlu0 %2328 }
 0x2d2   : > { %2351 = vst.msk [vmem:[#allocation4 + $0x10] sm:$0xff] %vm2348_vm7, %v2329_v29 }
 0x2d4   : > { %v2258_v6 = vpop.permute.xlu1 %2257 }
 0x2d5   : > { %2279 = vst.msk [vmem:[#allocation4 + $0x18] sm:$0xff] %vm2275_vm13, %v2258_v6  ;;  %v2331_v21 = vpop.permute.xlu0 %2330 }
 0x2d6   : > { %2352 = vst.msk [vmem:[#allocation4 + $0x18] sm:$0xff] %vm2348_vm7, %v2331_v21 }
 0x2d8   : > { %v1788_v13 = vpop.permute.xlu1 %1787 }
 0x2d9   : > { %1808 = vst.msk [vmem:[#allocation4 + $0x20] sm:$0xff] %vm1803_vm8, %v1788_v13  ;;  %v1861_v49 = vpop.permute.xlu0 %1860  ;;  %v2359_v62 = vld [vmem:[#allocation4 + $0x10] sm:$0xff] }
 0x2da   : > { %1881 = vst.msk [vmem:[#allocation4 + $0x20] sm:$0xff] %vm1876_vm9, %v1861_v49  ;;  %3095 = vmatprep.mubr.msk.bf16.mxu1 %vm2408_vm14, %v2359_v62 }
 0x2dc   : > { %v1790_v53 = vpop.permute.xlu1 %1789 }
 0x2dd   : > { %1809 = vst.msk [vmem:[#allocation4 + $0x28] sm:$0xff] %vm1803_vm8, %v1790_v53  ;;  %v1983_v26 = vpop.permute.xlu0 %1982  ;;  %v2360_v35 = vld [vmem:[#allocation4 + $0x18] sm:$0xff] }
 0x2de   : > { %2003 = vst.msk [vmem:[#allocation4 + $0x20] sm:$0xff] %vm1998_vm10, %v1983_v26  ;;  %3096 = vmatmul.mubr.msk.bf16.gmra.mrb[12].mxu1 %vm2408_vm14, %v2360_v35 }
 0x2e0   : > { %v1863_v11 = vpop.permute.xlu1 %1862 }
 0x2e1   : > { %1882 = vst.msk [vmem:[#allocation4 + $0x28] sm:$0xff] %vm1876_vm9, %v1863_v11  ;;  %v2024_v46 = vpop.permute.xlu0 %2023 }
 0x2e2   : > { %2044 = vst.msk [vmem:[#allocation4 + $0x20] sm:$0xff] %vm2039_vm11, %v2024_v46 }
 0x2e4   : > { %v1985_v48 = vpop.permute.xlu1 %1984 }
 0x2e5   : > { %2004 = vst.msk [vmem:[#allocation4 + $0x28] sm:$0xff] %vm1998_vm10, %v1985_v48  ;;  %v2097_v37 = vpop.permute.xlu0 %2096 }
 0x2e6   : > { %2117 = vst.msk [vmem:[#allocation4 + $0x20] sm:$0xff] %vm2112_vm4, %v2097_v37 }
 0x2e8   : > { %v2026_v31 = vpop.permute.xlu1 %2025 }
 0x2e9   : > { %2045 = vst.msk [vmem:[#allocation4 + $0x28] sm:$0xff] %vm2039_vm11, %v2026_v31  ;;  %v2219_v20 = vpop.permute.xlu0 %2218 }
 0x2ea   : > { %2239 = vst.msk [vmem:[#allocation4 + $0x20] sm:$0xff] %vm2234_vm12, %v2219_v20 }
 0x2ec   : > { %v2099_v47 = vpop.permute.xlu1 %2098 }
 0x2ed   : > { %2118 = vst.msk [vmem:[#allocation4 + $0x28] sm:$0xff] %vm2112_vm4, %v2099_v47  ;;  %v2260_v27 = vpop.permute.xlu0 %2259 }
 0x2ee   : > { %2280 = vst.msk [vmem:[#allocation4 + $0x20] sm:$0xff] %vm2275_vm13, %v2260_v27 }
 0x2f0   : > { %v2221_v36 = vpop.permute.xlu1 %2220 }
 0x2f1   : > { %2240 = vst.msk [vmem:[#allocation4 + $0x28] sm:$0xff] %vm2234_vm12, %v2221_v36  ;;  %v2333_v9 = vpop.permute.xlu0 %2332 }
 0x2f2   : > { %2353 = vst.msk [vmem:[#allocation4 + $0x20] sm:$0xff] %vm2348_vm7, %v2333_v9 }
 0x2f4   : > { %v2262_v19 = vpop.permute.xlu1 %2261 }
 0x2f5   : > { %2281 = vst.msk [vmem:[#allocation4 + $0x28] sm:$0xff] %vm2275_vm13, %v2262_v19  ;;  %v2335_v25 = vpop.permute.xlu0 %2334 }
 0x2f6   : > { %2354 = vst.msk [vmem:[#allocation4 + $0x28] sm:$0xff] %vm2348_vm7, %v2335_v25 }
 0x2f8   : > { %v1792_v61 = vpop.permute.xlu1 %1791 }
 0x2f9   : > { %1810 = vst.msk [vmem:[#allocation4 + $0x30] sm:$0xff] %vm1803_vm8, %v1792_v61  ;;  %v1865_v59 = vpop.permute.xlu0 %1864  ;;  %v2361_v60 = vld [vmem:[#allocation4 + $0x20] sm:$0xff] }
 0x2fa   : > { %1883 = vst.msk [vmem:[#allocation4 + $0x30] sm:$0xff] %vm1876_vm9, %v1865_v59  ;;  %3099 = vmatprep.mubr.msk.bf16.mxu1 %vm2408_vm14, %v2361_v60 }
 0x2fc   : > { %v1794_v58 = vpop.permute.xlu1 %1793  ;;  %v3111_v18 = vpop.f32.mrb[12].mxu0 }
 0x2fd   : > { %1811 = vst.msk [vmem:[#allocation4 + $0x38] sm:$0xff] %vm1803_vm8, %v1794_v58  ;;  %v2362_v39 = vld [vmem:[#allocation4 + $0x28] sm:$0xff]  ;;  %v1987_v4 = vpop.permute.xlu0 %1986  ;;  %v2620_v52 = vadd.f32 %v3111_v18, %v4270_v57  ;;  %v2611_v34 = vpop.f32.mrb[13].mxu0 }
 0x2fe   : > { %3100 = vmatmul.mubr.msk.bf16.gmra.mrb[16].mxu1 %vm2408_vm14, %v2362_v39  ;;  %2005 = vst.msk [vmem:[#allocation4 + $0x30] sm:$0xff] %vm1998_vm10, %v1987_v4  ;;  %v3112_v50 = vpop.f32.mrb[14].mxu0  ;;  %v2612_v51 = vadd.f32 %v4270_v57, %v2611_v34 }
 0x2ff   : > { %v2623_v30 = vadd.f32 %v3112_v50, %v4270_v57  ;;  %2710 = vrot.lane.b32.xlu0 %v2620_v52, %s3239_s10  ;;  %v2614_v63 = vpop.f32.mrb[15].mxu0  ;;  %v4324_v52 = vld [vmem:[%s4429_s8] ss:$0 sm:$0xff] }
 0x300   : > { %v1867_v45 = vpop.permute.xlu1 %1866  ;;  %v2615_v40 = vadd.f32 %v4270_v57, %v2614_v63 }
 0x301   : > { %1884 = vst.msk [vmem:[#allocation4 + $0x38] sm:$0xff] %vm1876_vm9, %v1867_v45  ;;  %v2028_v38 = vpop.permute.xlu0 %2027  ;;  %2712 = vrot.lane.b32.xlu1 %v2623_v30, %s3239_s10 }
 0x302   : > { %2046 = vst.msk [vmem:[#allocation4 + $0x30] sm:$0xff] %vm2039_vm11, %v2028_v38 }
 0x303   : > { %2706 = vrot.lane.b32.xlu0 %v2612_v51, %s3239_s10 }
 0x304   : > { %v1989_v43 = vpop.permute.xlu1 %1988  ;;  %v3115_v55 = vpop.f32.mrb[16].mxu0 }
 0x305   : > { %2006 = vst.msk [vmem:[#allocation4 + $0x38] sm:$0xff] %vm1998_vm10, %v1989_v43  ;;  %v2101_v3 = vpop.permute.xlu0 %2100  ;;  %2708 = vrot.lane.b32.xlu1 %v2615_v40, %s3239_s10  ;;  %v2636_v41 = vadd.f32 %v3115_v55, %v4270_v57  ;;  %v2627_v54 = vpop.f32.mrb[17].mxu0 }
 0x306   : > { %2119 = vst.msk [vmem:[#allocation4 + $0x30] sm:$0xff] %vm2112_vm4, %v2101_v3  ;;  %v3116_v44 = vpop.f32.mrb[18].mxu0  ;;  %v2628_v56 = vadd.f32 %v4270_v57, %v2627_v54 }
 0x307   : > { %v2639_v42 = vadd.f32 %v3116_v44, %v4270_v57  ;;  %2718 = vrot.lane.b32.xlu0 %v2636_v41, %s3239_s10  ;;  %v2630_v29 = vpop.f32.mrb[19].mxu0 }
 0x308   : > { %v2030_v10 = vpop.permute.xlu1 %2029  ;;  %v2631_v6 = vadd.f32 %v4270_v57, %v2630_v29 }
 0x309   : > { %2047 = vst.msk [vmem:[#allocation4 + $0x38] sm:$0xff] %vm2039_vm11, %v2030_v10  ;;  %v2223_v15 = vpop.permute.xlu0 %2222  ;;  %2720 = vrot.lane.b32.xlu1 %v2639_v42, %s3239_s10 }
 0x30a   : > { %2241 = vst.msk [vmem:[#allocation4 + $0x30] sm:$0xff] %vm2234_vm12, %v2223_v15 }
 0x30b   : > { %2714 = vrot.lane.b32.xlu0 %v2628_v56, %s3239_s10 }
 0x30c   : > { %v2103_v21 = vpop.permute.xlu1 %2102  ;;  %v3119_v49 = vpop.f32.mrb[20].mxu0 }
 0x30d   : > { %2120 = vst.msk [vmem:[#allocation4 + $0x38] sm:$0xff] %vm2112_vm4, %v2103_v21  ;;  %v2264_v13 = vpop.permute.xlu0 %2263  ;;  %2716 = vrot.lane.b32.xlu1 %v2631_v6, %s3239_s10  ;;  %v2652_v62 = vadd.f32 %v3119_v49, %v4270_v57  ;;  %v2643_v53 = vpop.f32.mrb[21].mxu0 }
 0x30e   : > { %2282 = vst.msk [vmem:[#allocation4 + $0x30] sm:$0xff] %vm2275_vm13, %v2264_v13  ;;  %v3120_v35 = vpop.f32.mrb[22].mxu0  ;;  %v2644_v46 = vadd.f32 %v4270_v57, %v2643_v53 }
 0x30f   : > { %v2655_v48 = vadd.f32 %v3120_v35, %v4270_v57  ;;  %2726 = vrot.lane.b32.xlu0 %v2652_v62, %s3239_s10  ;;  %v2646_v37 = vpop.f32.mrb[23].mxu0 }
 0x310   : > { %v2225_v26 = vpop.permute.xlu1 %2224  ;;  %v2647_v31 = vadd.f32 %v4270_v57, %v2646_v37 }
 0x311   : > { %2242 = vst.msk [vmem:[#allocation4 + $0x38] sm:$0xff] %vm2234_vm12, %v2225_v26  ;;  %v2337_v11 = vpop.permute.xlu0 %2336  ;;  %2728 = vrot.lane.b32.xlu1 %v2655_v48, %s3239_s10 }
 0x312   : > { %2355 = vst.msk [vmem:[#allocation4 + $0x30] sm:$0xff] %vm2348_vm7, %v2337_v11 }
 0x313   : > { %2722 = vrot.lane.b32.xlu0 %v2644_v46, %s3239_s10 }
 0x314   : > { %v2266_v20 = vpop.permute.xlu1 %2265  ;;  %v3123_v47 = vpop.f32.mrb[24].mxu0 }
 0x315   : > { %2283 = vst.msk [vmem:[#allocation4 + $0x38] sm:$0xff] %vm2275_vm13, %v2266_v20  ;;  %2724 = vrot.lane.b32.xlu1 %v2647_v31, %s3239_s10  ;;  %v2659_v27 = vpop.f32.mrb[25].mxu0  ;;  %v2668_v59 = vadd.f32 %v3123_v47, %v4270_v57 }
 0x316   : > { %v2660_v9 = vadd.f32 %v4270_v57, %v2659_v27  ;;  %v3124_v19 = vpop.f32.mrb[26].mxu0 }
 0x317   : > { %v2662_v61 = vpop.f32.mrb[27].mxu0  ;;  %v2671_v58 = vadd.f32 %v3124_v19, %v4270_v57 }
 0x318   : > { %v2339_v36 = vpop.permute.xlu1 %2338  ;;  %v2663_v60 = vadd.f32 %v4270_v57, %v2662_v61  ;;  %2730 = vrot.lane.b32.xlu0 %v2660_v9, %s3239_s10 }
 0x319   : > { %2356 = vst.msk [vmem:[#allocation4 + $0x38] sm:$0xff] %vm2348_vm7, %v2339_v36  ;;  %v2363_v25 = vld [vmem:[#allocation4 + $0x30] sm:$0xff] }
 0x31a   : > { %3103 = vmatprep.mubr.msk.bf16.mxu1 %vm2408_vm14, %v2363_v25  ;;  %2732 = vrot.lane.b32.xlu1 %v2663_v60, %s3239_s10 }
 0x31c   : > { %2734 = vrot.lane.b32.xlu0 %v2668_v59, %s3239_s10 }
 0x31e   : > { %2736 = vrot.lane.b32.xlu1 %v2671_v58, %s3239_s10 }
 0x320   : > { %v2364_v39 = vld [vmem:[#allocation4 + $0x38] sm:$0xff] }
 0x321   : > { %3104 = vmatmul.mubr.msk.bf16.gmra.mrb[20].mxu1 %vm2408_vm14, %v2364_v39 }
 0x371   : > { %v2711_v4 = vpop.permute.xlu0 %2710 }
 0x373   : > { %v2713_v18 = vpop.permute.xlu1 %2712 }
 0x375   : > { %v2707_v50 = vpop.permute.xlu0 %2706 }
 0x377   : > { %v2709_v3 = vpop.permute.xlu1 %2708 }
 0x379   : > { %v2719_v6 = vpop.permute.xlu0 %2718 }
 0x37d   : > { %v2715_v49 = vpop.permute.xlu0 %2714 }
 0x381   : > { %v2727_v61 = vpop.permute.xlu0 %2726 }
 0x385   : > { %v2723_v58 = vpop.permute.xlu0 %2722 }
 0x391   : > { %v3093_v34 = vpop.f32.mrb[8].mxu1 }
 0x392   : > { %v2480_v45 = vadd.f32 %v3093_v34, %v4324_v52  ;;  %v2471_v57 = vpop.f32.mrb[9].mxu1 }
 0x393   : > { %v2472_v38 = vadd.f32 %v4324_v52, %v2471_v57  ;;  %v3094_v51 = vpop.f32.mrb[10].mxu1 }
 0x394   : > { %v2676_v30 = vadd.f32 %v2480_v45, %v3364_v7  ;;  %v2756_v63 = vadd.f32 %v2711_v4, %v2480_v45  ;;  %v2483_v40 = vadd.f32 %v3094_v51, %v4324_v52  ;;  %v2474_v43 = vpop.f32.mrb[11].mxu1 }
 0x395   : > { %v2674_v55 = vadd.f32 %v2472_v38, %v3349_v0  ;;  %v2475_v41 = vadd.f32 %v4324_v52, %v2474_v43  ;;  %v2754_v54 = vadd.f32 %v2707_v50, %v2472_v38 }
 0x396   : > { %v2772_v10 = vsel %vm562_vm0, %v2676_v30, %v2756_v63  ;;  %v2677_v44 = vadd.f32 %v2483_v40, %v3367_v8  ;;  %v2757_v15 = vadd.f32 %v2713_v18, %v2483_v40  ;;  %v2721_v8 = vpop.permute.xlu1 %2720 }
 0x397   : > { %2788 = vst.msk [vmem:[%s3346_s27 + $0x10] sm:$0xff] %vm1663_vm5, %v2772_v10  ;;  %v2675_v7 = vadd.f32 %v2475_v41, %v3352_v1  ;;  %v2770_v56 = vsel %vm562_vm0, %v2674_v55, %v2754_v54  ;;  %v2755_v42 = vadd.f32 %v2709_v3, %v2475_v41  ;;  %v2731_v54 = vpop.permute.xlu0 %2730 }
 0x398   : > { %v2773_v29 = vsel %vm562_vm0, %v2677_v44, %v2757_v15  ;;  %2786 = vst.msk [vmem:[%s3346_s27] sm:$0xff] %vm1663_vm5, %v2770_v56 }
 0x399   : > { %2789 = vst.msk [vmem:[%s3346_s27 + $0x18] sm:$0xff] %vm1663_vm5, %v2773_v29  ;;  %v2771_v0 = vsel %vm562_vm0, %v2675_v7, %v2755_v42 }
 0x39a   : > { %2787 = vst.msk [vmem:[%s3346_s27 + $0x8] sm:$0xff] %vm1663_vm5, %v2771_v0  ;;  %v2717_v48 = vpop.permute.xlu1 %2716 }
 0x39b   : > { %v2735_v15 = vpop.permute.xlu0 %2734 }
 0x3b1   : > { %v3097_v21 = vpop.f32.mrb[12].mxu1 }
 0x3b2   : > { %v2496_v13 = vadd.f32 %v3097_v21, %v4324_v52  ;;  %v2487_v1 = vpop.f32.mrb[13].mxu1 }
 0x3b3   : > { %v2488_v62 = vadd.f32 %v4324_v52, %v2487_v1  ;;  %v3098_v53 = vpop.f32.mrb[14].mxu1 }
 0x3b4   : > { %v2680_v26 = vadd.f32 %v2496_v13, %v3396_v24  ;;  %v2760_v35 = vadd.f32 %v2719_v6, %v2496_v13  ;;  %v2499_v11 = vadd.f32 %v3098_v53, %v4324_v52  ;;  %v2490_v46 = vpop.f32.mrb[15].mxu1 }
 0x3b5   : > { %v2678_v37 = vadd.f32 %v2488_v62, %v3380_v16  ;;  %v2491_v31 = vadd.f32 %v4324_v52, %v2490_v46  ;;  %v2758_v20 = vadd.f32 %v2715_v49, %v2488_v62 }
 0x3b6   : > { %v2776_v47 = vsel %vm562_vm0, %v2680_v26, %v2760_v35  ;;  %v2681_v27 = vadd.f32 %v2499_v11, %v3406_v28  ;;  %v2761_v36 = vadd.f32 %v2721_v8, %v2499_v11  ;;  %v2729_v28 = vpop.permute.xlu1 %2728 }
 0x3b7   : > { %2792 = vst.msk [vmem:[%s3346_s27 + $0x30] sm:$0xff] %vm1663_vm5, %v2776_v47  ;;  %v2679_v24 = vadd.f32 %v2491_v31, %v3383_v17  ;;  %v2774_v9 = vsel %vm562_vm0, %v2678_v37, %v2758_v20  ;;  %v2759_v19 = vadd.f32 %v2717_v48, %v2491_v31 }
 0x3b8   : > { %v2777_v25 = vsel %vm562_vm0, %v2681_v27, %v2761_v36  ;;  %2790 = vst.msk [vmem:[%s3346_s27 + $0x20] sm:$0xff] %vm1663_vm5, %v2774_v9 }
 0x3b9   : > { %2793 = vst.msk [vmem:[%s3346_s27 + $0x38] sm:$0xff] %vm1663_vm5, %v2777_v25  ;;  %v2775_v16 = vsel %vm562_vm0, %v2679_v24, %v2759_v19 }
 0x3ba   : > { %2791 = vst.msk [vmem:[%s3346_s27 + $0x28] sm:$0xff] %vm1663_vm5, %v2775_v16  ;;  %v2725_v50 = vpop.permute.xlu1 %2724 }
 0x3d1   : > { %v3101_v59 = vpop.f32.mrb[16].mxu1 }
 0x3d2   : > { %v2512_v60 = vadd.f32 %v3101_v59, %v4324_v52  ;;  %v2503_v17 = vpop.f32.mrb[17].mxu1 }
 0x3d3   : > { %v2504_v39 = vadd.f32 %v4324_v52, %v2503_v17  ;;  %v3102_v4 = vpop.f32.mrb[18].mxu1 }
 0x3d4   : > { %v2684_v18 = vadd.f32 %v2512_v60, %v3373_v12  ;;  %v2764_v34 = vadd.f32 %v2727_v61, %v2512_v60  ;;  %v2515_v45 = vadd.f32 %v3102_v4, %v4324_v52  ;;  %v2506_v57 = vpop.f32.mrb[19].mxu1 }
 0x3d5   : > { %v2682_v38 = vadd.f32 %v2504_v39, %v3355_v2  ;;  %v2507_v51 = vadd.f32 %v4324_v52, %v2506_v57  ;;  %v2762_v30 = vadd.f32 %v2723_v58, %v2504_v39 }
 0x3d6   : > { %v2780_v63 = vsel %vm562_vm0, %v2684_v18, %v2764_v34  ;;  %v2685_v40 = vadd.f32 %v2515_v45, %v3376_v14  ;;  %v2765_v43 = vadd.f32 %v2729_v28, %v2515_v45  ;;  %v2733_v14 = vpop.permute.xlu1 %2732 }
 0x3d7   : > { %2796 = vst.msk [vmem:[%s3346_s27 + $0x50] sm:$0xff] %vm1663_vm5, %v2780_v63  ;;  %v2683_v12 = vadd.f32 %v2507_v51, %v3360_v5  ;;  %v2778_v3 = vsel %vm562_vm0, %v2682_v38, %v2762_v30  ;;  %v2763_v55 = vadd.f32 %v2725_v50, %v2507_v51 }
 0x3d8   : > { %v2781_v41 = vsel %vm562_vm0, %v2685_v40, %v2765_v43  ;;  %2794 = vst.msk [vmem:[%s3346_s27 + $0x40] sm:$0xff] %vm1663_vm5, %v2778_v3 }
 0x3d9   : > { %2797 = vst.msk [vmem:[%s3346_s27 + $0x58] sm:$0xff] %vm1663_vm5, %v2781_v41  ;;  %v2779_v2 = vsel %vm562_vm0, %v2683_v12, %v2763_v55 }
 0x3da   : > { %2795 = vst.msk [vmem:[%s3346_s27 + $0x48] sm:$0xff] %vm1663_vm5, %v2779_v2  ;;  %v2737_v8 = vpop.permute.xlu1 %2736 }
 0x3f4   : > { %v3105_v10 = vpop.f32.mrb[20].mxu1 }
 0x3f5   : > { %v2528_v44 = vadd.f32 %v3105_v10, %v4324_v52  ;;  %v2519_v5 = vpop.f32.mrb[21].mxu1 }
 0x3f6   : > { %v2520_v7 = vadd.f32 %v4324_v52, %v2519_v5  ;;  %v3106_v56 = vpop.f32.mrb[22].mxu1 }
 0x3f7   : > { %v2688_v42 = vadd.f32 %v2528_v44, %v3415_v32  ;;  %v2768_v29 = vadd.f32 %v2735_v15, %v2528_v44  ;;  %v2531_v0 = vadd.f32 %v3106_v56, %v4324_v52  ;;  %v2522_v6 = vpop.f32.mrb[23].mxu1 }
 0x3f8   : > { %v2686_v21 = vadd.f32 %v2520_v7, %v3390_v22  ;;  %v2766_v13 = vadd.f32 %v2731_v54, %v2520_v7  ;;  %v2523_v1 = vadd.f32 %v4324_v52, %v2522_v6 }
 0x3f9   : > { %v2784_v49 = vsel %vm562_vm0, %v2688_v42, %v2768_v29  ;;  %v2689_v62 = vadd.f32 %v2531_v0, %v3418_v33  ;;  %v2769_v53 = vadd.f32 %v2737_v8, %v2531_v0 }
 0x3fa   : > { %2800 = vst.msk [vmem:[%s3346_s27 + $0x70] sm:$0xff] %vm1663_vm5, %v2784_v49  ;;  %v2782_v32 = vsel %vm562_vm0, %v2686_v21, %v2766_v13  ;;  %v2687_v26 = vadd.f32 %v2523_v1, %v3393_v23  ;;  %v2767_v35 = vadd.f32 %v2733_v14, %v2523_v1 }
 0x3fb   : > { %2798 = vst.msk [vmem:[%s3346_s27 + $0x60] sm:$0xff] %vm1663_vm5, %v2782_v32  ;;  %v2785_v11 = vsel %vm562_vm0, %v2689_v62, %v2769_v53 }
 0x3fc   : > { %2801 = vst.msk [vmem:[%s3346_s27 + $0x78] sm:$0xff] %vm1663_vm5, %v2785_v11  ;;  %v2783_v22 = vsel %vm562_vm0, %v2687_v26, %v2767_v35 }
 0x3fd   : > { %2799 = vst.msk [vmem:[%s3346_s27 + $0x68] sm:$0xff] %vm1663_vm5, %v2783_v22 }
 0x3fe PF: > { %s19_s13 = sadd.s32 1, %s3235_s13   ;;  %s4446_s30 = smov %s3227_s11 }
 0x3ff   : > { %p16_p1 = scmp.ge.s32.totalorder %s19_s13, 6   ;;  %s4447_s10 = smov %s3231_s12 }
 0x400   : > { %s4448_s11 = smov %s4451_s14  ;;  %s4449_s12 = smov %s4455_s15 }
 0x401   :  { %18 = sbr.rel (!%p16_p1) target bundleno = 3 (0x3), region = 106 }

// kernel: tpu_custom_call.1
= control target key start
LH: loop header
LB: loop body
LE: loop exit
PB: predicated region body
PF: predicated region fallthrough
CT: control target
= control target key end

     0   :  { %s3301_s30 = smov 0   ;;  %s3303_s10 = smov 0   ;;  %s4421_s0 = inlined_call_operand.vmem [shape: f32[2,16,16,4], index: 0, kind: input, shape index: {}]   ;;  %s4422_s1 = inlined_call_operand.vmem [shape: f32[2,16,16,4], index: 1, kind: input, shape index: {}]   ;;  %s4423_s2 = inlined_call_operand.vmem [shape: f32[2,16,16,4], index: 2, kind: input, shape index: {}]   ;;  %s4424_s3 = inlined_call_operand.vmem [shape: bf16[4,4], index: 3, kind: input, shape index: {}]   ;;  %s4425_s4 = inlined_call_operand.vmem [shape: f32[1,4], index: 4, kind: input, shape index: {}]   ;;  %s4426_s5 = inlined_call_operand.vmem [shape: bf16[36,8], index: 5, kind: input, shape index: {}]   ;;  %s4427_s6 = inlined_call_operand.vmem [shape: f32[1,8], index: 6, kind: input, shape index: {}]   ;;  %s4428_s7 = inlined_call_operand.vmem [shape: bf16[72,8], index: 7, kind: input, shape index: {}]   ;;  %s4429_s8 = inlined_call_operand.vmem [shape: f32[1,8], index: 8, kind: input, shape index: {}]   ;;  %s4430_s9 = inlined_call_operand.vmem [shape: f32[2,16,16,8], index: 9, kind: output, shape index: {}]  }
   0x1   :  { %s3305_s11 = smov 0   ;;  %s3307_s12 = smov 0  }
   0x2   :  { %s3309_s13 = smov 0  }
   0x3 LB: > { %s28_s14 = sadd.s32 1, %s3227_s11  ;;  %s31_s15 = sadd.s32 1, %s3231_s12  ;;  %s3235_s13 = sphi %s3309_s13, %s19_s13   ;;  %s3231_s12 = sphi %s3307_s12, %s4449_s12   ;;  %s3227_s11 = sphi %s3305_s11, %s4448_s11   ;;  %s3223_s10 = sphi %s3303_s10, %s4447_s10   ;;  %s3219_s30 = sphi %s3301_s30, %s4446_s30  }
   0x4   : > { %p29_p0 = scmp.ge.s32.totalorder %s28_s14, 2  ;;  %p2953_p1 = scmp.ge.s32.totalorder %s3235_s13, 1 }
   0x5   : > { %p377_p2 = scmp.lt.s32.totalorder %s3235_s13, 5 }
   0x6   : > { %s4451_s14 = smov (%p29_p0, %s28_s14), 0  ;;  %s4453_s15 = smov (!%p29_p0, %s31_s15), %s3231_s12 }
   0x7   : > { %p378_p3 = pnand %p2953_p1, %p377_p2  ;;  %p33_p4 = scmp.ge.s32.totalorder %s4453_s15, 2 }
   0x8   : > { %p456_p5 = scmp.lt.s32.totalorder (!%p378_p3), %s3223_s10, 1  ;;  %s2960_s16 = sshll.u32 (!%p378_p3), %s3219_s30, 3  ;;  %vm562_vm0 = vcmask (!%p378_p3), 31744   ;;  %vm693_vm2 = vcmask (!%p378_p3), 1040384   ;;  %vm694_vm3 = vsmask.f32 (!%p378_p3), 256 }
   0x9   : > { %s4455_s15 = smov (%p33_p4, %s4453_s15), 0  ;;  %381 = sbr.rel (%p378_p3) target bundleno = 1022 (0x3fe), region = 56 }
   0xa   : > { %p473_p6 = scmp.lt.s32.totalorder (!%p378_p3), %s2960_s16, 15  ;;  %s2954_s21 = sshll.u32 (!%p378_p3), %s3219_s30, 2  ;;  %vm3468_vm4 = vmand (!%p378_p3), %vm693_vm2, %vm694_vm3  ;;  %vm797_vm5 = vcmask (!%p378_p3), 1047552   ;;  %vm798_vm6 = vsmask.f32 (!%p378_p3), 7424  ;;  %vm1516_vm9 = vcmask (!%p378_p3), 1041408  }
   0xb   : > { %s2955_s28 = sadd.s32 (!%p378_p3), 4294967295, %s2954_s21  ;;  %s3019_s29 = sadd.s32 (!%p378_p3), 4, %s2954_s21  ;;  %vm3491_vm7 = vmand (!%p378_p3), %vm797_vm5, %vm798_vm6  ;;  %vm756_vm10 = vcmask (!%p378_p3), 64544   ;;  %vm850_vm11 = vcmask (!%p378_p3), 97344   ;;  %vm1002_vm12 = vcmask (!%p378_p3), 130144   ;;  %vm1053_vm13 = vcmask (!%p378_p3), 162944  }
   0xc   : > { %p453_p7 = scmp.gt.s32.totalorder (!%p378_p3), %s2955_s28, 0  ;;  %p483_p8 = scmp.lt.s32.totalorder (!%p378_p3), %s3019_s29, 7  ;;  %vm1144_vm14 = vcmask (!%p378_p3), 195744   ;;  %vm1295_vm15 = vcmask (!%p378_p3), 228544   ;;  %vm1437_vm2 = vcmask (!%p378_p3), 294144   ;;  %vm1485_vm3 = vcmask (!%p378_p3), 293888  }
   0xd   : > { %p528_p9 = scmp.eq.s32.totalorder (!%p378_p3), %s3219_s30, 0  ;;  %s3237_s21 = smov (!%p378_p3), 28   ;;  %vm1663_vm5 = vcmask (!%p378_p3), 64512  }
   0xe   : > { %s3238_s22 = smov (!%p378_p3), 16   ;;  %p544_p12 = scmp.eq.s32.totalorder (!%p378_p3), %s3219_s30, 1 }
   0xf   : > { %s3242_s25 = smov (!%p378_p3), 24   ;;  %p2987_p13 = scmp.ne.s32.totalorder (!%p378_p3), %s3219_s30, 0 }
  0x10   : > { %s4457_s10 = smov (!%p456_p5, %s3223_s10), 1  ;;  %s4459_s16 = smov (!%p473_p6, %s2960_s16), 15 }
  0x11   : > { %s3334_s17 = sshll.u32 %s4457_s10, 5  ;;  %s2961_s18 = sshll.u32 %s4459_s16, 1 }
  0x12   : > { %s477_s19 = sadd.s32 %s2961_s18, %s3334_s17  ;;  %s4461_s28 = smov (!%p453_p7, %s2955_s28), 0 }
  0x13   : > { %s2963_s20 = sshll.u32 %s477_s19, 3  ;;  %s4463_s29 = smov (!%p483_p8, %s3019_s29), 7 }
  0x14   : > { %s3341_s24 = scalar_lea.vmem %s4422_s1, %s2963_s20  ;;  %s3346_s27 = scalar_lea.vmem %s4430_s9, %s2963_s20 }
  0x15   : > { %v3349_v0 = vld [vmem:[%s3341_s24] sm:$0xff]  ;;  %v3352_v1 = vld [vmem:[%s3341_s24 + $0x8] sm:$0xff]  ;;  %v3364_v7 = vld [vmem:[%s3341_s24 + $0x10] sm:$0xff]  ;;  %s2956_s10 = sshll.u32 %s4461_s28, 1  ;;  %s2965_s16 = sshll.u32 %s4463_s29, 1 }
  0x16   : > { %v3355_v2 = vld [vmem:[%s3341_s24 + $0x40] sm:$0xff]  ;;  %v565_v3 = vmax.f32 %v3349_v0, 0.0  ;;  %v566_v4 = vmax.f32 %v3352_v1, 0.0  ;;  %v3360_v5 = vld [vmem:[%s3341_s24 + $0x48] sm:$0xff]  ;;  %v3367_v8 = vld [vmem:[%s3341_s24 + $0x18] sm:$0xff]  ;;  %v567_v10 = vmax.f32 %v3364_v7, 0.0 }
  0x17   : > { %v573_v6 = vmax.f32 %v3355_v2, 0.0  ;;  %v574_v9 = vmax.f32 %v3360_v5, 0.0  ;;  %v568_v11 = vmax.f32 %v3367_v8, 0.0  ;;  %v3373_v12 = vld [vmem:[%s3341_s24 + $0x50] sm:$0xff]  ;;  %v3376_v14 = vld [vmem:[%s3341_s24 + $0x58] sm:$0xff]  ;;  %v3380_v16 = vld [vmem:[%s3341_s24 + $0x20] sm:$0xff] }
  0x18   : > { %v581_v13 = vpack.c.bf16 %v566_v4, %v565_v3  ;;  %v575_v15 = vmax.f32 %v3373_v12, 0.0  ;;  %v3383_v17 = vld [vmem:[%s3341_s24 + $0x28] sm:$0xff]  ;;  %v576_v20 = vmax.f32 %v3376_v14, 0.0  ;;  %v569_v21 = vmax.f32 %v3380_v16, 0.0  ;;  %v3390_v22 = vld [vmem:[%s3341_s24 + $0x60] sm:$0xff]  ;;  %v3396_v24 = vld [vmem:[%s3341_s24 + $0x30] sm:$0xff] }
  0x19   : > { %v585_v18 = vpack.c.bf16 %v574_v9, %v573_v6  ;;  %v582_v19 = vpack.c.bf16 %v568_v11, %v567_v10  ;;  %v3393_v23 = vld [vmem:[%s3341_s24 + $0x68] sm:$0xff]  ;;  %v570_v25 = vmax.f32 %v3383_v17, 0.0  ;;  %v577_v26 = vmax.f32 %v3390_v22, 0.0  ;;  %v3406_v28 = vld [vmem:[%s3341_s24 + $0x38] sm:$0xff]  ;;  %v3415_v32 = vld [vmem:[%s3341_s24 + $0x70] sm:$0xff]  ;;  %p458_p10 = scmp.lt.s32.totalorder %s2956_s10, 15 }
  0x1a   : > { %590 = vst.msk [vmem:[#allocation2 + $0x10] sm:$0xff] %vm562_vm0, %v581_v13  ;;  %v578_v27 = vmax.f32 %v3393_v23, 0.0  ;;  %v571_v29 = vmax.f32 %v3396_v24, 0.0  ;;  %v586_v30 = vpack.c.bf16 %v576_v20, %v575_v15  ;;  %v572_v31 = vmax.f32 %v3406_v28, 0.0  ;;  %v3418_v33 = vld [vmem:[%s3341_s24 + $0x78] sm:$0xff]  ;;  %p3435_p11 = scmp.lt.s32.totalorder %s2965_s16, 15 }
  0x1b   : > { %594 = vst.msk [vmem:[#allocation2 + $0x30] sm:$0xff] %vm562_vm0, %v585_v18  ;;  %591 = vst.msk [vmem:[#allocation2 + $0x18] sm:$0xff] %vm562_vm0, %v582_v19  ;;  %v583_v34 = vpack.c.bf16 %v570_v25, %v569_v21  ;;  %v579_v36 = vmax.f32 %v3415_v32, 0.0  ;;  %v580_v37 = vmax.f32 %v3418_v33, 0.0  ;;  %s4465_s10 = smov (!%p458_p10, %s2956_s10), 15 }
  0x1c   : > { %v587_v35 = vpack.c.bf16 %v578_v27, %v577_v26  ;;  %595 = vst.msk [vmem:[#allocation2 + $0x38] sm:$0xff] %vm562_vm0, %v586_v30  ;;  %v584_v38 = vpack.c.bf16 %v572_v31, %v571_v29  ;;  %s537_s18 = scalar_select %p528_p9, 1, 0 }
  0x1d   : > { %592 = vst.msk [vmem:[#allocation2 + $0x20] sm:$0xff] %vm562_vm0, %v583_v34  ;;  %v588_v39 = vpack.c.bf16 %v580_v37, %v579_v36  ;;  %s2957_s19 = sshll.u32 %s4465_s10, 1  ;;  %s3239_s10 = smov 4  }
  0x1e   : > { %596 = vst.msk [vmem:[#allocation2 + $0x40] sm:$0xff] %vm562_vm0, %v587_v35  ;;  %593 = vst.msk [vmem:[#allocation2 + $0x28] sm:$0xff] %vm562_vm0, %v584_v38  ;;  %s462_s20 = sadd.s32 %s3334_s17, %s2957_s19  ;;  %v538_v41 = vstv %s537_s18  ;;  %s4467_s16 = smov (!%p3435_p11, %s2965_s16), 15 }
  0x1f   : > { %597 = vst.msk [vmem:[#allocation2 + $0x48] sm:$0xff] %vm562_vm0, %v588_v39  ;;  %s2959_s23 = sshll.u32 %s462_s20, 3  ;;  %vm3446_vm1 = vcmp.eq.s32.totalorder %v538_v41, 1  ;;  %s2966_s29 = sshll.u32 %s4467_s16, 1 }
  0x20   : > { %s464_s28 = scalar_lea.vmem %s4421_s0, %s2959_s23  ;;  %s3503_s16 = sadd.s32 %s2966_s29, %s3334_s17 }
  0x21   : > { %v1155_v40 = vld [vmem:[#allocation2 + $0x10] sm:$0xff]  ;;  %v529_v47 = vld [vmem:[%s464_s28] sm:$0xff]  ;;  %v530_v48 = vld [vmem:[%s464_s28 + $0x8] sm:$0xff]  ;;  %s3240_s18 = smov 12   ;;  %s2968_s17 = sshll.u32 %s3503_s16, 3 }
  0x22   : > { %1316 = vrot.lane.b32.xlu0 %v1155_v40, %s3237_s21  ;;  %v1166_v42 = vshrl.u32 %v1155_v40, 16  ;;  %1025 = vrot.lane.b32.xlu1 %v1155_v40, %s3238_s22  ;;  %v1169_v43 = vshll.u32 %v1155_v40, 16  ;;  %v3439_v44 = vld [vmem:[#allocation2 + $0x30] sm:$0xff]  ;;  %v3441_v45 = vld [vmem:[#allocation2 + $0x18] sm:$0xff]  ;;  %v533_v51 = vmax.f32 %v529_v47, 0.0  ;;  %v534_v52 = vmax.f32 %v530_v48, 0.0  ;;  %s3547_s24 = scalar_lea.vmem %s4423_s2, %s2968_s17 }
  0x23   : > { %v531_v50 = vld [vmem:[%s464_s28 + $0x10] sm:$0xff]  ;;  %v532_v53 = vld [vmem:[%s464_s28 + $0x18] sm:$0xff]  ;;  %v1173_v54 = vshrl.u32 %v3441_v45, 16  ;;  %v656_v57 = vshrl.u32 %v3439_v44, 16  ;;  %v1176_v4 = vshll.u32 %v3441_v45, 16  ;;  %v659_v20 = vshll.u32 %v3439_v44, 16 }
  0x24   : > { %v882_v46 = vrot.slane %v1166_v42, 7  ;;  %v1066_v55 = vrot.slane %v1169_v43, 1  ;;  %v535_v56 = vmax.f32 %v531_v50, 0.0  ;;  %v540_v59 = vsel %vm3446_vm1, 0.0, %v533_v51  ;;  %v3483_v13 = vld [vmem:[#allocation2 + $0x20] sm:$0xff]  ;;  %v3511_v34 = vld [vmem:[#allocation2 + $0x38] sm:$0xff] }
  0x25   : > { %v541_v60 = vsel %vm3446_vm1, 0.0, %v534_v52  ;;  %v536_v63 = vmax.f32 %v532_v53, 0.0  ;;  %v658_v3 = vrot.slane %v656_v57, 7  ;;  %v637_v9 = vrot.slane %v1173_v54, 7  ;;  %v3496_v21 = vld [vmem:[#allocation2 + $0x40] sm:$0xff]  ;;  %v3500_v27 = vld [vmem:[#allocation2 + $0x28] sm:$0xff] }
  0x26   : > { %738 = vrot.lane.b32.xlu0 %v3439_v44, %s3239_s10  ;;  %1318 = vrot.lane.b32.xlu1 %v3441_v45, %s3237_s21  ;;  %v885_v58 = vor.u32 %v1169_v43, %v882_v46  ;;  %v560_v62 = vpack.c.bf16 %v541_v60, %v540_v59  ;;  %v542_v6 = vsel %vm3446_vm1, 0.0, %v535_v56  ;;  %v1067_v10 = vor.u32 %v1166_v42, %v1066_v55  ;;  %v3526_v48 = vld [vmem:[#allocation2 + $0x48] sm:$0xff]  ;;  %s3241_s19 = smov 20   ;;  %s3243_s28 = smov 32  }
  0x27   : > { %v543_v11 = vsel %vm3446_vm1, 0.0, %v536_v63  ;;  %v1359_v25 = vrot.slane %v1176_v4, 1  ;;  %v4431_v26 = vshrl.u32 %v3483_v13, 16  ;;  %v661_v29 = vor.u32 %v659_v20, %v658_v3  ;;  %s553_s26 = scalar_select %p544_p12, 1, 0 }
  0x28   : > { %563 = vst.msk [vmem:[#allocation2] sm:$0xff] %vm562_vm0, %v560_v62  ;;  %v3488_v15 = vsel %vm3468_vm4, 0, %v885_v58  ;;  %v561_v19 = vpack.c.bf16 %v543_v11, %v542_v6  ;;  %v640_v30 = vor.u32 %v1176_v4, %v637_v9  ;;  %v3509_v31 = vsel %vm3491_vm7, %v1067_v10, 0  ;;  %s3244_s23 = smov 8  }
  0x29   : > { %v896_v35 = vrot.slane %v4431_v26, 7  ;;  %v4433_v36 = vshll.u32 %v3483_v13, 16  ;;  %v4432_v37 = vshrl.u32 %v3496_v21, 16  ;;  %v925_v38 = vshll.u32 %v3496_v21, 16  ;;  %708 = vst.msk [vmem:[#allocation4 + $0x10] sm:$0xff] %vm562_vm0, %v3488_v15 }
  0x2a   : > { %732 = vrot.lane.b32.xlu0 %v3441_v45, %s3239_s10  ;;  %730 = vrot.lane.b32.xlu1 %v1155_v40, %s3239_s10  ;;  %564 = vst.msk [vmem:[#allocation2 + $0x8] sm:$0xff] %vm562_vm0, %v561_v19  ;;  %v663_v39 = vshrl.u32 %v3511_v34, 16  ;;  %v666_v40 = vshll.u32 %v3511_v34, 16  ;;  %v1187_v41 = vshrl.u32 %v3500_v27, 16  ;;  %v1360_v43 = vor.u32 %v1359_v25, %v1173_v54  ;;  %v545_v19 = vld [vmem:[%s3547_s24] sm:$0xff] }
  0x2b   : > { %v899_v46 = vor.u32 %v4433_v36, %v896_v35  ;;  %v924_v47 = vrot.slane %v4432_v37, 7  ;;  %v1190_v52 = vshll.u32 %v3500_v27, 16  ;;  %v3536_v54 = vsel %vm3468_vm4, 0, %v640_v30 }
  0x2c   : > { %v665_v50 = vrot.slane %v663_v39, 7  ;;  %v1189_v51 = vrot.slane %v1187_v41, 7  ;;  %v1215_v62 = vshrl.u32 %v3526_v48, 16  ;;  %v3562_v9 = vsel %vm3491_vm7, %v1360_v43, 0  ;;  %709 = vst.msk [vmem:[#allocation4 + $0x18] sm:$0xff] %vm562_vm0, %v3536_v54 }
  0x2d   : > { %v3540_v55 = vsel %vm3468_vm4, 0, %v899_v46  ;;  %v927_v56 = vor.u32 %v925_v38, %v924_v47  ;;  %v3564_v10 = vrot.slane %v659_v20, 1  ;;  %v546_v46 = vld [vmem:[%s3547_s24 + $0x8] sm:$0xff]  ;;  %v1218_v43 = vshll.u32 %v3526_v48, 16 }
  0x2e   : > { %974 = vrot.lane.b32.xlu1 %v3488_v15, %s3240_s18  ;;  %v1192_v60 = vor.u32 %v1190_v52, %v1189_v51  ;;  %710 = vst.msk [vmem:[#allocation4 + $0x20] sm:$0xff] %vm562_vm0, %v3540_v55  ;;  %v668_v20 = vor.u32 %v666_v40, %v665_v50  ;;  %v1363_v47 = vrot.slane %v1190_v52, 1  ;;  %v3583_v51 = vsel %vm3468_vm4, 0, %v661_v29 }
  0x2f   : > { %v603_v42 = vld [vmem:[#allocation2] sm:$0xff]  ;;  %v3555_v6 = vsel %vm3468_vm4, 0, %v927_v56  ;;  %v1371_v50 = vrot.slane %v1218_v43, 1  ;;  %v550_v26 = vmax.f32 %v546_v46, 0.0  ;;  %v554_v36 = vstv %s553_s26  ;;  %712 = vst.msk [vmem:[#allocation4 + $0x30] sm:$0xff] %vm562_vm0, %v3583_v51 }
  0x30   : > { %726 = vrot.lane.b32.xlu0 %v603_v42, %s3239_s10  ;;  %v617_v49 = vshll.u32 %v603_v42, 16  ;;  %v614_v53 = vshrl.u32 %v603_v42, 16  ;;  %v3568_v11 = vsel %vm3468_vm4, 0, %v1192_v60  ;;  %714 = vst.msk [vmem:[#allocation4 + $0x40] sm:$0xff] %vm562_vm0, %v3555_v6  ;;  %v1217_v42 = vrot.slane %v1215_v62, 7 }
  0x31   : > { %v604_v58 = vld [vmem:[#allocation2 + $0x8] sm:$0xff]  ;;  %711 = vst.msk [vmem:[#allocation4 + $0x28] sm:$0xff] %vm562_vm0, %v3568_v11  ;;  %v1364_v60 = vor.u32 %v1363_v47, %v1187_v41  ;;  %vm3598_vm8 = vcmp.eq.s32.totalorder %v554_v36, 1  ;;  %v547_v41 = vld [vmem:[%s3547_s24 + $0x10] sm:$0xff]  ;;  %v781_v47 = vrot.slane %v666_v40, 1  ;;  %vm1346_vm1 = vcmask 261344  }
  0x32   : > { %1116 = vrot.lane.b32.xlu1 %v3509_v31, %s3241_s19  ;;  %v767_v59 = vrot.slane %v617_v49, 1  ;;  %v616_v63 = vrot.slane %v614_v53, 7  ;;  %v621_v3 = vshrl.u32 %v604_v58, 16  ;;  %v624_v4 = vshll.u32 %v604_v58, 16 }
  0x33   : > { %v551_v46 = vmax.f32 %v547_v41, 0.0 }
  0x34   : > { %728 = vrot.lane.b32.xlu0 %v604_v58, %s3239_s10  ;;  %v623_v25 = vrot.slane %v621_v3, 7  ;;  %v768_v30 = vor.u32 %v767_v59, %v614_v53  ;;  %v769_v35 = vrot.slane %v624_v4, 1  ;;  %v619_v56 = vor.u32 %v617_v49, %v616_v63 }
  0x35   : > { %v549_v53 = vmax.f32 %v545_v19, 0.0  ;;  %v1220_v59 = vor.u32 %v1218_v43, %v1217_v42  ;;  %v1372_v63 = vor.u32 %v1371_v50, %v1215_v62  ;;  %v3634_v42 = vsel %vm3468_vm4, 0, %v668_v20  ;;  %v3190_v20 = vld [vmem:[%s4426_s5 + $0x8] sm:$0xff]  }
  0x36   : > { %1267 = vrot.lane.b32.xlu1 %v3536_v54, %s3242_s25  ;;  %v626_v37 = vor.u32 %v624_v4, %v623_v25  ;;  %v800_v52 = vsel %vm3491_vm7, %v768_v30, 0  ;;  %v770_v29 = vor.u32 %v769_v35, %v621_v3  ;;  %v548_v4 = vld [vmem:[%s3547_s24 + $0x18] sm:$0xff]  ;;  %v557_v3 = vsel %vm3598_vm8, 0.0, %v550_v26  ;;  %v3189_v30 = vld [vmem:[%s4426_s5] sm:$0xff]   ;;  %713 = vst.msk [vmem:[#allocation4 + $0x38] sm:$0xff] %vm562_vm0, %v3634_v42 }
  0x37   : > { %v3592_v49 = vsel %vm3468_vm4, 0, %v1220_v59  ;;  %v556_v25 = vsel %vm3598_vm8, 0.0, %v549_v53  ;;  %v3619_v36 = vsel %vm3491_vm7, %v1372_v63, 0  ;;  %v696_v26 = vsel %vm3468_vm4, 0, %v619_v56  ;;  %3055 = vmatprep.subr.bf16.mxu0 %v3189_v30  ;;  %3125 = vmatprep.subr.bf16.mxu1 %v3189_v30 }
  0x38   : > { %1023 = vrot.lane.b32.xlu0 %v604_v58, %s3238_s22  ;;  %v3596_v58 = vsel %vm3491_vm7, %v1364_v60, 0  ;;  %715 = vst.msk [vmem:[#allocation4 + $0x48] sm:$0xff] %vm562_vm0, %v3592_v49  ;;  %v598_v62 = vpack.c.bf16 %v557_v3, %v556_v25  ;;  %706 = vst.msk [vmem:[#allocation4] sm:$0xff] %vm562_vm0, %v696_v26  ;;  %v697_v35 = vsel %vm3468_vm4, 0, %v626_v37  ;;  %v552_v43 = vmax.f32 %v548_v4, 0.0  ;;  %3056 = vmatpush3.bf16.msra.mxu0 %v3189_v30 }
  0x39   : > { %707 = vst.msk [vmem:[#allocation4 + $0x8] sm:$0xff] %vm562_vm0, %v697_v35  ;;  %3128 = vmatpush3.bf16.msra.mxu1 %v3189_v30  ;;  %v801_v53 = vsel %vm3491_vm7, %v770_v29, 0  ;;  %v780_v59 = vor.u32 %v3564_v10, %v656_v57  ;;  %3057 = vmatprep.subr.bf16.mxu0 %v3190_v20  ;;  %v3191_v60 = vld [vmem:[%s4426_s5 + $0x10] ss:$0 sps:$4 sm:$0x33]   ;;  %v782_v57 = vor.u32 %v781_v47, %v663_v39  ;;  %v4443_v39 = vshll.u32 %v3483_v13, 16 }
  0x3a   : > { %1409 = vrot.lane.b32.xlu1 %v3562_v9, %s3243_s28  ;;  %601 = vst.msk [vmem:[#allocation2 + $0x50] sm:$0xff] %vm562_vm0, %v598_v62  ;;  %v559_v37 = vsel %vm3598_vm8, 0.0, %v552_v43  ;;  %3126 = vmatprep.subr.bf16.mxu1 %v3190_v20  ;;  %v1518_v10 = vsel %vm1516_vm9, %v3191_v60, 0 }
  0x3b   : > { %v3665_v40 = vsel %vm3491_vm7, %v780_v59, 0  ;;  %v3677_v50 = vsel %vm3491_vm7, %v782_v57, 0 }
  0x3c   : > { %1265 = vrot.lane.b32.xlu0 %v3488_v15, %s3242_s25  ;;  %v558_v15 = vsel %vm3598_vm8, 0.0, %v551_v46  ;;  %3058 = vmatpush3.bf16.msra.mxu0 %v3190_v20 }
  0x3d   : > { %v599_v56 = vpack.c.bf16 %v559_v37, %v558_v15  ;;  %3129 = vmatpush3.bf16.msra.mxu1 %v3190_v20  ;;  %3131 = vmatprep.subr.msk.bf16.mxu0 %vm1516_vm9, %v3191_v60 }
  0x3e   : > { %740 = vrot.lane.b32.xlu1 %v3511_v34, %s3239_s10  ;;  %3132 = vmatprep.subr.msk.bf16.mxu1 %vm1516_vm9, %v3191_v60 }
  0x3f   : > { %602 = vst.msk [vmem:[#allocation2 + $0x58] sm:$0xff] %vm562_vm0, %v599_v56 }
  0x40   : > { %1407 = vrot.lane.b32.xlu0 %v3509_v31, %s3243_s28  ;;  %3060 = vmatpush3.bf16.msra.mxu0 %v1518_v10 }
  0x41   : > { %3130 = vmatpush3.bf16.msra.mxu1 %v1518_v10 }
  0x42   : > { %820 = vrot.lane.b32.xlu1 %v800_v52, %s3244_s23  ;;  %v4444_v52 = vshrl.u32 %v3496_v21, 16 }
  0x44   : > { %972 = vrot.lane.b32.xlu0 %v697_v35, %s3240_s18 }
  0x46   : > { %822 = vrot.lane.b32.xlu1 %v801_v53, %s3244_s23  ;;  %v1164_v35 = vld [vmem:[#allocation2 + $0x58] sm:$0xff] }
  0x47   : > { %v1229_v46 = vshrl.u32 %v1164_v35, 16  ;;  %v1232_v37 = vshll.u32 %v1164_v35, 16 }
  0x48   : > { %1114 = vrot.lane.b32.xlu0 %v801_v53, %s3241_s19 }
  0x49   : > { %v1231_v15 = vrot.slane %v1229_v46, 7  ;;  %v1375_v10 = vrot.slane %v1232_v37, 1 }
  0x4a   : > { %832 = vrot.lane.b32.xlu1 %v3665_v40, %s3244_s23 }
  0x4c   : > { %824 = vrot.lane.b32.xlu0 %v3509_v31, %s3244_s23  ;;  %v1078_v31 = vrot.slane %v925_v38, 1  ;;  %v4445_v38 = vshrl.u32 %v3483_v13, 16 }
  0x4e   : > { %834 = vrot.lane.b32.xlu1 %v3677_v50, %s3244_s23  ;;  %v1079_v29 = vor.u32 %v1078_v31, %v4444_v52 }
  0x50   : > { %826 = vrot.lane.b32.xlu0 %v3562_v9, %s3244_s23 }
  0x52   : > { %984 = vrot.lane.b32.xlu1 %v3634_v42, %s3240_s18 }
  0x54   : > { %976 = vrot.lane.b32.xlu0 %v3536_v54, %s3240_s18  ;;  %v1070_v54 = vrot.slane %v4443_v39, 1 }
  0x56   : > { %986 = vrot.lane.b32.xlu1 %v3555_v6, %s3240_s18  ;;  %v1071_v63 = vor.u32 %v1070_v54, %v4445_v38 }
  0x58   : > { %978 = vrot.lane.b32.xlu0 %v3540_v55, %s3240_s18  ;;  %v1097_v19 = vsel %vm3491_vm7, %v1071_v63, 0 }
  0x5a   : > { %1035 = vrot.lane.b32.xlu1 %v3511_v34, %s3238_s22 }
  0x5c   : > { %1027 = vrot.lane.b32.xlu0 %v3441_v45, %s3238_s22  ;;  %v1101_v45 = vsel %vm3491_vm7, %v1079_v29, 0 }
  0x5e   : > { %1037 = vrot.lane.b32.xlu1 %v3496_v21, %s3238_s22 }
  0x60   : > { %1029 = vrot.lane.b32.xlu0 %v3483_v13, %s3238_s22 }
  0x62   : > { %1126 = vrot.lane.b32.xlu1 %v3677_v50, %s3241_s19 }
  0x64   : > { %1118 = vrot.lane.b32.xlu0 %v3562_v9, %s3241_s19 }
  0x66   : > { %1128 = vrot.lane.b32.xlu1 %v1101_v45, %s3241_s19 }
  0x68   : > { %1120 = vrot.lane.b32.xlu0 %v1097_v19, %s3241_s19 }
  0x6a   : > { %1277 = vrot.lane.b32.xlu1 %v3555_v6, %s3242_s25 }
  0x6c   : > { %1269 = vrot.lane.b32.xlu0 %v3540_v55, %s3242_s25  ;;  %v871_v55 = vld [vmem:[#allocation2 + $0x50] sm:$0xff] }
  0x6d   : > { %v936_v6 = vshrl.u32 %v871_v55, 16  ;;  %v939_v9 = vshll.u32 %v871_v55, 16 }
  0x6e   : > { %1279 = vrot.lane.b32.xlu1 %v3592_v49, %s3242_s25 }
  0x70   : > { %1271 = vrot.lane.b32.xlu0 %v3568_v11, %s3242_s25 }
  0x72   : > { %1328 = vrot.lane.b32.xlu1 %v3496_v21, %s3237_s21 }
  0x74   : > { %1320 = vrot.lane.b32.xlu0 %v3483_v13, %s3237_s21 }
  0x76   : > { %1330 = vrot.lane.b32.xlu1 %v3526_v48, %s3237_s21 }
  0x78   : > { %1322 = vrot.lane.b32.xlu0 %v3500_v27, %s3237_s21 }
  0x7a   : > { %1419 = vrot.lane.b32.xlu1 %v1101_v45, %s3243_s28 }
  0x7c   : > { %1411 = vrot.lane.b32.xlu0 %v1097_v19, %s3243_s28 }
  0x7e   : > { %742 = vrot.lane.b32.xlu1 %v3496_v21, %s3239_s10  ;;  %v938_v21 = vrot.slane %v936_v6, 7 }
  0x80   : > { %734 = vrot.lane.b32.xlu0 %v3483_v13, %s3239_s10  ;;  %v941_v13 = vor.u32 %v939_v9, %v938_v21 }
  0x82   : > { %1421 = vrot.lane.b32.xlu1 %v3619_v36, %s3243_s28  ;;  %v961_v41 = vsel %vm3468_vm4, 0, %v941_v13 }
  0x84   : > { %1413 = vrot.lane.b32.xlu0 %v3596_v58, %s3243_s28 }
  0x86   : > { %744 = vrot.lane.b32.xlu1 %v3526_v48, %s3239_s10 }
  0x88   : > { %736 = vrot.lane.b32.xlu0 %v3500_v27, %s3239_s10 }
  0x8a   : > { %836 = vrot.lane.b32.xlu1 %v1101_v45, %s3244_s23 }
  0x8c   : > { %828 = vrot.lane.b32.xlu0 %v1097_v19, %s3244_s23 }
  0x8e   : > { %838 = vrot.lane.b32.xlu1 %v3619_v36, %s3244_s23 }
  0x90   : > { %830 = vrot.lane.b32.xlu0 %v3596_v58, %s3244_s23 }
  0x92   : > { %988 = vrot.lane.b32.xlu1 %v3592_v49, %s3240_s18  ;;  %v1082_v49 = vrot.slane %v939_v9, 1 }
  0x94   : > { %v3759_v4 = vpop.permute.xlu0 %1316  ;;  %v3761_v25 = vpop.permute.xlu1 %1025  ;;  %980 = vrot.lane.b32.xlu0 %v3568_v11, %s3240_s18  ;;  %v1083_v11 = vor.u32 %v1082_v49, %v936_v6 }
  0x96   : > { %990 = vrot.lane.b32.xlu1 %v961_v41, %s3240_s18 }
  0x98   : > { %v739_v3 = vpop.permute.xlu0 %738  ;;  %v3766_v30 = vpop.permute.xlu1 %1318  ;;  %982 = vrot.lane.b32.xlu0 %v3583_v51, %s3240_s18 }
  0x99   : > { %763 = vst.msk [vmem:[#allocation4 + $0x30] sm:$0xff] %vm756_vm10, %v739_v3 }
  0x9a   : > { %1039 = vrot.lane.b32.xlu1 %v3526_v48, %s3238_s22  ;;  %v1103_v48 = vsel %vm3491_vm7, %v1083_v11, 0 }
  0x9c   : > { %v733_v62 = vpop.permute.xlu0 %732  ;;  %v731_v26 = vpop.permute.xlu1 %730  ;;  %1031 = vrot.lane.b32.xlu0 %v3500_v27, %s3238_s22  ;;  %v1234_v27 = vor.u32 %v1232_v37, %v1231_v15 }
  0x9d   : > { %760 = vst.msk [vmem:[#allocation4 + $0x18] sm:$0xff] %vm756_vm10, %v733_v62  ;;  %759 = vst.msk [vmem:[#allocation4 + $0x10] sm:$0xff] %vm756_vm10, %v731_v26 }
  0x9e   : > { %1041 = vrot.lane.b32.xlu1 %v871_v55, %s3238_s22 }
  0xa0   : > { %v975_v43 = vpop.permute.xlu1 %974  ;;  %1033 = vrot.lane.b32.xlu0 %v3439_v44, %s3238_s22 }
  0xa2   : > { %1130 = vrot.lane.b32.xlu1 %v3619_v36, %s3241_s19  ;;  %v727_v20 = vpop.permute.xlu0 %726  ;;  %v1254_v36 = vsel %vm3468_vm4, 0, %v1234_v27 }
  0xa3   : > { %757 = vst.msk [vmem:[#allocation4] sm:$0xff] %vm756_vm10, %v727_v20 }
  0xa4   : > { %v1117_v47 = vpop.permute.xlu1 %1116  ;;  %1122 = vrot.lane.b32.xlu0 %v3596_v58, %s3241_s19 }
  0xa6   : > { %1132 = vrot.lane.b32.xlu1 %v1103_v48, %s3241_s19  ;;  %v729_v56 = vpop.permute.xlu0 %728 }
  0xa7   : > { %758 = vst.msk [vmem:[#allocation4 + $0x8] sm:$0xff] %vm756_vm10, %v729_v56 }
  0xa8   : > { %v1268_v53 = vpop.permute.xlu1 %1267  ;;  %1124 = vrot.lane.b32.xlu0 %v3665_v40, %s3241_s19 }
  0xaa   : > { %1281 = vrot.lane.b32.xlu1 %v961_v41, %s3242_s25  ;;  %v1024_v59 = vpop.permute.xlu0 %1023 }
  0xac   : > { %v1410_v60 = vpop.permute.xlu1 %1409  ;;  %1273 = vrot.lane.b32.xlu0 %v3583_v51, %s3242_s25  ;;  %v1376_v51 = vor.u32 %v1375_v10, %v1229_v46 }
  0xae   : > { %1283 = vrot.lane.b32.xlu1 %v1254_v36, %s3242_s25  ;;  %v1266_v58 = vpop.permute.xlu0 %1265 }
  0xb0   : > { %v741_v57 = vpop.permute.xlu1 %740  ;;  %1275 = vrot.lane.b32.xlu0 %v3634_v42, %s3242_s25 }
  0xb1   : > { %764 = vst.msk [vmem:[#allocation4 + $0x38] sm:$0xff] %vm756_vm10, %v741_v57 }
  0xb2   : > { %1332 = vrot.lane.b32.xlu1 %v871_v55, %s3237_s21  ;;  %v1408_v31 = vpop.permute.xlu0 %1407 }
  0xb4   : > { %v821_v39 = vpop.permute.xlu1 %820  ;;  %1324 = vrot.lane.b32.xlu0 %v3439_v44, %s3237_s21  ;;  %v1396_v44 = vsel %vm3491_vm7, %v1376_v51, 0 }
  0xb5   : > { %851 = vst.msk [vmem:[#allocation4] sm:$0xff] %vm850_vm11, %v821_v39 }
  0xb6   : > { %1334 = vrot.lane.b32.xlu1 %v1164_v35, %s3237_s21  ;;  %v973_v54 = vpop.permute.xlu0 %972 }
  0xb7   : > { %1003 = vst.msk [vmem:[#allocation4] sm:$0xff] %vm1002_vm12, %v973_v54 }
  0xb8   : > { %v823_v52 = vpop.permute.xlu1 %822  ;;  %1326 = vrot.lane.b32.xlu0 %v3511_v34, %s3237_s21  ;;  %1054 = vst.msk [vmem:[#allocation4] sm:$0xff] %vm1053_vm13, %v1024_v59 }
  0xb9   : > { %852 = vst.msk [vmem:[#allocation4 + $0x8] sm:$0xff] %vm850_vm11, %v823_v52 }
  0xba   : > { %1004 = vst.msk [vmem:[#allocation4 + $0x8] sm:$0xff] %vm1002_vm12, %v975_v43  ;;  %1423 = vrot.lane.b32.xlu1 %v1103_v48, %s3243_s28  ;;  %v1115_v42 = vpop.permute.xlu0 %1114 }
  0xbb   : > { %1055 = vst.msk [vmem:[#allocation4 + $0x8] sm:$0xff] %vm1053_vm13, %v3761_v25 }
  0xbc   : > { %1146 = vst.msk [vmem:[#allocation4 + $0x8] sm:$0xff] %vm1144_vm14, %v1117_v47  ;;  %v833_v29 = vpop.permute.xlu1 %832  ;;  %1145 = vst.msk [vmem:[#allocation4] sm:$0xff] %vm1144_vm14, %v1115_v42  ;;  %1415 = vrot.lane.b32.xlu0 %v3665_v40, %s3243_s28 }
  0xbd   : > { %1297 = vst.msk [vmem:[#allocation4 + $0x8] sm:$0xff] %vm1295_vm15, %v1268_v53  ;;  %1296 = vst.msk [vmem:[#allocation4] sm:$0xff] %vm1295_vm15, %v1266_v58 }
  0xbe   : > { %857 = vst.msk [vmem:[#allocation4 + $0x30] sm:$0xff] %vm850_vm11, %v833_v29  ;;  %1425 = vrot.lane.b32.xlu1 %v1396_v44, %s3243_s28  ;;  %v825_v34 = vpop.permute.xlu0 %824 }
  0xbf   : > { %1348 = vst.msk [vmem:[#allocation4 + $0x8] sm:$0xff] %vm1346_vm1, %v3766_v30  ;;  %1347 = vst.msk [vmem:[#allocation4] sm:$0xff] %vm1346_vm1, %v3759_v4 }
  0xc0   : > { %1439 = vst.msk [vmem:[#allocation4 + $0x8] sm:$0xff] %vm1437_vm2, %v1410_v60  ;;  %1438 = vst.msk [vmem:[#allocation4] sm:$0xff] %vm1437_vm2, %v1408_v31  ;;  %v835_v38 = vpop.permute.xlu1 %834  ;;  %1417 = vrot.lane.b32.xlu0 %v3677_v50, %s3243_s28 }
  0xc1   : > { %853 = vst.msk [vmem:[#allocation4 + $0x10] sm:$0xff] %vm850_vm11, %v825_v34  ;;  %858 = vst.msk [vmem:[#allocation4 + $0x38] sm:$0xff] %vm850_vm11, %v835_v38 }
  0xc2   : > { %v827_v63 = vpop.permute.xlu0 %826 }
  0xc3   : > { %854 = vst.msk [vmem:[#allocation4 + $0x18] sm:$0xff] %vm850_vm11, %v827_v63 }
  0xc4   : > { %v985_v40 = vpop.permute.xlu1 %984 }
  0xc5   : > { %1009 = vst.msk [vmem:[#allocation4 + $0x30] sm:$0xff] %vm1002_vm12, %v985_v40 }
  0xc6   : > { %v977_v55 = vpop.permute.xlu0 %976 }
  0xc7   : > { %v1449_v45 = vld [vmem:[#allocation4 + $0x8] sm:$0xff]  ;;  %v1448_v19 = vld [vmem:[#allocation4] sm:$0xff]  ;;  %1005 = vst.msk [vmem:[#allocation4 + $0x10] sm:$0xff] %vm1002_vm12, %v977_v55 }
  0xc8   : > { %3061 = vmatprep.mubr.msk.bf16.mxu0 %vm1485_vm3, %v1448_v19  ;;  %v987_v6 = vpop.permute.xlu1 %986 }
  0xc9   : > { %3062 = vmatmul.mubr.msk.bf16.vlgmr.msra.gmra.mrb[0].mxu0 %vm1485_vm3, %v1449_v45  ;;  %1010 = vst.msk [vmem:[#allocation4 + $0x38] sm:$0xff] %vm1002_vm12, %v987_v6 }
  0xca   : > { %v979_v50 = vpop.permute.xlu0 %978 }
  0xcb   : > { %1006 = vst.msk [vmem:[#allocation4 + $0x18] sm:$0xff] %vm1002_vm12, %v979_v50 }
  0xcc   : > { %v1036_v21 = vpop.permute.xlu1 %1035 }
  0xcd   : > { %1060 = vst.msk [vmem:[#allocation4 + $0x30] sm:$0xff] %vm1053_vm13, %v1036_v21 }
  0xce   : > { %v1028_v9 = vpop.permute.xlu0 %1027 }
  0xcf   : > { %1056 = vst.msk [vmem:[#allocation4 + $0x10] sm:$0xff] %vm1053_vm13, %v1028_v9 }
  0xd0   : > { %v1038_v13 = vpop.permute.xlu1 %1037 }
  0xd1   : > { %1061 = vst.msk [vmem:[#allocation4 + $0x38] sm:$0xff] %vm1053_vm13, %v1038_v13 }
  0xd2   : > { %v1030_v41 = vpop.permute.xlu0 %1029 }
  0xd3   : > { %1057 = vst.msk [vmem:[#allocation4 + $0x18] sm:$0xff] %vm1053_vm13, %v1030_v41 }
  0xd4   : > { %v1127_v4 = vpop.permute.xlu1 %1126 }
  0xd5   : > { %1151 = vst.msk [vmem:[#allocation4 + $0x30] sm:$0xff] %vm1144_vm14, %v1127_v4 }
  0xd6   : > { %v1119_v25 = vpop.permute.xlu0 %1118 }
  0xd7   : > { %1147 = vst.msk [vmem:[#allocation4 + $0x10] sm:$0xff] %vm1144_vm14, %v1119_v25 }
  0xd8   : > { %v1129_v3 = vpop.permute.xlu1 %1128 }
  0xd9   : > { %1152 = vst.msk [vmem:[#allocation4 + $0x38] sm:$0xff] %vm1144_vm14, %v1129_v3 }
  0xda   : > { %v1121_v30 = vpop.permute.xlu0 %1120 }
  0xdb   : > { %1148 = vst.msk [vmem:[#allocation4 + $0x18] sm:$0xff] %vm1144_vm14, %v1121_v30 }
  0xdc   : > { %v1278_v49 = vpop.permute.xlu1 %1277 }
  0xdd   : > { %1302 = vst.msk [vmem:[#allocation4 + $0x30] sm:$0xff] %vm1295_vm15, %v1278_v49 }
  0xde   : > { %v1270_v62 = vpop.permute.xlu0 %1269 }
  0xdf   : > { %1298 = vst.msk [vmem:[#allocation4 + $0x10] sm:$0xff] %vm1295_vm15, %v1270_v62 }
  0xe0   : > { %v1280_v26 = vpop.permute.xlu1 %1279 }
  0xe1   : > { %1303 = vst.msk [vmem:[#allocation4 + $0x38] sm:$0xff] %vm1295_vm15, %v1280_v26 }
  0xe2   : > { %v1272_v35 = vpop.permute.xlu0 %1271 }
  0xe3   : > { %1299 = vst.msk [vmem:[#allocation4 + $0x18] sm:$0xff] %vm1295_vm15, %v1272_v35 }
  0xe4   : > { %v1329_v11 = vpop.permute.xlu1 %1328 }
  0xe5   : > { %1353 = vst.msk [vmem:[#allocation4 + $0x30] sm:$0xff] %vm1346_vm1, %v1329_v11 }
  0xe6   : > { %v1321_v46 = vpop.permute.xlu0 %1320 }
  0xe7   : > { %1349 = vst.msk [vmem:[#allocation4 + $0x10] sm:$0xff] %vm1346_vm1, %v1321_v46 }
  0xe8   : > { %v1331_v43 = vpop.permute.xlu1 %1330 }
  0xe9   : > { %1354 = vst.msk [vmem:[#allocation4 + $0x38] sm:$0xff] %vm1346_vm1, %v1331_v43  ;;  %v3904_v43 = vld [vmem:[%s4427_s6] ss:$0 sm:$0xff] }
  0xea   : > { %v1323_v48 = vpop.permute.xlu0 %1322 }
  0xeb   : > { %1350 = vst.msk [vmem:[#allocation4 + $0x18] sm:$0xff] %vm1346_vm1, %v1323_v48 }
  0xec   : > { %v1420_v15 = vpop.permute.xlu1 %1419 }
  0xed   : > { %1444 = vst.msk [vmem:[#allocation4 + $0x30] sm:$0xff] %vm1437_vm2, %v1420_v15 }
  0xee   : > { %v1412_v37 = vpop.permute.xlu0 %1411 }
  0xef   : > { %1440 = vst.msk [vmem:[#allocation4 + $0x10] sm:$0xff] %vm1437_vm2, %v1412_v37 }
  0xf0   : > { %v743_v20 = vpop.permute.xlu1 %742 }
  0xf1   : > { %765 = vst.msk [vmem:[#allocation4 + $0x40] sm:$0xff] %vm756_vm10, %v743_v20 }
  0xf2   : > { %v735_v47 = vpop.permute.xlu0 %734 }
  0xf3   : > { %761 = vst.msk [vmem:[#allocation4 + $0x20] sm:$0xff] %vm756_vm10, %v735_v47 }
  0xf4   : > { %v1422_v27 = vpop.permute.xlu1 %1421  ;;  %v1454_v56 = vld [vmem:[#allocation4 + $0x30] sm:$0xff] }
  0xf5   : > { %1445 = vst.msk [vmem:[#allocation4 + $0x38] sm:$0xff] %vm1437_vm2, %v1422_v27  ;;  %3073 = vmatprep.mubr.msk.bf16.mxu1 %vm1485_vm3, %v1454_v56 }
  0xf6   : > { %v1414_v53 = vpop.permute.xlu0 %1413  ;;  %v1450_v36 = vld [vmem:[#allocation4 + $0x10] sm:$0xff] }
  0xf7   : > { %1441 = vst.msk [vmem:[#allocation4 + $0x18] sm:$0xff] %vm1437_vm2, %v1414_v53  ;;  %3065 = vmatprep.mubr.msk.bf16.mxu0 %vm1485_vm3, %v1450_v36 }
  0xf8   : > { %v745_v59 = vpop.permute.xlu1 %744 }
  0xf9   : > { %766 = vst.msk [vmem:[#allocation4 + $0x48] sm:$0xff] %vm756_vm10, %v745_v59 }
  0xfa   : > { %v737_v60 = vpop.permute.xlu0 %736 }
  0xfb   : > { %762 = vst.msk [vmem:[#allocation4 + $0x28] sm:$0xff] %vm756_vm10, %v737_v60 }
  0xfc   : > { %v837_v58 = vpop.permute.xlu1 %836  ;;  %v1455_v57 = vld [vmem:[#allocation4 + $0x38] sm:$0xff] }
  0xfd   : > { %859 = vst.msk [vmem:[#allocation4 + $0x40] sm:$0xff] %vm850_vm11, %v837_v58  ;;  %3074 = vmatmul.mubr.msk.bf16.vlgmr.msra.gmra.mrb[0].mxu1 %vm1485_vm3, %v1455_v57 }
  0xfe   : > { %v829_v10 = vpop.permute.xlu0 %828  ;;  %v1451_v31 = vld [vmem:[#allocation4 + $0x18] sm:$0xff] }
  0xff   : > { %855 = vst.msk [vmem:[#allocation4 + $0x20] sm:$0xff] %vm850_vm11, %v829_v10  ;;  %3066 = vmatmul.mubr.msk.bf16.gmra.mrb[4].mxu0 %vm1485_vm3, %v1451_v31 }
 0x100   : > { %v839_v39 = vpop.permute.xlu1 %838 }
 0x101   : > { %860 = vst.msk [vmem:[#allocation4 + $0x48] sm:$0xff] %vm850_vm11, %v839_v39 }
 0x102   : > { %v831_v51 = vpop.permute.xlu0 %830 }
 0x103   : > { %856 = vst.msk [vmem:[#allocation4 + $0x28] sm:$0xff] %vm850_vm11, %v831_v51 }
 0x104   : > { %v989_v54 = vpop.permute.xlu1 %988 }
 0x105   : > { %1011 = vst.msk [vmem:[#allocation4 + $0x40] sm:$0xff] %vm1002_vm12, %v989_v54 }
 0x106   : > { %v981_v52 = vpop.permute.xlu0 %980 }
 0x107   : > { %1007 = vst.msk [vmem:[#allocation4 + $0x20] sm:$0xff] %vm1002_vm12, %v981_v52 }
 0x108   : > { %v991_v44 = vpop.permute.xlu1 %990 }
 0x109   : > { %1012 = vst.msk [vmem:[#allocation4 + $0x48] sm:$0xff] %vm1002_vm12, %v991_v44 }
 0x10a   : > { %v983_v42 = vpop.permute.xlu0 %982 }
 0x10b   : > { %1008 = vst.msk [vmem:[#allocation4 + $0x28] sm:$0xff] %vm1002_vm12, %v983_v42 }
 0x10c   : > { %v1040_v29 = vpop.permute.xlu1 %1039 }
 0x10d   : > { %1062 = vst.msk [vmem:[#allocation4 + $0x40] sm:$0xff] %vm1053_vm13, %v1040_v29 }
 0x10e   : > { %v1032_v34 = vpop.permute.xlu0 %1031 }
 0x10f   : > { %1058 = vst.msk [vmem:[#allocation4 + $0x20] sm:$0xff] %vm1053_vm13, %v1032_v34 }
 0x110   : > { %v1042_v38 = vpop.permute.xlu1 %1041 }
 0x111   : > { %1063 = vst.msk [vmem:[#allocation4 + $0x48] sm:$0xff] %vm1053_vm13, %v1042_v38 }
 0x112   : > { %v1034_v63 = vpop.permute.xlu0 %1033 }
 0x113   : > { %1059 = vst.msk [vmem:[#allocation4 + $0x28] sm:$0xff] %vm1053_vm13, %v1034_v63 }
 0x114   : > { %v1131_v40 = vpop.permute.xlu1 %1130 }
 0x115   : > { %1153 = vst.msk [vmem:[#allocation4 + $0x40] sm:$0xff] %vm1144_vm14, %v1131_v40 }
 0x116   : > { %v1123_v45 = vpop.permute.xlu0 %1122 }
 0x117   : > { %1149 = vst.msk [vmem:[#allocation4 + $0x20] sm:$0xff] %vm1144_vm14, %v1123_v45 }
 0x118   : > { %v1133_v19 = vpop.permute.xlu1 %1132 }
 0x119   : > { %1154 = vst.msk [vmem:[#allocation4 + $0x48] sm:$0xff] %vm1144_vm14, %v1133_v19 }
 0x11a   : > { %v1125_v55 = vpop.permute.xlu0 %1124 }
 0x11b   : > { %1150 = vst.msk [vmem:[#allocation4 + $0x28] sm:$0xff] %vm1144_vm14, %v1125_v55 }
 0x11c   : > { %v1282_v6 = vpop.permute.xlu1 %1281 }
 0x11d   : > { %1304 = vst.msk [vmem:[#allocation4 + $0x40] sm:$0xff] %vm1295_vm15, %v1282_v6 }
 0x11e   : > { %v1274_v50 = vpop.permute.xlu0 %1273 }
 0x11f   : > { %1300 = vst.msk [vmem:[#allocation4 + $0x20] sm:$0xff] %vm1295_vm15, %v1274_v50 }
 0x120   : > { %v1284_v21 = vpop.permute.xlu1 %1283 }
 0x121   : > { %1305 = vst.msk [vmem:[#allocation4 + $0x48] sm:$0xff] %vm1295_vm15, %v1284_v21 }
 0x122   : > { %v1276_v9 = vpop.permute.xlu0 %1275 }
 0x123   : > { %1301 = vst.msk [vmem:[#allocation4 + $0x28] sm:$0xff] %vm1295_vm15, %v1276_v9 }
 0x124   : > { %v1333_v13 = vpop.permute.xlu1 %1332 }
 0x125   : > { %1355 = vst.msk [vmem:[#allocation4 + $0x40] sm:$0xff] %vm1346_vm1, %v1333_v13 }
 0x126   : > { %v1325_v41 = vpop.permute.xlu0 %1324 }
 0x127   : > { %1351 = vst.msk [vmem:[#allocation4 + $0x20] sm:$0xff] %vm1346_vm1, %v1325_v41 }
 0x128   : > { %v1335_v4 = vpop.permute.xlu1 %1334 }
 0x129   : > { %1356 = vst.msk [vmem:[#allocation4 + $0x48] sm:$0xff] %vm1346_vm1, %v1335_v4 }
 0x12a   : > { %v1327_v25 = vpop.permute.xlu0 %1326 }
 0x12b   : > { %1352 = vst.msk [vmem:[#allocation4 + $0x28] sm:$0xff] %vm1346_vm1, %v1327_v25 }
 0x12c   : > { %v1424_v3 = vpop.permute.xlu1 %1423 }
 0x12d   : > { %1446 = vst.msk [vmem:[#allocation4 + $0x40] sm:$0xff] %vm1437_vm2, %v1424_v3 }
 0x12e   : > { %v1416_v30 = vpop.permute.xlu0 %1415 }
 0x12f   : > { %1442 = vst.msk [vmem:[#allocation4 + $0x20] sm:$0xff] %vm1437_vm2, %v1416_v30 }
 0x130   : > { %v1426_v49 = vpop.permute.xlu1 %1425 }
 0x131   : > { %1447 = vst.msk [vmem:[#allocation4 + $0x48] sm:$0xff] %vm1437_vm2, %v1426_v49 }
 0x132   : > { %v1418_v62 = vpop.permute.xlu0 %1417 }
 0x133   : > { %1443 = vst.msk [vmem:[#allocation4 + $0x28] sm:$0xff] %vm1437_vm2, %v1418_v62 }
 0x134   : > { %v1456_v26 = vld [vmem:[#allocation4 + $0x40] sm:$0xff] }
 0x135   : > { %3077 = vmatprep.mubr.msk.bf16.mxu1 %vm1485_vm3, %v1456_v26 }
 0x136   : > { %v1452_v35 = vld [vmem:[#allocation4 + $0x20] sm:$0xff] }
 0x137   : > { %3069 = vmatprep.mubr.msk.bf16.mxu0 %vm1485_vm3, %v1452_v35 }
 0x138   : > { %v1457_v11 = vld [vmem:[#allocation4 + $0x48] sm:$0xff] }
 0x139   : > { %3078 = vmatmul.mubr.msk.bf16.gmra.mrb[4].mxu1 %vm1485_vm3, %v1457_v11 }
 0x13a   : > { %v1453_v46 = vld [vmem:[#allocation4 + $0x28] sm:$0xff] }
 0x13b   : > { %3070 = vmatmul.mubr.msk.bf16.gmra.mrb[8].mxu0 %vm1485_vm3, %v1453_v46 }
 0x19c   : > { %v3063_v48 = vpop.f32.mrb[0].mxu0 }
 0x19d   : > { %v1563_v15 = vadd.f32 %v3063_v48, %v3904_v43  ;;  %v1554_v37 = vpop.f32.mrb[1].mxu0 }
 0x19e   : > { %v1555_v20 = vadd.f32 %v3904_v43, %v1554_v37  ;;  %v3064_v47 = vpop.f32.mrb[2].mxu0 }
 0x19f   : > { %v1566_v27 = vadd.f32 %v3064_v47, %v3904_v43  ;;  %v1557_v56 = vpop.f32.mrb[3].mxu0  ;;  %v1635_v36 = vmax.f32 %v1563_v15, 0.0 }
 0x1a0   : > { %v1558_v53 = vadd.f32 %v3904_v43, %v1557_v56  ;;  %v1633_v60 = vmax.f32 %v1555_v20, 0.0 }
 0x1a1   : > { %v1636_v59 = vmax.f32 %v1566_v27, 0.0 }
 0x1a2   : > { %v1634_v58 = vmax.f32 %v1558_v53, 0.0 }
 0x1a3   : > { %v1654_v57 = vpack.c.bf16 %v1636_v59, %v1635_v36 }
 0x1a4   : > { %v1653_v10 = vpack.c.bf16 %v1634_v58, %v1633_v60 }
 0x1a5   : > { %1665 = vst.msk [vmem:[#allocation3 + $0x8] sm:$0xff] %vm1663_vm5, %v1654_v57 }
 0x1a6   : > { %1664 = vst.msk [vmem:[#allocation3] sm:$0xff] %vm1663_vm5, %v1653_v10 }
 0x1d0   : > { %v3075_v31 = vpop.f32.mrb[0].mxu1 }
 0x1d1   : > { %v1611_v39 = vadd.f32 %v3075_v31, %v3904_v43  ;;  %v1602_v51 = vpop.f32.mrb[1].mxu1 }
 0x1d2   : > { %v1603_v54 = vadd.f32 %v3904_v43, %v1602_v51  ;;  %v3076_v52 = vpop.f32.mrb[2].mxu1  ;;  %v3067_v29 = vpop.f32.mrb[4].mxu0 }
 0x1d3   : > { %v1614_v44 = vadd.f32 %v3076_v52, %v3904_v43  ;;  %v1605_v42 = vpop.f32.mrb[3].mxu1  ;;  %v1579_v38 = vadd.f32 %v3067_v29, %v3904_v43  ;;  %v1647_v63 = vmax.f32 %v1611_v39, 0.0  ;;  %v1570_v40 = vpop.f32.mrb[5].mxu0 }
 0x1d4   : > { %v1606_v34 = vadd.f32 %v3904_v43, %v1605_v42  ;;  %v1571_v19 = vadd.f32 %v3904_v43, %v1570_v40  ;;  %v1645_v55 = vmax.f32 %v1603_v54, 0.0  ;;  %v3068_v6 = vpop.f32.mrb[6].mxu0  ;;  %v3245_v40 = vmov (!%p2987_p13), 0  }
 0x1d5   : > { %v1648_v45 = vmax.f32 %v1614_v44, 0.0  ;;  %v1582_v21 = vadd.f32 %v3068_v6, %v3904_v43  ;;  %v1573_v13 = vpop.f32.mrb[7].mxu0  ;;  %v1639_v25 = vmax.f32 %v1579_v38, 0.0  ;;  %1677 = vst.msk [vmem:[#allocation3] sm:$0xff] (!%p2987_p13), %vm1663_vm5, %v3245_v40 }
 0x1d6   : > { %v1646_v50 = vmax.f32 %v1606_v34, 0.0  ;;  %v1574_v41 = vadd.f32 %v3904_v43, %v1573_v13  ;;  %v1637_v30 = vmax.f32 %v1571_v19, 0.0 }
 0x1d7   : > { %v1660_v9 = vpack.c.bf16 %v1648_v45, %v1647_v63  ;;  %v1640_v3 = vmax.f32 %v1582_v21, 0.0 }
 0x1d8   : > { %v1659_v4 = vpack.c.bf16 %v1646_v50, %v1645_v55  ;;  %v1638_v49 = vmax.f32 %v1574_v41, 0.0 }
 0x1d9   : > { %1671 = vst.msk [vmem:[#allocation3 + $0x38] sm:$0xff] %vm1663_vm5, %v1660_v9  ;;  %v1656_v62 = vpack.c.bf16 %v1640_v3, %v1639_v25 }
 0x1da   : > { %1670 = vst.msk [vmem:[#allocation3 + $0x30] sm:$0xff] %vm1663_vm5, %v1659_v4  ;;  %v1655_v26 = vpack.c.bf16 %v1638_v49, %v1637_v30 }
 0x1db   : > { %1667 = vst.msk [vmem:[#allocation3 + $0x18] sm:$0xff] %vm1663_vm5, %v1656_v62 }
 0x1dc   : > { %1666 = vst.msk [vmem:[#allocation3 + $0x10] sm:$0xff] %vm1663_vm5, %v1655_v26 }
 0x20c   : > { %v3079_v35 = vpop.f32.mrb[4].mxu1 }
 0x20d   : > { %v1627_v11 = vadd.f32 %v3079_v35, %v3904_v43  ;;  %v1618_v46 = vpop.f32.mrb[5].mxu1 }
 0x20e   : > { %v1619_v48 = vadd.f32 %v3904_v43, %v1618_v46  ;;  %v3080_v15 = vpop.f32.mrb[6].mxu1  ;;  %v3071_v47 = vpop.f32.mrb[8].mxu0 }
 0x20f   : > { %v1630_v37 = vadd.f32 %v3080_v15, %v3904_v43  ;;  %v1621_v20 = vpop.f32.mrb[7].mxu1  ;;  %v1595_v56 = vadd.f32 %v3071_v47, %v3904_v43  ;;  %v1651_v53 = vmax.f32 %v1627_v11, 0.0  ;;  %v1586_v36 = vpop.f32.mrb[9].mxu0 }
 0x210   : > { %v1622_v27 = vadd.f32 %v3904_v43, %v1621_v20  ;;  %v1587_v60 = vadd.f32 %v3904_v43, %v1586_v36  ;;  %v1649_v58 = vmax.f32 %v1619_v48, 0.0  ;;  %v3072_v57 = vpop.f32.mrb[10].mxu0 }
 0x211   : > { %v1652_v59 = vmax.f32 %v1630_v37, 0.0  ;;  %v1598_v31 = vadd.f32 %v3072_v57, %v3904_v43  ;;  %v1589_v51 = vpop.f32.mrb[11].mxu0  ;;  %v1643_v44 = vmax.f32 %v1595_v56, 0.0 }
 0x212   : > { %v1650_v10 = vmax.f32 %v1622_v27, 0.0  ;;  %v1590_v54 = vadd.f32 %v3904_v43, %v1589_v51  ;;  %v1641_v29 = vmax.f32 %v1587_v60, 0.0  ;;  %1676 = sbr.rel (%p2987_p13) target bundleno = 537 (0x219), region = 60 }
 0x213   : > { %v1662_v39 = vpack.c.bf16 %v1652_v59, %v1651_v53  ;;  %v1644_v42 = vmax.f32 %v1598_v31, 0.0 }
 0x214   : > { %v1661_v52 = vpack.c.bf16 %v1650_v10, %v1649_v58  ;;  %v1642_v34 = vmax.f32 %v1590_v54, 0.0 }
 0x215   : > { %1673 = vst.msk [vmem:[#allocation3 + $0x48] sm:$0xff] %vm1663_vm5, %v1662_v39  ;;  %v1658_v38 = vpack.c.bf16 %v1644_v42, %v1643_v44 }
 0x216   : > { %1672 = vst.msk [vmem:[#allocation3 + $0x40] sm:$0xff] %vm1663_vm5, %v1661_v52  ;;  %v1657_v63 = vpack.c.bf16 %v1642_v34, %v1641_v29 }
 0x217   : > { %1669 = vst.msk [vmem:[#allocation3 + $0x28] sm:$0xff] %vm1663_vm5, %v1658_v38 }
 0x218   : > { %1668 = vst.msk [vmem:[#allocation3 + $0x20] sm:$0xff] %vm1663_vm5, %v1657_v63 }
 0x219 PF: > { %p2988_p0 = scmp.ne.s32.totalorder %s3219_s30, 1 }
 0x21a   : > { %v3246_v43 = vmov (!%p2988_p0), 0  }
 0x21b   : > { %1680 = sbr.rel (%p2988_p0) target bundleno = 546 (0x222), region = 64  ;;  %1682 = vst.msk [vmem:[#allocation3 + $0x48] sm:$0xff] (!%p2988_p0), %vm1663_vm5, %v3246_v43 }
 0x222 PF: > { %v3940_v45 = vld [vmem:[#allocation3] sm:$0xff]  ;;  %v3942_v19 = vld [vmem:[#allocation3 + $0x8] sm:$0xff]  ;;  %v3944_v55 = vld [vmem:[#allocation3 + $0x10] sm:$0xff]  ;;  %v2534_v6 = vpack.c.bf16 %v3352_v1, %v3349_v0  ;;  %v2535_v48 = vpack.c.bf16 %v3367_v8, %v3364_v7  ;;  %v2536_v60 = vpack.c.bf16 %v3383_v17, %v3380_v16  ;;  %s3247_s24 = smov 40   ;;  %s3248_s18 = smov 48   ;;  %vm2433_vm6 = vcmask 1043456  }
 0x223   : > { %1779 = vrot.lane.b32.xlu0 %v3940_v45, %s3244_s23  ;;  %v1695_v50 = vshll.u32 %v3940_v45, 16  ;;  %v1702_v21 = vshll.u32 %v3942_v19, 16  ;;  %v1692_v9 = vshrl.u32 %v3940_v45, 16  ;;  %v1895_v13 = vshrl.u32 %v3942_v19, 16  ;;  %v3954_v41 = vld [vmem:[#allocation3 + $0x18] sm:$0xff]  ;;  %v3973_v15 = vld [vmem:[#allocation3 + $0x20] sm:$0xff] }
 0x224   : > { %v1902_v4 = vshrl.u32 %v3944_v55, 16  ;;  %v1905_v25 = vshll.u32 %v3944_v55, 16  ;;  %v2138_v3 = vshrl.u32 %v3954_v41, 16  ;;  %v2141_v30 = vshll.u32 %v3954_v41, 16  ;;  %3109 = vmatprep.mubr.msk.bf16.mxu0 %vm562_vm0, %v2534_v6  ;;  %v2542_v35 = vld [vmem:[%s4424_s3] sm:$0x3] }
 0x225   : > { %v1812_v49 = vrot.slane %v1695_v50, 1  ;;  %v1897_v62 = vrot.slane %v1895_v13, 7  ;;  %v1814_v26 = vrot.slane %v1702_v21, 1  ;;  %3134 = vmatprep.subr.msk.bf16.mxu0 %vm1516_vm9, %v2542_v35  ;;  %v2575_v27 = vsel %vm1516_vm9, %v2542_v35, 0  ;;  %v3978_v56 = vld [vmem:[#allocation3 + $0x28] sm:$0xff]  ;;  %v3980_v53 = vld [vmem:[#allocation3 + $0x30] sm:$0xff] }
 0x226   : > { %v1904_v11 = vrot.slane %v1902_v4, 7  ;;  %v2140_v46 = vrot.slane %v2138_v3, 7  ;;  %3108 = vmatpush3.bf16.msra.mxu0 %v2575_v27  ;;  %v1916_v10 = vshrl.u32 %v3973_v15, 16  ;;  %v3991_v31 = vld [vmem:[#allocation3 + $0x38] sm:$0xff]  ;;  %v1919_v44 = vshll.u32 %v3973_v15, 16  ;;  %v3192_v34 = vld [vmem:[%s4428_s7] sm:$0xff]  }
 0x227   : > { %1781 = vrot.lane.b32.xlu0 %v3942_v19, %s3244_s23  ;;  %v1813_v37 = vor.u32 %v1812_v49, %v1692_v9  ;;  %v1900_v20 = vor.u32 %v1897_v62, %v1702_v21  ;;  %v1815_v47 = vor.u32 %v1895_v13, %v1814_v26  ;;  %v2152_v42 = vshrl.u32 %v3978_v56, 16  ;;  %3081 = vmatprep.subr.bf16.mxu1 %v3192_v34  ;;  %v3195_v45 = vld [vmem:[%s4428_s7 + $0x18] sm:$0xff]   ;;  %s3249_s29 = smov 56   ;;  %s3250_s20 = smov 64  }
 0x228   : > { %v1907_v36 = vor.u32 %v1905_v25, %v1904_v11  ;;  %v2143_v59 = vor.u32 %v2141_v30, %v2140_v46  ;;  %v1918_v52 = vrot.slane %v1916_v10, 7  ;;  %v2155_v29 = vshll.u32 %v3978_v56, 16  ;;  %3082 = vmatpush3.bf16.msra.mxu1 %v3192_v34 }
 0x229   : > { %v1836_v58 = vsel %vm3491_vm7, %v1813_v37, 0  ;;  %v1958_v57 = vsel %vm3468_vm4, 0, %v1900_v20  ;;  %v1837_v39 = vsel %vm3491_vm7, %v1815_v47, 0  ;;  %3110 = vmatmul.mubr.msk.bf16.vlgmr.msra.gmra.mrb[12].mxu0 %vm562_vm0, %v2535_v48  ;;  %v1930_v38 = vshrl.u32 %v3980_v53, 16  ;;  %v3193_v20 = vld [vmem:[%s4428_s7 + $0x8] sm:$0xff]  }
 0x22a   : > { %1852 = vrot.lane.b32.xlu1 %v1836_v58, %s3238_s22  ;;  %v1959_v51 = vsel %vm3468_vm4, 0, %v1907_v36  ;;  %v4000_v54 = vsel %vm3468_vm4, 0, %v2143_v59  ;;  %1764 = vst.msk [vmem:[#allocation4 + $0x8] sm:$0xff] %vm1663_vm5, %v1958_v57  ;;  %3113 = vmatprep.mubr.msk.bf16.mxu0 %vm562_vm0, %v2536_v60  ;;  %v1933_v63 = vshll.u32 %v3980_v53, 16  ;;  %v2166_v40 = vshrl.u32 %v3991_v31, 16 }
 0x22b   : > { %1974 = vrot.lane.b32.xlu0 %v1958_v57, %s3242_s25  ;;  %1765 = vst.msk [vmem:[#allocation4 + $0x10] sm:$0xff] %vm1663_vm5, %v1959_v51  ;;  %1766 = vst.msk [vmem:[#allocation4 + $0x18] sm:$0xff] %vm1663_vm5, %v4000_v54  ;;  %v2169_v43 = vshll.u32 %v3991_v31, 16  ;;  %v1921_v6 = vor.u32 %v1919_v44, %v1918_v52  ;;  %v2154_v21 = vrot.slane %v2152_v42, 7  ;;  %v2537_v13 = vpack.c.bf16 %v3406_v28, %v3396_v24  ;;  %v3194_v57 = vld [vmem:[%s4428_s7 + $0x10] sm:$0xff]  }
 0x22c   : > { %v1932_v49 = vrot.slane %v1930_v38, 7  ;;  %v2058_v62 = vrot.slane %v1933_v63, 1  ;;  %v2168_v26 = vrot.slane %v2166_v40, 7  ;;  %v1694_v11 = vrot.slane %v1692_v9, 7  ;;  %3083 = vmatprep.subr.bf16.mxu1 %v3193_v20 }
 0x22d   : > { %v2294_v35 = vrot.slane %v2169_v43, 1  ;;  %v2050_v46 = vrot.slane %v1905_v25, 1  ;;  %v4032_v48 = vsel %vm3468_vm4, 0, %v1921_v6  ;;  %v2157_v37 = vor.u32 %v2155_v29, %v2154_v21  ;;  %3084 = vmatpush3.bf16.msra.mxu1 %v3193_v20 }
 0x22e   : > { %1854 = vrot.lane.b32.xlu1 %v1837_v39, %s3238_s22  ;;  %v1935_v47 = vor.u32 %v1933_v63, %v1932_v49  ;;  %v4039_v27 = vor.u32 %v2058_v62, %v1930_v38  ;;  %v2171_v36 = vor.u32 %v2169_v43, %v2168_v26  ;;  %1767 = vst.msk [vmem:[#allocation4 + $0x20] sm:$0xff] %vm1663_vm5, %v4032_v48  ;;  %v2129_v49 = vld [vmem:[#allocation3 + $0x48] sm:$0xff]  ;;  %vm1803_vm8 = vcmask 130112  }
 0x22f   : > { %2015 = vrot.lane.b32.xlu0 %v3942_v19, %s3243_s28  ;;  %v4041_v9 = vor.u32 %v2294_v35, %v2166_v40  ;;  %v4047_v19 = vsel %vm3468_vm4, 0, %v2157_v37  ;;  %v2538_v25 = vpack.c.bf16 %v3360_v5, %v3355_v2  ;;  %v2051_v58 = vor.u32 %v2050_v46, %v1902_v4  ;;  %3085 = vmatprep.subr.bf16.mxu1 %v3194_v57 }
 0x230   : > { %v4054_v59 = vsel %vm3468_vm4, 0, %v1935_v47  ;;  %v4058_v60 = vsel %vm3468_vm4, 0, %v2171_v36  ;;  %1768 = vst.msk [vmem:[#allocation4 + $0x28] sm:$0xff] %vm1663_vm5, %v4047_v19  ;;  %v2539_v34 = vpack.c.bf16 %v3376_v14, %v3373_v12  ;;  %v2540_v38 = vpack.c.bf16 %v3393_v23, %v3390_v22 }
 0x231   : > { %3114 = vmatmul.mubr.msk.bf16.gmra.mrb[16].mxu0 %vm562_vm0, %v2537_v13  ;;  %1769 = vst.msk [vmem:[#allocation4 + $0x30] sm:$0xff] %vm1663_vm5, %v4054_v59  ;;  %1770 = vst.msk [vmem:[#allocation4 + $0x38] sm:$0xff] %vm1663_vm5, %v4058_v60  ;;  %3086 = vmatpush3.bf16.msra.mxu1 %v3194_v57  ;;  %v2073_v52 = vsel %vm3491_vm7, %v2051_v58, 0  ;;  %v2541_v40 = vpack.c.bf16 %v3418_v33, %v3415_v32  ;;  %v2180_v26 = vshrl.u32 %v2129_v49, 16  ;;  %v2183_v46 = vshll.u32 %v2129_v49, 16 }
 0x232   : > { %1976 = vrot.lane.b32.xlu1 %v1959_v51, %s3242_s25  ;;  %3117 = vmatprep.mubr.msk.bf16.mxu0 %vm562_vm0, %v2538_v25  ;;  %vm1876_vm9 = vcmask 195712   ;;  %vm1998_vm10 = vcmask 261312   ;;  %vm2039_vm11 = vcmask 326912   ;;  %vm2234_vm12 = vcmask 458112  }
 0x233   : > { %2088 = vrot.lane.b32.xlu0 %v1837_v39, %s3247_s24  ;;  %v1697_v39 = vor.u32 %v1695_v50, %v1694_v11  ;;  %v2286_v50 = vrot.slane %v2141_v30, 1  ;;  %3087 = vmatprep.subr.bf16.mxu1 %v3195_v45  ;;  %v2182_v11 = vrot.slane %v2180_v26, 7  ;;  %vm2275_vm13 = vcmask 523712  }
 0x234   : > { %vm2408_vm14 = vcmask 588800  }
 0x235   : > { %v1755_v4 = vsel %vm3468_vm4, 0, %v1697_v39  ;;  %3088 = vmatpush3.bf16.msra.mxu1 %v3195_v45  ;;  %v2287_v30 = vor.u32 %v2286_v50, %v2138_v3  ;;  %v2054_v3 = vrot.slane %v1919_v44, 1 }
 0x236   : > { %2017 = vrot.lane.b32.xlu1 %v3944_v55, %s3243_s28  ;;  %1763 = vst.msk [vmem:[#allocation4] sm:$0xff] %vm1663_vm5, %v1755_v4 }
 0x237   : > { %2210 = vrot.lane.b32.xlu0 %v1959_v51, %s3248_s18  ;;  %v3196_v51 = vld [vmem:[%s4428_s7 + $0x20] ss:$0 sps:$4 sm:$0xff]   ;;  %v2309_v43 = vsel %vm3491_vm7, %v2287_v30, 0 }
 0x238   : > { %3133 = vmatprep.subr.msk.bf16.mxu1 %vm2433_vm6, %v3196_v51  ;;  %v2435_v63 = vsel %vm2433_vm6, %v3196_v51, 0 }
 0x239   : > { %3118 = vmatmul.mubr.msk.bf16.gmra.mrb[20].mxu0 %vm562_vm0, %v2539_v34  ;;  %3090 = vmatpush3.bf16.msra.mxu1 %v2435_v63 }
 0x23a   : > { %2090 = vrot.lane.b32.xlu1 %v2073_v52, %s3247_s24  ;;  %3121 = vmatprep.mubr.msk.bf16.mxu0 %vm562_vm0, %v2540_v38 }
 0x23b   : > { %2251 = vrot.lane.b32.xlu0 %v3944_v55, %s3249_s29 }
 0x23e   : > { %2212 = vrot.lane.b32.xlu1 %v4000_v54, %s3248_s18 }
 0x23f   : > { %2324 = vrot.lane.b32.xlu0 %v2073_v52, %s3250_s20 }
 0x241   : > { %3122 = vmatmul.mubr.msk.bf16.gmra.mrb[24].mxu0 %vm562_vm0, %v2541_v40 }
 0x242   : > { %2253 = vrot.lane.b32.xlu1 %v3954_v41, %s3249_s29 }
 0x243   : > { %2326 = vrot.lane.b32.xlu0 %v2309_v43, %s3250_s20 }
 0x246   : > { %1783 = vrot.lane.b32.xlu1 %v3944_v55, %s3244_s23  ;;  %v2055_v55 = vor.u32 %v2054_v3, %v1916_v10 }
 0x247   : > { %1856 = vrot.lane.b32.xlu0 %v2073_v52, %s3238_s22 }
 0x24a   : > { %1785 = vrot.lane.b32.xlu1 %v3954_v41, %s3244_s23 }
 0x24b   : > { %1978 = vrot.lane.b32.xlu0 %v4000_v54, %s3242_s25  ;;  %v2290_v54 = vrot.slane %v2155_v29, 1 }
 0x24d   : > { %v2291_v10 = vor.u32 %v2290_v54, %v2152_v42  ;;  %v1893_v42 = vld [vmem:[#allocation3 + $0x40] sm:$0xff] }
 0x24e   : > { %1858 = vrot.lane.b32.xlu1 %v2309_v43, %s3238_s22  ;;  %v1944_v29 = vshrl.u32 %v1893_v42, 16  ;;  %v1947_v21 = vshll.u32 %v1893_v42, 16 }
 0x24f   : > { %2019 = vrot.lane.b32.xlu0 %v3954_v41, %s3243_s28  ;;  %v2075_v41 = vsel %vm3491_vm7, %v2055_v55, 0  ;;  %v2311_v44 = vsel %vm3491_vm7, %v2291_v10, 0 }
 0x250   : > { %v1946_v6 = vrot.slane %v1944_v29, 7 }
 0x252   : > { %1980 = vrot.lane.b32.xlu1 %v4032_v48, %s3242_s25  ;;  %v1949_v13 = vor.u32 %v1947_v21, %v1946_v6 }
 0x253   : > { %2092 = vrot.lane.b32.xlu0 %v2309_v43, %s3247_s24 }
 0x254   : > { %v1965_v62 = vsel %vm3468_vm4, 0, %v1949_v13 }
 0x256   : > { %2021 = vrot.lane.b32.xlu1 %v3973_v15, %s3243_s28 }
 0x257   : > { %2214 = vrot.lane.b32.xlu0 %v4032_v48, %s3248_s18 }
 0x25a   : > { %2094 = vrot.lane.b32.xlu1 %v2075_v41, %s3247_s24 }
 0x25b   : > { %2255 = vrot.lane.b32.xlu0 %v3973_v15, %s3249_s29 }
 0x25e   : > { %2216 = vrot.lane.b32.xlu1 %v4047_v19, %s3248_s18 }
 0x25f   : > { %2328 = vrot.lane.b32.xlu0 %v2075_v41, %s3250_s20 }
 0x262   : > { %2257 = vrot.lane.b32.xlu1 %v3978_v56, %s3249_s29 }
 0x263   : > { %2330 = vrot.lane.b32.xlu0 %v2311_v44, %s3250_s20 }
 0x266   : > { %1787 = vrot.lane.b32.xlu1 %v3973_v15, %s3244_s23  ;;  %v2077_v15 = vsel %vm3491_vm7, %v4039_v27, 0  ;;  %v2298_v27 = vrot.slane %v2183_v46, 1 }
 0x267   : > { %1860 = vrot.lane.b32.xlu0 %v2075_v41, %s3238_s22 }
 0x26a   : > { %1789 = vrot.lane.b32.xlu1 %v3978_v56, %s3244_s23 }
 0x26b   : > { %1982 = vrot.lane.b32.xlu0 %v4047_v19, %s3242_s25  ;;  %v2299_v19 = vor.u32 %v2298_v27, %v2180_v26 }
 0x26e   : > { %1862 = vrot.lane.b32.xlu1 %v2311_v44, %s3238_s22 }
 0x26f   : > { %2023 = vrot.lane.b32.xlu0 %v3978_v56, %s3243_s28  ;;  %v2313_v56 = vsel %vm3491_vm7, %v4041_v9, 0 }
 0x272   : > { %1984 = vrot.lane.b32.xlu1 %v4054_v59, %s3242_s25 }
 0x273   : > { %2096 = vrot.lane.b32.xlu0 %v2311_v44, %s3247_s24 }
 0x276   : > { %2025 = vrot.lane.b32.xlu1 %v3980_v53, %s3243_s28 }
 0x277   : > { %2218 = vrot.lane.b32.xlu0 %v4054_v59, %s3248_s18  ;;  %v2315_v59 = vsel %vm3491_vm7, %v2299_v19, 0 }
 0x27a   : > { %2098 = vrot.lane.b32.xlu1 %v2077_v15, %s3247_s24 }
 0x27b   : > { %2259 = vrot.lane.b32.xlu0 %v3980_v53, %s3249_s29 }
 0x27e   : > { %2220 = vrot.lane.b32.xlu1 %v4058_v60, %s3248_s18 }
 0x27f   : > { %2332 = vrot.lane.b32.xlu0 %v2077_v15, %s3250_s20 }
 0x282   : > { %2261 = vrot.lane.b32.xlu1 %v3991_v31, %s3249_s29 }
 0x283   : > { %2334 = vrot.lane.b32.xlu0 %v2313_v56, %s3250_s20 }
 0x286   : > { %1791 = vrot.lane.b32.xlu1 %v3980_v53, %s3244_s23  ;;  %v2062_v53 = vrot.slane %v1947_v21, 1 }
 0x287   : > { %1864 = vrot.lane.b32.xlu0 %v2077_v15, %s3238_s22 }
 0x288   : > { %v2063_v35 = vor.u32 %v2062_v53, %v1944_v29 }
 0x28a   : > { %1793 = vrot.lane.b32.xlu1 %v3991_v31, %s3244_s23  ;;  %v2079_v37 = vsel %vm3491_vm7, %v2063_v35, 0  ;;  %vm2348_vm7 = vcmask 589312  }
 0x28b   : > { %1986 = vrot.lane.b32.xlu0 %v4058_v60, %s3242_s25 }
 0x28e   : > { %1866 = vrot.lane.b32.xlu1 %v2313_v56, %s3238_s22 }
 0x28f   : > { %2027 = vrot.lane.b32.xlu0 %v3991_v31, %s3243_s28  ;;  %v2185_v31 = vor.u32 %v2183_v46, %v2182_v11 }
 0x291   : > { %v2201_v47 = vsel %vm3468_vm4, 0, %v2185_v31  ;;  %vm2112_vm4 = vcmask 392512  }
 0x292   : > { %1988 = vrot.lane.b32.xlu1 %v1965_v62, %s3242_s25 }
 0x293   : > { %2100 = vrot.lane.b32.xlu0 %v2313_v56, %s3247_s24 }
 0x295   : > { %v1780_v48 = vpop.permute.xlu0 %1779 }
 0x296   : > { %2029 = vrot.lane.b32.xlu1 %v1893_v42, %s3243_s28  ;;  %1804 = vst.msk [vmem:[#allocation4] sm:$0xff] %vm1803_vm8, %v1780_v48 }
 0x297   : > { %2222 = vrot.lane.b32.xlu0 %v1965_v62, %s3248_s18 }
 0x299   : > { %v1782_v20 = vpop.permute.xlu0 %1781 }
 0x29a   : > { %2102 = vrot.lane.b32.xlu1 %v2079_v37, %s3247_s24  ;;  %1805 = vst.msk [vmem:[#allocation4 + $0x8] sm:$0xff] %vm1803_vm8, %v1782_v20 }
 0x29b   : > { %2263 = vrot.lane.b32.xlu0 %v1893_v42, %s3249_s29 }
 0x29c   : > { %v1853_v36 = vpop.permute.xlu1 %1852 }
 0x29d   : > { %1877 = vst.msk [vmem:[#allocation4] sm:$0xff] %vm1876_vm9, %v1853_v36  ;;  %v1975_v9 = vpop.permute.xlu0 %1974 }
 0x29e   : > { %2224 = vrot.lane.b32.xlu1 %v2201_v47, %s3248_s18  ;;  %1999 = vst.msk [vmem:[#allocation4] sm:$0xff] %vm1998_vm10, %v1975_v9 }
 0x29f   : > { %2336 = vrot.lane.b32.xlu0 %v2079_v37, %s3250_s20 }
 0x2a0   : > { %v1855_v25 = vpop.permute.xlu1 %1854 }
 0x2a1   : > { %1878 = vst.msk [vmem:[#allocation4 + $0x8] sm:$0xff] %vm1876_vm9, %v1855_v25  ;;  %v2016_v61 = vpop.permute.xlu0 %2015 }
 0x2a2   : > { %2265 = vrot.lane.b32.xlu1 %v2129_v49, %s3249_s29  ;;  %2040 = vst.msk [vmem:[#allocation4] sm:$0xff] %vm2039_vm11, %v2016_v61 }
 0x2a4   : > { %v1977_v60 = vpop.permute.xlu1 %1976 }
 0x2a5   : > { %2000 = vst.msk [vmem:[#allocation4 + $0x8] sm:$0xff] %vm1998_vm10, %v1977_v60  ;;  %v2089_v58 = vpop.permute.xlu0 %2088 }
 0x2a6   : > { %2338 = vrot.lane.b32.xlu1 %v2315_v59, %s3250_s20  ;;  %2113 = vst.msk [vmem:[#allocation4] sm:$0xff] %vm2112_vm4, %v2089_v58 }
 0x2a8   : > { %v2018_v57 = vpop.permute.xlu1 %2017 }
 0x2a9   : > { %2041 = vst.msk [vmem:[#allocation4 + $0x8] sm:$0xff] %vm2039_vm11, %v2018_v57  ;;  %v2211_v39 = vpop.permute.xlu0 %2210  ;;  %v4270_v57 = vld [vmem:[%s4425_s4] ss:$0 sm:$0xff] }
 0x2aa   : > { %2235 = vst.msk [vmem:[#allocation4] sm:$0xff] %vm2234_vm12, %v2211_v39 }
 0x2ac   : > { %v2091_v4 = vpop.permute.xlu1 %2090 }
 0x2ad   : > { %2114 = vst.msk [vmem:[#allocation4 + $0x8] sm:$0xff] %vm2112_vm4, %v2091_v4  ;;  %v2252_v18 = vpop.permute.xlu0 %2251 }
 0x2ae   : > { %2276 = vst.msk [vmem:[#allocation4] sm:$0xff] %vm2275_vm13, %v2252_v18 }
 0x2b0   : > { %v2213_v52 = vpop.permute.xlu1 %2212 }
 0x2b1   : > { %2236 = vst.msk [vmem:[#allocation4 + $0x8] sm:$0xff] %vm2234_vm12, %v2213_v52  ;;  %v2325_v34 = vpop.permute.xlu0 %2324 }
 0x2b2   : > { %2349 = vst.msk [vmem:[#allocation4] sm:$0xff] %vm2348_vm7, %v2325_v34 }
 0x2b4   : > { %v2254_v45 = vpop.permute.xlu1 %2253 }
 0x2b5   : > { %2277 = vst.msk [vmem:[#allocation4 + $0x8] sm:$0xff] %vm2275_vm13, %v2254_v45  ;;  %v2327_v50 = vpop.permute.xlu0 %2326 }
 0x2b6   : > { %2350 = vst.msk [vmem:[#allocation4 + $0x8] sm:$0xff] %vm2348_vm7, %v2327_v50 }
 0x2b8   : > { %v1784_v38 = vpop.permute.xlu1 %1783 }
 0x2b9   : > { %1806 = vst.msk [vmem:[#allocation4 + $0x10] sm:$0xff] %vm1803_vm8, %v1784_v38  ;;  %v1857_v51 = vpop.permute.xlu0 %1856  ;;  %v2357_v30 = vld [vmem:[#allocation4] sm:$0xff] }
 0x2ba   : > { %1879 = vst.msk [vmem:[#allocation4 + $0x10] sm:$0xff] %vm1876_vm9, %v1857_v51  ;;  %3091 = vmatprep.mubr.msk.bf16.mxu1 %vm2408_vm14, %v2357_v30 }
 0x2bc   : > { %v1786_v63 = vpop.permute.xlu1 %1785 }
 0x2bd   : > { %1807 = vst.msk [vmem:[#allocation4 + $0x18] sm:$0xff] %vm1803_vm8, %v1786_v63  ;;  %v1979_v40 = vpop.permute.xlu0 %1978  ;;  %v2358_v43 = vld [vmem:[#allocation4 + $0x8] sm:$0xff] }
 0x2be   : > { %2001 = vst.msk [vmem:[#allocation4 + $0x10] sm:$0xff] %vm1998_vm10, %v1979_v40  ;;  %3092 = vmatmul.mubr.msk.bf16.vlgmr.msra.gmra.mrb[8].mxu1 %vm2408_vm14, %v2358_v43 }
 0x2c0   : > { %v1859_v3 = vpop.permute.xlu1 %1858 }
 0x2c1   : > { %1880 = vst.msk [vmem:[#allocation4 + $0x18] sm:$0xff] %vm1876_vm9, %v1859_v3  ;;  %v2020_v55 = vpop.permute.xlu0 %2019 }
 0x2c2   : > { %2042 = vst.msk [vmem:[#allocation4 + $0x10] sm:$0xff] %vm2039_vm11, %v2020_v55 }
 0x2c4   : > { %v1981_v41 = vpop.permute.xlu1 %1980 }
 0x2c5   : > { %2002 = vst.msk [vmem:[#allocation4 + $0x18] sm:$0xff] %vm1998_vm10, %v1981_v41  ;;  %v2093_v54 = vpop.permute.xlu0 %2092 }
 0x2c6   : > { %2115 = vst.msk [vmem:[#allocation4 + $0x10] sm:$0xff] %vm2112_vm4, %v2093_v54 }
 0x2c8   : > { %v2022_v10 = vpop.permute.xlu1 %2021 }
 0x2c9   : > { %2043 = vst.msk [vmem:[#allocation4 + $0x18] sm:$0xff] %vm2039_vm11, %v2022_v10  ;;  %v2215_v44 = vpop.permute.xlu0 %2214 }
 0x2ca   : > { %2237 = vst.msk [vmem:[#allocation4 + $0x10] sm:$0xff] %vm2234_vm12, %v2215_v44 }
 0x2cc   : > { %v2095_v15 = vpop.permute.xlu1 %2094 }
 0x2cd   : > { %2116 = vst.msk [vmem:[#allocation4 + $0x18] sm:$0xff] %vm2112_vm4, %v2095_v15  ;;  %v2256_v56 = vpop.permute.xlu0 %2255 }
 0x2ce   : > { %2278 = vst.msk [vmem:[#allocation4 + $0x10] sm:$0xff] %vm2275_vm13, %v2256_v56 }
 0x2d0   : > { %v2217_v42 = vpop.permute.xlu1 %2216 }
 0x2d1   : > { %2238 = vst.msk [vmem:[#allocation4 + $0x18] sm:$0xff] %vm2234_vm12, %v2217_v42  ;;  %v2329_v29 = vpop.permute.xlu0 %2328 }
 0x2d2   : > { %2351 = vst.msk [vmem:[#allocation4 + $0x10] sm:$0xff] %vm2348_vm7, %v2329_v29 }
 0x2d4   : > { %v2258_v6 = vpop.permute.xlu1 %2257 }
 0x2d5   : > { %2279 = vst.msk [vmem:[#allocation4 + $0x18] sm:$0xff] %vm2275_vm13, %v2258_v6  ;;  %v2331_v21 = vpop.permute.xlu0 %2330 }
 0x2d6   : > { %2352 = vst.msk [vmem:[#allocation4 + $0x18] sm:$0xff] %vm2348_vm7, %v2331_v21 }
 0x2d8   : > { %v1788_v13 = vpop.permute.xlu1 %1787 }
 0x2d9   : > { %1808 = vst.msk [vmem:[#allocation4 + $0x20] sm:$0xff] %vm1803_vm8, %v1788_v13  ;;  %v1861_v49 = vpop.permute.xlu0 %1860  ;;  %v2359_v62 = vld [vmem:[#allocation4 + $0x10] sm:$0xff] }
 0x2da   : > { %1881 = vst.msk [vmem:[#allocation4 + $0x20] sm:$0xff] %vm1876_vm9, %v1861_v49  ;;  %3095 = vmatprep.mubr.msk.bf16.mxu1 %vm2408_vm14, %v2359_v62 }
 0x2dc   : > { %v1790_v53 = vpop.permute.xlu1 %1789 }
 0x2dd   : > { %1809 = vst.msk [vmem:[#allocation4 + $0x28] sm:$0xff] %vm1803_vm8, %v1790_v53  ;;  %v1983_v26 = vpop.permute.xlu0 %1982  ;;  %v2360_v35 = vld [vmem:[#allocation4 + $0x18] sm:$0xff] }
 0x2de   : > { %2003 = vst.msk [vmem:[#allocation4 + $0x20] sm:$0xff] %vm1998_vm10, %v1983_v26  ;;  %3096 = vmatmul.mubr.msk.bf16.gmra.mrb[12].mxu1 %vm2408_vm14, %v2360_v35 }
 0x2e0   : > { %v1863_v11 = vpop.permute.xlu1 %1862 }
 0x2e1   : > { %1882 = vst.msk [vmem:[#allocation4 + $0x28] sm:$0xff] %vm1876_vm9, %v1863_v11  ;;  %v2024_v46 = vpop.permute.xlu0 %2023 }
 0x2e2   : > { %2044 = vst.msk [vmem:[#allocation4 + $0x20] sm:$0xff] %vm2039_vm11, %v2024_v46 }
 0x2e4   : > { %v1985_v48 = vpop.permute.xlu1 %1984 }
 0x2e5   : > { %2004 = vst.msk [vmem:[#allocation4 + $0x28] sm:$0xff] %vm1998_vm10, %v1985_v48  ;;  %v2097_v37 = vpop.permute.xlu0 %2096 }
 0x2e6   : > { %2117 = vst.msk [vmem:[#allocation4 + $0x20] sm:$0xff] %vm2112_vm4, %v2097_v37 }
 0x2e8   : > { %v2026_v31 = vpop.permute.xlu1 %2025 }
 0x2e9   : > { %2045 = vst.msk [vmem:[#allocation4 + $0x28] sm:$0xff] %vm2039_vm11, %v2026_v31  ;;  %v2219_v20 = vpop.permute.xlu0 %2218 }
 0x2ea   : > { %2239 = vst.msk [vmem:[#allocation4 + $0x20] sm:$0xff] %vm2234_vm12, %v2219_v20 }
 0x2ec   : > { %v2099_v47 = vpop.permute.xlu1 %2098 }
 0x2ed   : > { %2118 = vst.msk [vmem:[#allocation4 + $0x28] sm:$0xff] %vm2112_vm4, %v2099_v47  ;;  %v2260_v27 = vpop.permute.xlu0 %2259 }
 0x2ee   : > { %2280 = vst.msk [vmem:[#allocation4 + $0x20] sm:$0xff] %vm2275_vm13, %v2260_v27 }
 0x2f0   : > { %v2221_v36 = vpop.permute.xlu1 %2220 }
 0x2f1   : > { %2240 = vst.msk [vmem:[#allocation4 + $0x28] sm:$0xff] %vm2234_vm12, %v2221_v36  ;;  %v2333_v9 = vpop.permute.xlu0 %2332 }
 0x2f2   : > { %2353 = vst.msk [vmem:[#allocation4 + $0x20] sm:$0xff] %vm2348_vm7, %v2333_v9 }
 0x2f4   : > { %v2262_v19 = vpop.permute.xlu1 %2261 }
 0x2f5   : > { %2281 = vst.msk [vmem:[#allocation4 + $0x28] sm:$0xff] %vm2275_vm13, %v2262_v19  ;;  %v2335_v25 = vpop.permute.xlu0 %2334 }
 0x2f6   : > { %2354 = vst.msk [vmem:[#allocation4 + $0x28] sm:$0xff] %vm2348_vm7, %v2335_v25 }
 0x2f8   : > { %v1792_v61 = vpop.permute.xlu1 %1791 }
 0x2f9   : > { %1810 = vst.msk [vmem:[#allocation4 + $0x30] sm:$0xff] %vm1803_vm8, %v1792_v61  ;;  %v1865_v59 = vpop.permute.xlu0 %1864  ;;  %v2361_v60 = vld [vmem:[#allocation4 + $0x20] sm:$0xff] }
 0x2fa   : > { %1883 = vst.msk [vmem:[#allocation4 + $0x30] sm:$0xff] %vm1876_vm9, %v1865_v59  ;;  %3099 = vmatprep.mubr.msk.bf16.mxu1 %vm2408_vm14, %v2361_v60 }
 0x2fc   : > { %v1794_v58 = vpop.permute.xlu1 %1793  ;;  %v3111_v18 = vpop.f32.mrb[12].mxu0 }
 0x2fd   : > { %1811 = vst.msk [vmem:[#allocation4 + $0x38] sm:$0xff] %vm1803_vm8, %v1794_v58  ;;  %v2362_v39 = vld [vmem:[#allocation4 + $0x28] sm:$0xff]  ;;  %v1987_v4 = vpop.permute.xlu0 %1986  ;;  %v2620_v52 = vadd.f32 %v3111_v18, %v4270_v57  ;;  %v2611_v34 = vpop.f32.mrb[13].mxu0 }
 0x2fe   : > { %3100 = vmatmul.mubr.msk.bf16.gmra.mrb[16].mxu1 %vm2408_vm14, %v2362_v39  ;;  %2005 = vst.msk [vmem:[#allocation4 + $0x30] sm:$0xff] %vm1998_vm10, %v1987_v4  ;;  %v3112_v50 = vpop.f32.mrb[14].mxu0  ;;  %v2612_v51 = vadd.f32 %v4270_v57, %v2611_v34 }
 0x2ff   : > { %v2623_v30 = vadd.f32 %v3112_v50, %v4270_v57  ;;  %2710 = vrot.lane.b32.xlu0 %v2620_v52, %s3239_s10  ;;  %v2614_v63 = vpop.f32.mrb[15].mxu0  ;;  %v4324_v52 = vld [vmem:[%s4429_s8] ss:$0 sm:$0xff] }
 0x300   : > { %v1867_v45 = vpop.permute.xlu1 %1866  ;;  %v2615_v40 = vadd.f32 %v4270_v57, %v2614_v63 }
 0x301   : > { %1884 = vst.msk [vmem:[#allocation4 + $0x38] sm:$0xff] %vm1876_vm9, %v1867_v45  ;;  %v2028_v38 = vpop.permute.xlu0 %2027  ;;  %2712 = vrot.lane.b32.xlu1 %v2623_v30, %s3239_s10 }
 0x302   : > { %2046 = vst.msk [vmem:[#allocation4 + $0x30] sm:$0xff] %vm2039_vm11, %v2028_v38 }
 0x303   : > { %2706 = vrot.lane.b32.xlu0 %v2612_v51, %s3239_s10 }
 0x304   : > { %v1989_v43 = vpop.permute.xlu1 %1988  ;;  %v3115_v55 = vpop.f32.mrb[16].mxu0 }
 0x305   : > { %2006 = vst.msk [vmem:[#allocation4 + $0x38] sm:$0xff] %vm1998_vm10, %v1989_v43  ;;  %v2101_v3 = vpop.permute.xlu0 %2100  ;;  %2708 = vrot.lane.b32.xlu1 %v2615_v40, %s3239_s10  ;;  %v2636_v41 = vadd.f32 %v3115_v55, %v4270_v57  ;;  %v2627_v54 = vpop.f32.mrb[17].mxu0 }
 0x306   : > { %2119 = vst.msk [vmem:[#allocation4 + $0x30] sm:$0xff] %vm2112_vm4, %v2101_v3  ;;  %v3116_v44 = vpop.f32.mrb[18].mxu0  ;;  %v2628_v56 = vadd.f32 %v4270_v57, %v2627_v54 }
 0x307   : > { %v2639_v42 = vadd.f32 %v3116_v44, %v4270_v57  ;;  %2718 = vrot.lane.b32.xlu0 %v2636_v41, %s3239_s10  ;;  %v2630_v29 = vpop.f32.mrb[19].mxu0 }
 0x308   : > { %v2030_v10 = vpop.permute.xlu1 %2029  ;;  %v2631_v6 = vadd.f32 %v4270_v57, %v2630_v29 }
 0x309   : > { %2047 = vst.msk [vmem:[#allocation4 + $0x38] sm:$0xff] %vm2039_vm11, %v2030_v10  ;;  %v2223_v15 = vpop.permute.xlu0 %2222  ;;  %2720 = vrot.lane.b32.xlu1 %v2639_v42, %s3239_s10 }
 0x30a   : > { %2241 = vst.msk [vmem:[#allocation4 + $0x30] sm:$0xff] %vm2234_vm12, %v2223_v15 }
 0x30b   : > { %2714 = vrot.lane.b32.xlu0 %v2628_v56, %s3239_s10 }
 0x30c   : > { %v2103_v21 = vpop.permute.xlu1 %2102  ;;  %v3119_v49 = vpop.f32.mrb[20].mxu0 }
 0x30d   : > { %2120 = vst.msk [vmem:[#allocation4 + $0x38] sm:$0xff] %vm2112_vm4, %v2103_v21  ;;  %v2264_v13 = vpop.permute.xlu0 %2263  ;;  %2716 = vrot.lane.b32.xlu1 %v2631_v6, %s3239_s10  ;;  %v2652_v62 = vadd.f32 %v3119_v49, %v4270_v57  ;;  %v2643_v53 = vpop.f32.mrb[21].mxu0 }
 0x30e   : > { %2282 = vst.msk [vmem:[#allocation4 + $0x30] sm:$0xff] %vm2275_vm13, %v2264_v13  ;;  %v3120_v35 = vpop.f32.mrb[22].mxu0  ;;  %v2644_v46 = vadd.f32 %v4270_v57, %v2643_v53 }
 0x30f   : > { %v2655_v48 = vadd.f32 %v3120_v35, %v4270_v57  ;;  %2726 = vrot.lane.b32.xlu0 %v2652_v62, %s3239_s10  ;;  %v2646_v37 = vpop.f32.mrb[23].mxu0 }
 0x310   : > { %v2225_v26 = vpop.permute.xlu1 %2224  ;;  %v2647_v31 = vadd.f32 %v4270_v57, %v2646_v37 }
 0x311   : > { %2242 = vst.msk [vmem:[#allocation4 + $0x38] sm:$0xff] %vm2234_vm12, %v2225_v26  ;;  %v2337_v11 = vpop.permute.xlu0 %2336  ;;  %2728 = vrot.lane.b32.xlu1 %v2655_v48, %s3239_s10 }
 0x312   : > { %2355 = vst.msk [vmem:[#allocation4 + $0x30] sm:$0xff] %vm2348_vm7, %v2337_v11 }
 0x313   : > { %2722 = vrot.lane.b32.xlu0 %v2644_v46, %s3239_s10 }
 0x314   : > { %v2266_v20 = vpop.permute.xlu1 %2265  ;;  %v3123_v47 = vpop.f32.mrb[24].mxu0 }
 0x315   : > { %2283 = vst.msk [vmem:[#allocation4 + $0x38] sm:$0xff] %vm2275_vm13, %v2266_v20  ;;  %2724 = vrot.lane.b32.xlu1 %v2647_v31, %s3239_s10  ;;  %v2659_v27 = vpop.f32.mrb[25].mxu0  ;;  %v2668_v59 = vadd.f32 %v3123_v47, %v4270_v57 }
 0x316   : > { %v2660_v9 = vadd.f32 %v4270_v57, %v2659_v27  ;;  %v3124_v19 = vpop.f32.mrb[26].mxu0 }
 0x317   : > { %v2662_v61 = vpop.f32.mrb[27].mxu0  ;;  %v2671_v58 = vadd.f32 %v3124_v19, %v4270_v57 }
 0x318   : > { %v2339_v36 = vpop.permute.xlu1 %2338  ;;  %v2663_v60 = vadd.f32 %v4270_v57, %v2662_v61  ;;  %2730 = vrot.lane.b32.xlu0 %v2660_v9, %s3239_s10 }
 0x319   : > { %2356 = vst.msk [vmem:[#allocation4 + $0x38] sm:$0xff] %vm2348_vm7, %v2339_v36  ;;  %v2363_v25 = vld [vmem:[#allocation4 + $0x30] sm:$0xff] }
 0x31a   : > { %3103 = vmatprep.mubr.msk.bf16.mxu1 %vm2408_vm14, %v2363_v25  ;;  %2732 = vrot.lane.b32.xlu1 %v2663_v60, %s3239_s10 }
 0x31c   : > { %2734 = vrot.lane.b32.xlu0 %v2668_v59, %s3239_s10 }
 0x31e   : > { %2736 = vrot.lane.b32.xlu1 %v2671_v58, %s3239_s10 }
 0x320   : > { %v2364_v39 = vld [vmem:[#allocation4 + $0x38] sm:$0xff] }
 0x321   : > { %3104 = vmatmul.mubr.msk.bf16.gmra.mrb[20].mxu1 %vm2408_vm14, %v2364_v39 }
 0x371   : > { %v2711_v4 = vpop.permute.xlu0 %2710 }
 0x373   : > { %v2713_v18 = vpop.permute.xlu1 %2712 }
 0x375   : > { %v2707_v50 = vpop.permute.xlu0 %2706 }
 0x377   : > { %v2709_v3 = vpop.permute.xlu1 %2708 }
 0x379   : > { %v2719_v6 = vpop.permute.xlu0 %2718 }
 0x37d   : > { %v2715_v49 = vpop.permute.xlu0 %2714 }
 0x381   : > { %v2727_v61 = vpop.permute.xlu0 %2726 }
 0x385   : > { %v2723_v58 = vpop.permute.xlu0 %2722 }
 0x391   : > { %v3093_v34 = vpop.f32.mrb[8].mxu1 }
 0x392   : > { %v2480_v45 = vadd.f32 %v3093_v34, %v4324_v52  ;;  %v2471_v57 = vpop.f32.mrb[9].mxu1 }
 0x393   : > { %v2472_v38 = vadd.f32 %v4324_v52, %v2471_v57  ;;  %v3094_v51 = vpop.f32.mrb[10].mxu1 }
 0x394   : > { %v2676_v30 = vadd.f32 %v2480_v45, %v3364_v7  ;;  %v2756_v63 = vadd.f32 %v2711_v4, %v2480_v45  ;;  %v2483_v40 = vadd.f32 %v3094_v51, %v4324_v52  ;;  %v2474_v43 = vpop.f32.mrb[11].mxu1 }
 0x395   : > { %v2674_v55 = vadd.f32 %v2472_v38, %v3349_v0  ;;  %v2475_v41 = vadd.f32 %v4324_v52, %v2474_v43  ;;  %v2754_v54 = vadd.f32 %v2707_v50, %v2472_v38 }
 0x396   : > { %v2772_v10 = vsel %vm562_vm0, %v2676_v30, %v2756_v63  ;;  %v2677_v44 = vadd.f32 %v2483_v40, %v3367_v8  ;;  %v2757_v15 = vadd.f32 %v2713_v18, %v2483_v40  ;;  %v2721_v8 = vpop.permute.xlu1 %2720 }
 0x397   : > { %2788 = vst.msk [vmem:[%s3346_s27 + $0x10] sm:$0xff] %vm1663_vm5, %v2772_v10  ;;  %v2675_v7 = vadd.f32 %v2475_v41, %v3352_v1  ;;  %v2770_v56 = vsel %vm562_vm0, %v2674_v55, %v2754_v54  ;;  %v2755_v42 = vadd.f32 %v2709_v3, %v2475_v41  ;;  %v2731_v54 = vpop.permute.xlu0 %2730 }
 0x398   : > { %v2773_v29 = vsel %vm562_vm0, %v2677_v44, %v2757_v15  ;;  %2786 = vst.msk [vmem:[%s3346_s27] sm:$0xff] %vm1663_vm5, %v2770_v56 }
 0x399   : > { %2789 = vst.msk [vmem:[%s3346_s27 + $0x18] sm:$0xff] %vm1663_vm5, %v2773_v29  ;;  %v2771_v0 = vsel %vm562_vm0, %v2675_v7, %v2755_v42 }
 0x39a   : > { %2787 = vst.msk [vmem:[%s3346_s27 + $0x8] sm:$0xff] %vm1663_vm5, %v2771_v0  ;;  %v2717_v48 = vpop.permute.xlu1 %2716 }
 0x39b   : > { %v2735_v15 = vpop.permute.xlu0 %2734 }
 0x3b1   : > { %v3097_v21 = vpop.f32.mrb[12].mxu1 }
 0x3b2   : > { %v2496_v13 = vadd.f32 %v3097_v21, %v4324_v52  ;;  %v2487_v1 = vpop.f32.mrb[13].mxu1 }
 0x3b3   : > { %v2488_v62 = vadd.f32 %v4324_v52, %v2487_v1  ;;  %v3098_v53 = vpop.f32.mrb[14].mxu1 }
 0x3b4   : > { %v2680_v26 = vadd.f32 %v2496_v13, %v3396_v24  ;;  %v2760_v35 = vadd.f32 %v2719_v6, %v2496_v13  ;;  %v2499_v11 = vadd.f32 %v3098_v53, %v4324_v52  ;;  %v2490_v46 = vpop.f32.mrb[15].mxu1 }
 0x3b5   : > { %v2678_v37 = vadd.f32 %v2488_v62, %v3380_v16  ;;  %v2491_v31 = vadd.f32 %v4324_v52, %v2490_v46  ;;  %v2758_v20 = vadd.f32 %v2715_v49, %v2488_v62 }
 0x3b6   : > { %v2776_v47 = vsel %vm562_vm0, %v2680_v26, %v2760_v35  ;;  %v2681_v27 = vadd.f32 %v2499_v11, %v3406_v28  ;;  %v2761_v36 = vadd.f32 %v2721_v8, %v2499_v11  ;;  %v2729_v28 = vpop.permute.xlu1 %2728 }
 0x3b7   : > { %2792 = vst.msk [vmem:[%s3346_s27 + $0x30] sm:$0xff] %vm1663_vm5, %v2776_v47  ;;  %v2679_v24 = vadd.f32 %v2491_v31, %v3383_v17  ;;  %v2774_v9 = vsel %vm562_vm0, %v2678_v37, %v2758_v20  ;;  %v2759_v19 = vadd.f32 %v2717_v48, %v2491_v31 }
 0x3b8   : > { %v2777_v25 = vsel %vm562_vm0, %v2681_v27, %v2761_v36  ;;  %2790 = vst.msk [vmem:[%s3346_s27 + $0x20] sm:$0xff] %vm1663_vm5, %v2774_v9 }
 0x3b9   : > { %2793 = vst.msk [vmem:[%s3346_s27 + $0x38] sm:$0xff] %vm1663_vm5, %v2777_v25  ;;  %v2775_v16 = vsel %vm562_vm0, %v2679_v24, %v2759_v19 }
 0x3ba   : > { %2791 = vst.msk [vmem:[%s3346_s27 + $0x28] sm:$0xff] %vm1663_vm5, %v2775_v16  ;;  %v2725_v50 = vpop.permute.xlu1 %2724 }
 0x3d1   : > { %v3101_v59 = vpop.f32.mrb[16].mxu1 }
 0x3d2   : > { %v2512_v60 = vadd.f32 %v3101_v59, %v4324_v52  ;;  %v2503_v17 = vpop.f32.mrb[17].mxu1 }
 0x3d3   : > { %v2504_v39 = vadd.f32 %v4324_v52, %v2503_v17  ;;  %v3102_v4 = vpop.f32.mrb[18].mxu1 }
 0x3d4   : > { %v2684_v18 = vadd.f32 %v2512_v60, %v3373_v12  ;;  %v2764_v34 = vadd.f32 %v2727_v61, %v2512_v60  ;;  %v2515_v45 = vadd.f32 %v3102_v4, %v4324_v52  ;;  %v2506_v57 = vpop.f32.mrb[19].mxu1 }
 0x3d5   : > { %v2682_v38 = vadd.f32 %v2504_v39, %v3355_v2  ;;  %v2507_v51 = vadd.f32 %v4324_v52, %v2506_v57  ;;  %v2762_v30 = vadd.f32 %v2723_v58, %v2504_v39 }
 0x3d6   : > { %v2780_v63 = vsel %vm562_vm0, %v2684_v18, %v2764_v34  ;;  %v2685_v40 = vadd.f32 %v2515_v45, %v3376_v14  ;;  %v2765_v43 = vadd.f32 %v2729_v28, %v2515_v45  ;;  %v2733_v14 = vpop.permute.xlu1 %2732 }
 0x3d7   : > { %2796 = vst.msk [vmem:[%s3346_s27 + $0x50] sm:$0xff] %vm1663_vm5, %v2780_v63  ;;  %v2683_v12 = vadd.f32 %v2507_v51, %v3360_v5  ;;  %v2778_v3 = vsel %vm562_vm0, %v2682_v38, %v2762_v30  ;;  %v2763_v55 = vadd.f32 %v2725_v50, %v2507_v51 }
 0x3d8   : > { %v2781_v41 = vsel %vm562_vm0, %v2685_v40, %v2765_v43  ;;  %2794 = vst.msk [vmem:[%s3346_s27 + $0x40] sm:$0xff] %vm1663_vm5, %v2778_v3 }
 0x3d9   : > { %2797 = vst.msk [vmem:[%s3346_s27 + $0x58] sm:$0xff] %vm1663_vm5, %v2781_v41  ;;  %v2779_v2 = vsel %vm562_vm0, %v2683_v12, %v2763_v55 }
 0x3da   : > { %2795 = vst.msk [vmem:[%s3346_s27 + $0x48] sm:$0xff] %vm1663_vm5, %v2779_v2  ;;  %v2737_v8 = vpop.permute.xlu1 %2736 }
 0x3f4   : > { %v3105_v10 = vpop.f32.mrb[20].mxu1 }
 0x3f5   : > { %v2528_v44 = vadd.f32 %v3105_v10, %v4324_v52  ;;  %v2519_v5 = vpop.f32.mrb[21].mxu1 }
 0x3f6   : > { %v2520_v7 = vadd.f32 %v4324_v52, %v2519_v5  ;;  %v3106_v56 = vpop.f32.mrb[22].mxu1 }
 0x3f7   : > { %v2688_v42 = vadd.f32 %v2528_v44, %v3415_v32  ;;  %v2768_v29 = vadd.f32 %v2735_v15, %v2528_v44  ;;  %v2531_v0 = vadd.f32 %v3106_v56, %v4324_v52  ;;  %v2522_v6 = vpop.f32.mrb[23].mxu1 }
 0x3f8   : > { %v2686_v21 = vadd.f32 %v2520_v7, %v3390_v22  ;;  %v2766_v13 = vadd.f32 %v2731_v54, %v2520_v7  ;;  %v2523_v1 = vadd.f32 %v4324_v52, %v2522_v6 }
 0x3f9   : > { %v2784_v49 = vsel %vm562_vm0, %v2688_v42, %v2768_v29  ;;  %v2689_v62 = vadd.f32 %v2531_v0, %v3418_v33  ;;  %v2769_v53 = vadd.f32 %v2737_v8, %v2531_v0 }
 0x3fa   : > { %2800 = vst.msk [vmem:[%s3346_s27 + $0x70] sm:$0xff] %vm1663_vm5, %v2784_v49  ;;  %v2782_v32 = vsel %vm562_vm0, %v2686_v21, %v2766_v13  ;;  %v2687_v26 = vadd.f32 %v2523_v1, %v3393_v23  ;;  %v2767_v35 = vadd.f32 %v2733_v14, %v2523_v1 }
 0x3fb   : > { %2798 = vst.msk [vmem:[%s3346_s27 + $0x60] sm:$0xff] %vm1663_vm5, %v2782_v32  ;;  %v2785_v11 = vsel %vm562_vm0, %v2689_v62, %v2769_v53 }
 0x3fc   : > { %2801 = vst.msk [vmem:[%s3346_s27 + $0x78] sm:$0xff] %vm1663_vm5, %v2785_v11  ;;  %v2783_v22 = vsel %vm562_vm0, %v2687_v26, %v2767_v35 }
 0x3fd   : > { %2799 = vst.msk [vmem:[%s3346_s27 + $0x68] sm:$0xff] %vm1663_vm5, %v2783_v22 }
 0x3fe PF: > { %s19_s13 = sadd.s32 1, %s3235_s13   ;;  %s4446_s30 = smov %s3227_s11 }
 0x3ff   : > { %p16_p1 = scmp.ge.s32.totalorder %s19_s13, 6   ;;  %s4447_s10 = smov %s3231_s12 }
 0x400   : > { %s4448_s11 = smov %s4451_s14  ;;  %s4449_s12 = smov %s4455_s15 }
 0x401   :  { %18 = sbr.rel (!%p16_p1) target bundleno = 3 (0x3), region = 106 }

</bundles_post_ra>
